<compile_context>
chip_gen: v6e
topology: v6e:2x2x1
jax: 0.10.0
libtpu: 0.0.40
codegen_flags: <defaults>
</compile_context>

<pallas_src>
import jax
import jax.numpy as jnp
from jax import lax
from jax.experimental import pallas as pl
from jax.experimental.pallas import tpu as pltpu

SOS_TOKEN = 1
SUBLANE = 8


def _round_up(x, m):
    return ((x + m - 1) // m) * m


# ----------------------------- shared math helpers -----------------------------
def _sigmoid(x):
    # stable sigmoid riding the EUP tanh path (no f32 divide / exp overflow)
    return 0.5 * (jnp.tanh(0.5 * x) + 1.0)


def _gru_step(gi, h, w_hh, b_hn_b, H):
    """One GRU step. gi = x@W_ih + (b_ih + b_hh[rz]) precomputed (hoisted GEMM).

    gi:     (B, 3H) f32, gate order [r | z | n]; r/z columns already include b_hh.
    h:      (B, H)  f32 recurrent state.
    w_hh:   (H, 3H) bf16.
    b_hn_b: (B, H)  f32 pre-broadcast hidden bias of the n gate.
    """
    gh = jnp.dot(h.astype(jnp.bfloat16), w_hh, preferred_element_type=jnp.float32)
    r = _sigmoid(gi[:, 0:H] + gh[:, 0:H])
    z = _sigmoid(gi[:, H:2 * H] + gh[:, H:2 * H])
    n = jnp.tanh(gi[:, 2 * H:3 * H] + r * (gh[:, 2 * H:3 * H] + b_hn_b))
    return (1.0 - z) * n + z * h


def _split_gru_bias(b_ih, b_hh, H):
    """b_gi folds b_ih (+ b_hh for r,z) into the hoisted input GEMM; b_hn stays separate."""
    b_gi = jnp.concatenate([b_ih[:, :2 * H] + b_hh[:, :2 * H], b_ih[:, 2 * H:]],
                           axis=1).astype(jnp.float32)          # (1, 3H)
    b_hn = b_hh[:, 2 * H:].astype(jnp.float32)                   # (1, H)
    return b_gi, b_hn


# --------------------------- fused seq2seq loss kernel ---------------------------
def seq2seq_loss_kernel(
        enc_x_ref, ilen_ref, enc_w_ih_ref, enc_w_hh_ref, enc_b_gi_ref, enc_b_hn_ref,
        dec_x_ref, dec_w_ih_ref, dec_w_hh_ref, dec_b_gi_ref, dec_b_hn_ref,
        tgt_ref, wgt_ref, w_out_ref, b_out_ref,
        loss_ref,
        enc_gi_scr, dec_gi_scr, h_all_scr, m_scr, s_scr, p_scr):
    v = pl.program_id(0)
    num_v = pl.num_programs(0)
    B, H = ilen_ref.shape
    S = enc_gi_scr.shape[0] // B
    T = dec_gi_scr.shape[0] // B
    TB = dec_gi_scr.shape[0]

    # ---------- Phase 1 (first vocab tile only): projections + recurrences ----------
    @pl.when(v == 0)
    def _recurrence():
        # Hoisted input projections: one big GEMM each, bias folded in once.
        enc_gi_scr[...] = jnp.dot(enc_x_ref[...], enc_w_ih_ref[...],
                                  preferred_element_type=jnp.float32) + enc_b_gi_ref[...]
        dec_gi_scr[...] = jnp.dot(dec_x_ref[...], dec_w_ih_ref[...],
                                  preferred_element_type=jnp.float32) + dec_b_gi_ref[...]

        ilen = ilen_ref[...]                                   # (B, H) int32, loaded once
        w_hh_e = enc_w_hh_ref[...]                             # loop-invariant bf16
        b_hn_e = jnp.broadcast_to(enc_b_hn_ref[...], (B, H))   # broadcast hoisted

        def enc_step(t, h):
            row = pl.multiple_of(t * B, B)                     # sublane-tile aligned
            gi = enc_gi_scr[pl.ds(row, B), :]
            h_new = _gru_step(gi, h, w_hh_e, b_hn_e, H)
            return jnp.where(t < ilen, h_new, h)               # freeze past input_length

        h = lax.fori_loop(0, S, enc_step, jnp.zeros((B, H), jnp.float32), unroll=True)

        w_hh_d = dec_w_hh_ref[...]
        b_hn_d = jnp.broadcast_to(dec_b_hn_ref[...], (B, H))

        def dec_step(t, h):
            row = pl.multiple_of(t * B, B)
            gi = dec_gi_scr[pl.ds(row, B), :]
            h_new = _gru_step(gi, h, w_hh_d, b_hn_d, H)
            h_all_scr[pl.ds(row, B), :] = h_new
            return h_new

        lax.fori_loop(0, T, dec_step, h, unroll=True)

        # online-logsumexp / picked-logit carries across vocab tiles
        m_scr[...] = jnp.full((TB, 1), -1e30, jnp.float32)
        s_scr[...] = jnp.zeros((TB, 1), jnp.float32)
        p_scr[...] = jnp.zeros((TB, 1), jnp.float32)

    # ------- Phase 2 (every vocab tile): projection tile + online LSE + gather -------
    h_all = h_all_scr[...].astype(jnp.bfloat16)                            # (TB, H)
    logits = jnp.dot(h_all, w_out_ref[...],
                     preferred_element_type=jnp.float32) + b_out_ref[...]  # (TB, VT) f32
    m_prev = m_scr[...]
    m_new = jnp.maximum(m_prev, jnp.max(logits, axis=-1, keepdims=True))
    s_scr[...] = (jnp.exp(m_prev - m_new) * s_scr[...]
                  + jnp.sum(jnp.exp(logits - m_new), axis=-1, keepdims=True))
    m_scr[...] = m_new
    col0 = v * w_out_ref.shape[1]
    ids = lax.broadcasted_iota(jnp.int32, logits.shape, 1) + col0
    p_scr[...] = p_scr[...] + jnp.sum(jnp.where(ids == tgt_ref[...], logits, 0.0),
                                      axis=-1, keepdims=True)

    # --------------- Finalize on last vocab tile: masked NLL -> scalar ----------------
    @pl.when(v == num_v - 1)
    def _finalize():
        nll = (m_scr[...] + jnp.log(s_scr[...])) - p_scr[...]              # (TB, 1)
        # wgt folds (t < target_length), 1/target_length, 1/B and batch padding.
        loss_ref[...] = jnp.sum(nll * wgt_ref[...], axis=0, keepdims=True)


# ---------------------------- TranslationModel.forward ---------------------------
def translation_model_forward(params, batch):
    input_seq = jnp.asarray(batch['input'], jnp.int32)          # (B, S)
    target_seq = jnp.asarray(batch['target'], jnp.int32)        # (B, T)
    input_length = jnp.asarray(batch['input_length'], jnp.int32)
    target_length = jnp.asarray(batch['target_length'], jnp.int32)
    B, S = input_seq.shape
    T = target_seq.shape[1]
    E = params['enc_embed'].shape[1]
    H = params['enc_w_hh'].shape[0]
    V = params['dec_w_out'].shape[1]

    # Pad batch to 8 sublanes; padded rows carry zero loss weight.
    Bp = _round_up(B, SUBLANE)
    pad_b = Bp - B
    input_p = jnp.pad(input_seq, ((0, pad_b), (0, 0)))
    target_p = jnp.pad(target_seq, ((0, pad_b), (0, 0)))
    ilen_p = jnp.pad(input_length, (0, pad_b))
    tlen_p = jnp.pad(target_length, (0, pad_b))

    # Time-major, flattened (S*B, E) embeddings (bf16 for the MXU).
    enc_x = (params['enc_embed'][input_p]
             .transpose(1, 0, 2).reshape(S * Bp, E).astype(jnp.bfloat16))
    ilen_b = jnp.broadcast_to(ilen_p[:, None], (Bp, H)).astype(jnp.int32)

    # Teacher forcing (ratio = 1.0): decoder input t is SOS / target[t-1].
    dec_in = jnp.concatenate(
        [jnp.full((Bp, 1), SOS_TOKEN, dtype=jnp.int32), target_p[:, :-1]], axis=1)
    dec_x = (params['dec_embed'][dec_in]
             .transpose(1, 0, 2).reshape(T * Bp, E).astype(jnp.bfloat16))

    enc_w_ih = params['enc_w_ih'].astype(jnp.bfloat16)
    enc_w_hh = params['enc_w_hh'].astype(jnp.bfloat16)
    enc_b_gi, enc_b_hn = _split_gru_bias(params['enc_b_ih'], params['enc_b_hh'], H)
    dec_w_ih = params['dec_w_ih'].astype(jnp.bfloat16)
    dec_w_hh = params['dec_w_hh'].astype(jnp.bfloat16)
    dec_b_gi, dec_b_hn = _split_gru_bias(params['dec_b_ih'], params['dec_b_hh'], H)

    # Vocab padded to the tile width; padded columns pinned to -1e30 via the bias.
    V_TILE = min(512, _round_up(V, 128))
    Vp = _round_up(V, V_TILE)
    w_out = jnp.pad(params['dec_w_out'], ((0, 0), (0, Vp - V))).astype(jnp.bfloat16)
    b_out = jnp.pad(params['dec_b_out'].astype(jnp.float32), ((0, 0), (0, Vp - V)),
                    constant_values=-1e30)

    # Targets and per-row loss weights (length mask, 1/len, 1/B, batch padding folded).
    tgt_flat = jnp.transpose(target_p, (1, 0)).reshape(T * Bp, 1).astype(jnp.int32)
    t_idx = jnp.arange(T, dtype=jnp.int32)[:, None]
    valid_row = (jnp.arange(Bp) < B)[None, :]
    step_mask = (t_idx < tlen_p[None, :]) & valid_row
    inv_len = 1.0 / jnp.maximum(tlen_p, 1).astype(jnp.float32)[None, :]
    wgt_flat = (step_mask.astype(jnp.float32) * inv_len / float(B)).reshape(T * Bp, 1)

    num_v = Vp // V_TILE
    full2 = lambda shape: pl.BlockSpec(shape, lambda v: (0, 0))

    loss = pl.pallas_call(
        seq2seq_loss_kernel,
        out_shape=jax.ShapeDtypeStruct((1, 1), jnp.float32),
        grid=(num_v,),
        in_specs=[
            full2((S * Bp, E)), full2((Bp, H)),
            full2((E, 3 * H)), full2((H, 3 * H)), full2((1, 3 * H)), full2((1, H)),
            full2((T * Bp, E)),
            full2((E, 3 * H)), full2((H, 3 * H)), full2((1, 3 * H)), full2((1, H)),
            full2((T * Bp, 1)), full2((T * Bp, 1)),
            pl.BlockSpec((H, V_TILE), lambda v: (0, v)),
            pl.BlockSpec((1, V_TILE), lambda v: (0, v)),
        ],
        out_specs=pl.BlockSpec((1, 1), lambda v: (0, 0)),
        scratch_shapes=[
            pltpu.VMEM((S * Bp, 3 * H), jnp.float32),   # hoisted encoder gi
            pltpu.VMEM((T * Bp, 3 * H), jnp.float32),   # hoisted decoder gi
            pltpu.VMEM((T * Bp, H), jnp.float32),       # decoder hidden states
            pltpu.VMEM((T * Bp, 1), jnp.float32),       # running max
            pltpu.VMEM((T * Bp, 1), jnp.float32),       # running sum of exp
            pltpu.VMEM((T * Bp, 1), jnp.float32),       # picked (target) logit
        ],
        compiler_params=pltpu.CompilerParams(
            dimension_semantics=("arbitrary",),          # online LSE carries across V tiles
            vmem_limit_bytes=32 * 1024 * 1024),
    )(enc_x, ilen_b, enc_w_ih, enc_w_hh, enc_b_gi, enc_b_hn,
      dec_x, dec_w_ih, dec_w_hh, dec_b_gi, dec_b_hn,
      tgt_flat, wgt_flat, w_out, b_out)
    return loss[0, 0]


# ------------------------------- pure-JAX reference ------------------------------
def _gru_cell_ref(x, h, w_ih, w_hh, b_ih, b_hh):
    H = h.shape[-1]
    gi = jnp.dot(x, w_ih) + b_ih
    gh = jnp.dot(h, w_hh) + b_hh
    r = jax.nn.sigmoid(gi[:, 0:H] + gh[:, 0:H])
    z = jax.nn.sigmoid(gi[:, H:2 * H] + gh[:, H:2 * H])
    n = jnp.tanh(gi[:, 2 * H:3 * H] + r * gh[:, 2 * H:3 * H])
    return (1.0 - z) * n + z * h


def reference_forward(params, batch):
    input_seq = batch['input']
    target_seq = batch['target']
    input_length = batch['input_length']
    target_length = batch['target_length']
    B, S = input_seq.shape
    T = target_seq.shape[1]
    H = params['enc_w_hh'].shape[0]

    enc_emb = jnp.transpose(params['enc_embed'][input_seq], (1, 0, 2))
    h = jnp.zeros((B, H), jnp.float32)
    for t in range(S):
        h_new = _gru_cell_ref(enc_emb[t], h, params['enc_w_ih'], params['enc_w_hh'],
                              params['enc_b_ih'], params['enc_b_hh'])
        h = jnp.where((t < input_length)[:, None], h_new, h)

    dec_in = jnp.concatenate(
        [jnp.full((B, 1), SOS_TOKEN, dtype=target_seq.dtype), target_seq[:, :-1]], axis=1)
    dec_emb = jnp.transpose(params['dec_embed'][dec_in], (1, 0, 2))
    dec_h = h
    acc = jnp.zeros((B,), jnp.float32)
    for t in range(T):
        dec_h = _gru_cell_ref(dec_emb[t], dec_h, params['dec_w_ih'], params['dec_w_hh'],
                              params['dec_b_ih'], params['dec_b_hh'])
        logits = jnp.dot(dec_h, params['dec_w_out']) + params['dec_b_out']
        logp = logits - jax.scipy.special.logsumexp(logits, axis=-1, keepdims=True)
        picked = jnp.take_along_axis(logp, target_seq[:, t][:, None], axis=1)[:, 0]
        acc += (-picked) * (t < target_length).astype(jnp.float32)
    return jnp.mean(acc / target_length.astype(jnp.float32))


# ------------------------------------- setup -------------------------------------
def init_params(key, v_src, v_tgt, E, H):
    ks = jax.random.split(key, 12)
    rn = lambda k, shape: 0.1 * jax.random.normal(k, shape, jnp.float32)
    return {
        'enc_embed': rn(ks[0], (v_src, E)),
        'enc_w_ih': rn(ks[1], (E, 3 * H)), 'enc_w_hh': rn(ks[2], (H, 3 * H)),
        'enc_b_ih': rn(ks[3], (1, 3 * H)), 'enc_b_hh': rn(ks[4], (1, 3 * H)),
        'dec_embed': rn(ks[5], (v_tgt, E)),
        'dec_w_ih': rn(ks[6], (E, 3 * H)), 'dec_w_hh': rn(ks[7], (H, 3 * H)),
        'dec_b_ih': rn(ks[8], (1, 3 * H)), 'dec_b_hh': rn(ks[9], (1, 3 * H)),
        'dec_w_out': rn(ks[10], (H, v_tgt)), 'dec_b_out': rn(ks[11], (1, v_tgt)),
    }


if __name__ == "__main__":
    B, S, T, E, H = 2, 8, 8, 32, 32
    V_SRC, V_TGT = 64, 128

    key = jax.random.PRNGKey(0)
    kp, ki, kt = jax.random.split(key, 3)
    params = init_params(kp, V_SRC, V_TGT, E, H)
    batch = {
        'input': jax.random.randint(ki, (B, S), 0, V_SRC, dtype=jnp.int32),
        'target': jax.random.randint(kt, (B, T), 0, V_TGT, dtype=jnp.int32),
        'input_length': jnp.array([S, 5], dtype=jnp.int32),
        'target_length': jnp.array([T, 6], dtype=jnp.int32),
    }

    loss = jax.block_until_ready(translation_model_forward(params, batch))
    ref = jax.block_until_ready(reference_forward(params, batch))
    assert jnp.isfinite(loss), loss
    # bf16 MXU operands (weights / embeddings / h_all) -> slightly looser tolerance vs f32 ref
    assert jnp.allclose(loss, ref, atol=5e-3, rtol=5e-3), (loss, ref)
    print("KERNEL_OK")
</pallas_src>

<mosaic_0001>
module attributes {stable_mosaic.version = 11 : i64} {
  func.func @seq2seq_loss_kernel(%arg0: i32, %arg1: memref<64x32xbf16, #tpu.memory_space<vmem>>, %arg2: memref<8x32xi32, #tpu.memory_space<vmem>>, %arg3: memref<32x96xbf16, #tpu.memory_space<vmem>>, %arg4: memref<32x96xbf16, #tpu.memory_space<vmem>>, %arg5: memref<1x96xf32, #tpu.memory_space<vmem>>, %arg6: memref<1x32xf32, #tpu.memory_space<vmem>>, %arg7: memref<64x32xbf16, #tpu.memory_space<vmem>>, %arg8: memref<32x96xbf16, #tpu.memory_space<vmem>>, %arg9: memref<32x96xbf16, #tpu.memory_space<vmem>>, %arg10: memref<1x96xf32, #tpu.memory_space<vmem>>, %arg11: memref<1x32xf32, #tpu.memory_space<vmem>>, %arg12: memref<64x1xi32, #tpu.memory_space<vmem>>, %arg13: memref<64x1xf32, #tpu.memory_space<vmem>>, %arg14: memref<32x128xbf16, #tpu.memory_space<vmem>>, %arg15: memref<1x128xf32, #tpu.memory_space<vmem>>, %arg16: memref<1x1xf32, #tpu.memory_space<vmem>>, %arg17: memref<64x96xf32, #tpu.memory_space<vmem>>, %arg18: memref<64x96xf32, #tpu.memory_space<vmem>>, %arg19: memref<64x32xf32, #tpu.memory_space<vmem>>, %arg20: memref<64x1xf32, #tpu.memory_space<vmem>>, %arg21: memref<64x1xf32, #tpu.memory_space<vmem>>, %arg22: memref<64x1xf32, #tpu.memory_space<vmem>>) attributes {dimension_semantics = [#tpu.dimension_semantics<arbitrary>], iteration_bounds = array<i64: 1>, scalar_prefetch = 0 : i64, scratch_operands = 6 : i64, tpu.core_type = #tpu.core_type<tc>, window_params = [{pipeline_mode = #tpu.pipeline_mode<synchronous>, transform_indices = @transform_0, window_bounds = array<i64: 64, 32>}, {pipeline_mode = #tpu.pipeline_mode<synchronous>, transform_indices = @transform_1, window_bounds = array<i64: 8, 32>}, {pipeline_mode = #tpu.pipeline_mode<synchronous>, transform_indices = @transform_2, window_bounds = array<i64: 32, 96>}, {pipeline_mode = #tpu.pipeline_mode<synchronous>, transform_indices = @transform_3, window_bounds = array<i64: 32, 96>}, {pipeline_mode = #tpu.pipeline_mode<synchronous>, transform_indices = @transform_4, window_bounds = array<i64: 1, 96>}, {pipeline_mode = #tpu.pipeline_mode<synchronous>, transform_indices = @transform_5, window_bounds = array<i64: 1, 32>}, {pipeline_mode = #tpu.pipeline_mode<synchronous>, transform_indices = @transform_6, window_bounds = array<i64: 64, 32>}, {pipeline_mode = #tpu.pipeline_mode<synchronous>, transform_indices = @transform_7, window_bounds = array<i64: 32, 96>}, {pipeline_mode = #tpu.pipeline_mode<synchronous>, transform_indices = @transform_8, window_bounds = array<i64: 32, 96>}, {pipeline_mode = #tpu.pipeline_mode<synchronous>, transform_indices = @transform_9, window_bounds = array<i64: 1, 96>}, {pipeline_mode = #tpu.pipeline_mode<synchronous>, transform_indices = @transform_10, window_bounds = array<i64: 1, 32>}, {pipeline_mode = #tpu.pipeline_mode<synchronous>, transform_indices = @transform_11, window_bounds = array<i64: 64, 1>}, {pipeline_mode = #tpu.pipeline_mode<synchronous>, transform_indices = @transform_12, window_bounds = array<i64: 64, 1>}, {transform_indices = @transform_13, window_bounds = array<i64: 32, 128>}, {transform_indices = @transform_14, window_bounds = array<i64: 1, 128>}, {pipeline_mode = #tpu.pipeline_mode<synchronous>, transform_indices = @transform_15, window_bounds = array<i64: 1, 1>}]} {
    %c0_i32 = arith.constant 0 : i32
    %0 = arith.cmpi eq, %arg0, %c0_i32 : i32
    %1 = arith.extui %0 : i1 to i32
    %c0_i32_0 = arith.constant 0 : i32
    %2 = arith.cmpi ne, %1, %c0_i32_0 : i32
    scf.if %2 {
      %c0_26 = arith.constant 0 : index
      %c0_27 = arith.constant 0 : index
      %43 = vector.load %arg1[%c0_26, %c0_27] : memref<64x32xbf16, #tpu.memory_space<vmem>>, vector<64x32xbf16>
      %c0_28 = arith.constant 0 : index
      %c0_29 = arith.constant 0 : index
      %44 = vector.load %arg3[%c0_28, %c0_29] : memref<32x96xbf16, #tpu.memory_space<vmem>>, vector<32x96xbf16>
      %cst_30 = arith.constant dense<0.000000e+00> : vector<64x96xf32>
      %45 = tpu.matmul %43, %44, %cst_30 {dimension_numbers = #tpu.dot_dimension_numbers<[1], [0], [0], [1], [0, 0, 1, 1], [], []>} : vector<64x32xbf16>, vector<32x96xbf16>, vector<64x96xf32> -> vector<64x96xf32>
      %c0_31 = arith.constant 0 : index
      %c0_32 = arith.constant 0 : index
      %46 = vector.load %arg5[%c0_31, %c0_32] : memref<1x96xf32, #tpu.memory_space<vmem>>, vector<1x96xf32>
      %47 = vector.broadcast %46 : vector<1x96xf32> to vector<64x96xf32>
      %48 = arith.addf %45, %47 : vector<64x96xf32>
      %c0_33 = arith.constant 0 : index
      %c0_34 = arith.constant 0 : index
      %49 = vector.load %arg17[%c0_33, %c0_34] : memref<64x96xf32, #tpu.memory_space<vmem>>, vector<64x96xf32>
      tpu.vector_store %arg17[%c0_33, %c0_34], %48 {strides = array<i32>} : memref<64x96xf32, #tpu.memory_space<vmem>>, vector<64x96xf32>,
      %c0_35 = arith.constant 0 : index
      %c0_36 = arith.constant 0 : index
      %50 = vector.load %arg7[%c0_35, %c0_36] : memref<64x32xbf16, #tpu.memory_space<vmem>>, vector<64x32xbf16>
      %c0_37 = arith.constant 0 : index
      %c0_38 = arith.constant 0 : index
      %51 = vector.load %arg8[%c0_37, %c0_38] : memref<32x96xbf16, #tpu.memory_space<vmem>>, vector<32x96xbf16>
      %cst_39 = arith.constant dense<0.000000e+00> : vector<64x96xf32>
      %52 = tpu.matmul %50, %51, %cst_39 {dimension_numbers = #tpu.dot_dimension_numbers<[1], [0], [0], [1], [0, 0, 1, 1], [], []>} : vector<64x32xbf16>, vector<32x96xbf16>, vector<64x96xf32> -> vector<64x96xf32>
      %c0_40 = arith.constant 0 : index
      %c0_41 = arith.constant 0 : index
      %53 = vector.load %arg10[%c0_40, %c0_41] : memref<1x96xf32, #tpu.memory_space<vmem>>, vector<1x96xf32>
      %54 = vector.broadcast %53 : vector<1x96xf32> to vector<64x96xf32>
      %55 = arith.addf %52, %54 : vector<64x96xf32>
      %c0_42 = arith.constant 0 : index
      %c0_43 = arith.constant 0 : index
      %56 = vector.load %arg18[%c0_42, %c0_43] : memref<64x96xf32, #tpu.memory_space<vmem>>, vector<64x96xf32>
      tpu.vector_store %arg18[%c0_42, %c0_43], %55 {strides = array<i32>} : memref<64x96xf32, #tpu.memory_space<vmem>>, vector<64x96xf32>,
      %c0_44 = arith.constant 0 : index
      %c0_45 = arith.constant 0 : index
      %57 = vector.load %arg2[%c0_44, %c0_45] : memref<8x32xi32, #tpu.memory_space<vmem>>, vector<8x32xi32>
      %c0_46 = arith.constant 0 : index
      %c0_47 = arith.constant 0 : index
      %58 = vector.load %arg4[%c0_46, %c0_47] : memref<32x96xbf16, #tpu.memory_space<vmem>>, vector<32x96xbf16>
      %c0_48 = arith.constant 0 : index
      %c0_49 = arith.constant 0 : index
      %59 = vector.load %arg6[%c0_48, %c0_49] : memref<1x32xf32, #tpu.memory_space<vmem>>, vector<1x32xf32>
      %60 = vector.shape_cast %59 : vector<1x32xf32> to vector<1x32xf32>
      %61 = vector.broadcast %60 : vector<1x32xf32> to vector<8x32xf32>
      %cst_50 = arith.constant 0.000000e+00 : f32
      %62 = vector.broadcast %cst_50 : f32 to vector<8x32xf32>
      %c0_i32_51 = arith.constant 0 : i32
      %c8_i32 = arith.constant 8 : i32
      %63 = arith.muli %c0_i32_51, %c8_i32 : i32
      %64 = tpu.assume_multiple %63, 8 : i32
      %65 = arith.index_cast %64 : i32 to index
      %c0_52 = arith.constant 0 : index
      %66 = vector.load %arg17[%65, %c0_52] : memref<64x96xf32, #tpu.memory_space<vmem>>, vector<8x96xf32>
      %67 = arith.truncf %62 : vector<8x32xf32> to vector<8x32xbf16>
      %cst_53 = arith.constant dense<0.000000e+00> : vector<8x96xf32>
      %68 = tpu.matmul %67, %58, %cst_53 {dimension_numbers = #tpu.dot_dimension_numbers<[1], [0], [0], [1], [0, 0, 1, 1], [], []>} : vector<8x32xbf16>, vector<32x96xbf16>, vector<8x96xf32> -> vector<8x96xf32>
      %69 = vector.extract_strided_slice %66 {offsets = [0, 0], sizes = [8, 32], strides = [1, 1]} : vector<8x96xf32> to vector<8x32xf32>
      %70 = vector.extract_strided_slice %68 {offsets = [0, 0], sizes = [8, 32], strides = [1, 1]} : vector<8x96xf32> to vector<8x32xf32>
      %71 = arith.addf %69, %70 : vector<8x32xf32>
      %cst_54 = arith.constant 5.000000e-01 : f32
      %72 = vector.broadcast %cst_54 : f32 to vector<8x32xf32>
      %73 = arith.mulf %72, %71 : vector<8x32xf32>
      %74 = math.tanh %73 : vector<8x32xf32>
      %cst_55 = arith.constant 1.000000e+00 : f32
      %75 = vector.broadcast %cst_55 : f32 to vector<8x32xf32>
      %76 = arith.addf %74, %75 : vector<8x32xf32>
      %cst_56 = arith.constant 5.000000e-01 : f32
      %77 = vector.broadcast %cst_56 : f32 to vector<8x32xf32>
      %78 = arith.mulf %77, %76 : vector<8x32xf32>
      %79 = vector.extract_strided_slice %66 {offsets = [0, 32], sizes = [8, 32], strides = [1, 1]} : vector<8x96xf32> to vector<8x32xf32>
      %80 = vector.extract_strided_slice %68 {offsets = [0, 32], sizes = [8, 32], strides = [1, 1]} : vector<8x96xf32> to vector<8x32xf32>
      %81 = arith.addf %79, %80 : vector<8x32xf32>
      %cst_57 = arith.constant 5.000000e-01 : f32
      %82 = vector.broadcast %cst_57 : f32 to vector<8x32xf32>
      %83 = arith.mulf %82, %81 : vector<8x32xf32>
      %84 = math.tanh %83 : vector<8x32xf32>
      %cst_58 = arith.constant 1.000000e+00 : f32
      %85 = vector.broadcast %cst_58 : f32 to vector<8x32xf32>
      %86 = arith.addf %84, %85 : vector<8x32xf32>
      %cst_59 = arith.constant 5.000000e-01 : f32
      %87 = vector.broadcast %cst_59 : f32 to vector<8x32xf32>
      %88 = arith.mulf %87, %86 : vector<8x32xf32>
      %89 = vector.extract_strided_slice %66 {offsets = [0, 64], sizes = [8, 32], strides = [1, 1]} : vector<8x96xf32> to vector<8x32xf32>
      %90 = vector.extract_strided_slice %68 {offsets = [0, 64], sizes = [8, 32], strides = [1, 1]} : vector<8x96xf32> to vector<8x32xf32>
      %91 = arith.addf %90, %61 : vector<8x32xf32>
      %92 = arith.mulf %78, %91 : vector<8x32xf32>
      %93 = arith.addf %89, %92 : vector<8x32xf32>
      %94 = math.tanh %93 : vector<8x32xf32>
      %cst_60 = arith.constant 1.000000e+00 : f32
      %95 = vector.broadcast %cst_60 : f32 to vector<8x32xf32>
      %96 = arith.subf %95, %88 : vector<8x32xf32>
      %97 = arith.mulf %96, %94 : vector<8x32xf32>
      %98 = arith.mulf %88, %62 : vector<8x32xf32>
      %99 = arith.addf %97, %98 : vector<8x32xf32>
      %100 = vector.broadcast %c0_i32_51 : i32 to vector<8x32xi32>
      %101 = arith.cmpi slt, %100, %57 : vector<8x32xi32>
      %102 = arith.select %101, %99, %62 : vector<8x32xi1>, vector<8x32xf32>
      %c1_i32 = arith.constant 1 : i32
      %c8_i32_61 = arith.constant 8 : i32
      %103 = arith.muli %c1_i32, %c8_i32_61 : i32
      %104 = tpu.assume_multiple %103, 8 : i32
      %105 = arith.index_cast %104 : i32 to index
      %c0_62 = arith.constant 0 : index
      %106 = vector.load %arg17[%105, %c0_62] : memref<64x96xf32, #tpu.memory_space<vmem>>, vector<8x96xf32>
      %107 = arith.truncf %102 : vector<8x32xf32> to vector<8x32xbf16>
      %cst_63 = arith.constant dense<0.000000e+00> : vector<8x96xf32>
      %108 = tpu.matmul %107, %58, %cst_63 {dimension_numbers = #tpu.dot_dimension_numbers<[1], [0], [0], [1], [0, 0, 1, 1], [], []>} : vector<8x32xbf16>, vector<32x96xbf16>, vector<8x96xf32> -> vector<8x96xf32>
      %109 = vector.extract_strided_slice %106 {offsets = [0, 0], sizes = [8, 32], strides = [1, 1]} : vector<8x96xf32> to vector<8x32xf32>
      %110 = vector.extract_strided_slice %108 {offsets = [0, 0], sizes = [8, 32], strides = [1, 1]} : vector<8x96xf32> to vector<8x32xf32>
      %111 = arith.addf %109, %110 : vector<8x32xf32>
      %cst_64 = arith.constant 5.000000e-01 : f32
      %112 = vector.broadcast %cst_64 : f32 to vector<8x32xf32>
      %113 = arith.mulf %112, %111 : vector<8x32xf32>
      %114 = math.tanh %113 : vector<8x32xf32>
      %cst_65 = arith.constant 1.000000e+00 : f32
      %115 = vector.broadcast %cst_65 : f32 to vector<8x32xf32>
      %116 = arith.addf %114, %115 : vector<8x32xf32>
      %cst_66 = arith.constant 5.000000e-01 : f32
      %117 = vector.broadcast %cst_66 : f32 to vector<8x32xf32>
      %118 = arith.mulf %117, %116 : vector<8x32xf32>
      %119 = vector.extract_strided_slice %106 {offsets = [0, 32], sizes = [8, 32], strides = [1, 1]} : vector<8x96xf32> to vector<8x32xf32>
      %120 = vector.extract_strided_slice %108 {offsets = [0, 32], sizes = [8, 32], strides = [1, 1]} : vector<8x96xf32> to vector<8x32xf32>
      %121 = arith.addf %119, %120 : vector<8x32xf32>
      %cst_67 = arith.constant 5.000000e-01 : f32
      %122 = vector.broadcast %cst_67 : f32 to vector<8x32xf32>
      %123 = arith.mulf %122, %121 : vector<8x32xf32>
      %124 = math.tanh %123 : vector<8x32xf32>
      %cst_68 = arith.constant 1.000000e+00 : f32
      %125 = vector.broadcast %cst_68 : f32 to vector<8x32xf32>
      %126 = arith.addf %124, %125 : vector<8x32xf32>
      %cst_69 = arith.constant 5.000000e-01 : f32
      %127 = vector.broadcast %cst_69 : f32 to vector<8x32xf32>
      %128 = arith.mulf %127, %126 : vector<8x32xf32>
      %129 = vector.extract_strided_slice %106 {offsets = [0, 64], sizes = [8, 32], strides = [1, 1]} : vector<8x96xf32> to vector<8x32xf32>
      %130 = vector.extract_strided_slice %108 {offsets = [0, 64], sizes = [8, 32], strides = [1, 1]} : vector<8x96xf32> to vector<8x32xf32>
      %131 = arith.addf %130, %61 : vector<8x32xf32>
      %132 = arith.mulf %118, %131 : vector<8x32xf32>
      %133 = arith.addf %129, %132 : vector<8x32xf32>
      %134 = math.tanh %133 : vector<8x32xf32>
      %cst_70 = arith.constant 1.000000e+00 : f32
      %135 = vector.broadcast %cst_70 : f32 to vector<8x32xf32>
      %136 = arith.subf %135, %128 : vector<8x32xf32>
      %137 = arith.mulf %136, %134 : vector<8x32xf32>
      %138 = arith.mulf %128, %102 : vector<8x32xf32>
      %139 = arith.addf %137, %138 : vector<8x32xf32>
      %140 = vector.broadcast %c1_i32 : i32 to vector<8x32xi32>
      %141 = arith.cmpi slt, %140, %57 : vector<8x32xi32>
      %142 = arith.select %141, %139, %102 : vector<8x32xi1>, vector<8x32xf32>
      %c2_i32 = arith.constant 2 : i32
      %c8_i32_71 = arith.constant 8 : i32
      %143 = arith.muli %c2_i32, %c8_i32_71 : i32
      %144 = tpu.assume_multiple %143, 8 : i32
      %145 = arith.index_cast %144 : i32 to index
      %c0_72 = arith.constant 0 : index
      %146 = vector.load %arg17[%145, %c0_72] : memref<64x96xf32, #tpu.memory_space<vmem>>, vector<8x96xf32>
      %147 = arith.truncf %142 : vector<8x32xf32> to vector<8x32xbf16>
      %cst_73 = arith.constant dense<0.000000e+00> : vector<8x96xf32>
      %148 = tpu.matmul %147, %58, %cst_73 {dimension_numbers = #tpu.dot_dimension_numbers<[1], [0], [0], [1], [0, 0, 1, 1], [], []>} : vector<8x32xbf16>, vector<32x96xbf16>, vector<8x96xf32> -> vector<8x96xf32>
      %149 = vector.extract_strided_slice %146 {offsets = [0, 0], sizes = [8, 32], strides = [1, 1]} : vector<8x96xf32> to vector<8x32xf32>
      %150 = vector.extract_strided_slice %148 {offsets = [0, 0], sizes = [8, 32], strides = [1, 1]} : vector<8x96xf32> to vector<8x32xf32>
      %151 = arith.addf %149, %150 : vector<8x32xf32>
      %cst_74 = arith.constant 5.000000e-01 : f32
      %152 = vector.broadcast %cst_74 : f32 to vector<8x32xf32>
      %153 = arith.mulf %152, %151 : vector<8x32xf32>
      %154 = math.tanh %153 : vector<8x32xf32>
      %cst_75 = arith.constant 1.000000e+00 : f32
      %155 = vector.broadcast %cst_75 : f32 to vector<8x32xf32>
      %156 = arith.addf %154, %155 : vector<8x32xf32>
      %cst_76 = arith.constant 5.000000e-01 : f32
      %157 = vector.broadcast %cst_76 : f32 to vector<8x32xf32>
      %158 = arith.mulf %157, %156 : vector<8x32xf32>
      %159 = vector.extract_strided_slice %146 {offsets = [0, 32], sizes = [8, 32], strides = [1, 1]} : vector<8x96xf32> to vector<8x32xf32>
      %160 = vector.extract_strided_slice %148 {offsets = [0, 32], sizes = [8, 32], strides = [1, 1]} : vector<8x96xf32> to vector<8x32xf32>
      %161 = arith.addf %159, %160 : vector<8x32xf32>
      %cst_77 = arith.constant 5.000000e-01 : f32
      %162 = vector.broadcast %cst_77 : f32 to vector<8x32xf32>
      %163 = arith.mulf %162, %161 : vector<8x32xf32>
      %164 = math.tanh %163 : vector<8x32xf32>
      %cst_78 = arith.constant 1.000000e+00 : f32
      %165 = vector.broadcast %cst_78 : f32 to vector<8x32xf32>
      %166 = arith.addf %164, %165 : vector<8x32xf32>
      %cst_79 = arith.constant 5.000000e-01 : f32
      %167 = vector.broadcast %cst_79 : f32 to vector<8x32xf32>
      %168 = arith.mulf %167, %166 : vector<8x32xf32>
      %169 = vector.extract_strided_slice %146 {offsets = [0, 64], sizes = [8, 32], strides = [1, 1]} : vector<8x96xf32> to vector<8x32xf32>
      %170 = vector.extract_strided_slice %148 {offsets = [0, 64], sizes = [8, 32], strides = [1, 1]} : vector<8x96xf32> to vector<8x32xf32>
      %171 = arith.addf %170, %61 : vector<8x32xf32>
      %172 = arith.mulf %158, %171 : vector<8x32xf32>
      %173 = arith.addf %169, %172 : vector<8x32xf32>
      %174 = math.tanh %173 : vector<8x32xf32>
      %cst_80 = arith.constant 1.000000e+00 : f32
      %175 = vector.broadcast %cst_80 : f32 to vector<8x32xf32>
      %176 = arith.subf %175, %168 : vector<8x32xf32>
      %177 = arith.mulf %176, %174 : vector<8x32xf32>
      %178 = arith.mulf %168, %142 : vector<8x32xf32>
      %179 = arith.addf %177, %178 : vector<8x32xf32>
      %180 = vector.broadcast %c2_i32 : i32 to vector<8x32xi32>
      %181 = arith.cmpi slt, %180, %57 : vector<8x32xi32>
      %182 = arith.select %181, %179, %142 : vector<8x32xi1>, vector<8x32xf32>
      %c3_i32 = arith.constant 3 : i32
      %c8_i32_81 = arith.constant 8 : i32
      %183 = arith.muli %c3_i32, %c8_i32_81 : i32
      %184 = tpu.assume_multiple %183, 8 : i32
      %185 = arith.index_cast %184 : i32 to index
      %c0_82 = arith.constant 0 : index
      %186 = vector.load %arg17[%185, %c0_82] : memref<64x96xf32, #tpu.memory_space<vmem>>, vector<8x96xf32>
      %187 = arith.truncf %182 : vector<8x32xf32> to vector<8x32xbf16>
      %cst_83 = arith.constant dense<0.000000e+00> : vector<8x96xf32>
      %188 = tpu.matmul %187, %58, %cst_83 {dimension_numbers = #tpu.dot_dimension_numbers<[1], [0], [0], [1], [0, 0, 1, 1], [], []>} : vector<8x32xbf16>, vector<32x96xbf16>, vector<8x96xf32> -> vector<8x96xf32>
      %189 = vector.extract_strided_slice %186 {offsets = [0, 0], sizes = [8, 32], strides = [1, 1]} : vector<8x96xf32> to vector<8x32xf32>
      %190 = vector.extract_strided_slice %188 {offsets = [0, 0], sizes = [8, 32], strides = [1, 1]} : vector<8x96xf32> to vector<8x32xf32>
      %191 = arith.addf %189, %190 : vector<8x32xf32>
      %cst_84 = arith.constant 5.000000e-01 : f32
      %192 = vector.broadcast %cst_84 : f32 to vector<8x32xf32>
      %193 = arith.mulf %192, %191 : vector<8x32xf32>
      %194 = math.tanh %193 : vector<8x32xf32>
      %cst_85 = arith.constant 1.000000e+00 : f32
      %195 = vector.broadcast %cst_85 : f32 to vector<8x32xf32>
      %196 = arith.addf %194, %195 : vector<8x32xf32>
      %cst_86 = arith.constant 5.000000e-01 : f32
      %197 = vector.broadcast %cst_86 : f32 to vector<8x32xf32>
      %198 = arith.mulf %197, %196 : vector<8x32xf32>
      %199 = vector.extract_strided_slice %186 {offsets = [0, 32], sizes = [8, 32], strides = [1, 1]} : vector<8x96xf32> to vector<8x32xf32>
      %200 = vector.extract_strided_slice %188 {offsets = [0, 32], sizes = [8, 32], strides = [1, 1]} : vector<8x96xf32> to vector<8x32xf32>
      %201 = arith.addf %199, %200 : vector<8x32xf32>
      %cst_87 = arith.constant 5.000000e-01 : f32
      %202 = vector.broadcast %cst_87 : f32 to vector<8x32xf32>
      %203 = arith.mulf %202, %201 : vector<8x32xf32>
      %204 = math.tanh %203 : vector<8x32xf32>
      %cst_88 = arith.constant 1.000000e+00 : f32
      %205 = vector.broadcast %cst_88 : f32 to vector<8x32xf32>
      %206 = arith.addf %204, %205 : vector<8x32xf32>
      %cst_89 = arith.constant 5.000000e-01 : f32
      %207 = vector.broadcast %cst_89 : f32 to vector<8x32xf32>
      %208 = arith.mulf %207, %206 : vector<8x32xf32>
      %209 = vector.extract_strided_slice %186 {offsets = [0, 64], sizes = [8, 32], strides = [1, 1]} : vector<8x96xf32> to vector<8x32xf32>
      %210 = vector.extract_strided_slice %188 {offsets = [0, 64], sizes = [8, 32], strides = [1, 1]} : vector<8x96xf32> to vector<8x32xf32>
      %211 = arith.addf %210, %61 : vector<8x32xf32>
      %212 = arith.mulf %198, %211 : vector<8x32xf32>
      %213 = arith.addf %209, %212 : vector<8x32xf32>
      %214 = math.tanh %213 : vector<8x32xf32>
      %cst_90 = arith.constant 1.000000e+00 : f32
      %215 = vector.broadcast %cst_90 : f32 to vector<8x32xf32>
      %216 = arith.subf %215, %208 : vector<8x32xf32>
      %217 = arith.mulf %216, %214 : vector<8x32xf32>
      %218 = arith.mulf %208, %182 : vector<8x32xf32>
      %219 = arith.addf %217, %218 : vector<8x32xf32>
      %220 = vector.broadcast %c3_i32 : i32 to vector<8x32xi32>
      %221 = arith.cmpi slt, %220, %57 : vector<8x32xi32>
      %222 = arith.select %221, %219, %182 : vector<8x32xi1>, vector<8x32xf32>
      %c4_i32 = arith.constant 4 : i32
      %c8_i32_91 = arith.constant 8 : i32
      %223 = arith.muli %c4_i32, %c8_i32_91 : i32
      %224 = tpu.assume_multiple %223, 8 : i32
      %225 = arith.index_cast %224 : i32 to index
      %c0_92 = arith.constant 0 : index
      %226 = vector.load %arg17[%225, %c0_92] : memref<64x96xf32, #tpu.memory_space<vmem>>, vector<8x96xf32>
      %227 = arith.truncf %222 : vector<8x32xf32> to vector<8x32xbf16>
      %cst_93 = arith.constant dense<0.000000e+00> : vector<8x96xf32>
      %228 = tpu.matmul %227, %58, %cst_93 {dimension_numbers = #tpu.dot_dimension_numbers<[1], [0], [0], [1], [0, 0, 1, 1], [], []>} : vector<8x32xbf16>, vector<32x96xbf16>, vector<8x96xf32> -> vector<8x96xf32>
      %229 = vector.extract_strided_slice %226 {offsets = [0, 0], sizes = [8, 32], strides = [1, 1]} : vector<8x96xf32> to vector<8x32xf32>
      %230 = vector.extract_strided_slice %228 {offsets = [0, 0], sizes = [8, 32], strides = [1, 1]} : vector<8x96xf32> to vector<8x32xf32>
      %231 = arith.addf %229, %230 : vector<8x32xf32>
      %cst_94 = arith.constant 5.000000e-01 : f32
      %232 = vector.broadcast %cst_94 : f32 to vector<8x32xf32>
      %233 = arith.mulf %232, %231 : vector<8x32xf32>
      %234 = math.tanh %233 : vector<8x32xf32>
      %cst_95 = arith.constant 1.000000e+00 : f32
      %235 = vector.broadcast %cst_95 : f32 to vector<8x32xf32>
      %236 = arith.addf %234, %235 : vector<8x32xf32>
      %cst_96 = arith.constant 5.000000e-01 : f32
      %237 = vector.broadcast %cst_96 : f32 to vector<8x32xf32>
      %238 = arith.mulf %237, %236 : vector<8x32xf32>
      %239 = vector.extract_strided_slice %226 {offsets = [0, 32], sizes = [8, 32], strides = [1, 1]} : vector<8x96xf32> to vector<8x32xf32>
      %240 = vector.extract_strided_slice %228 {offsets = [0, 32], sizes = [8, 32], strides = [1, 1]} : vector<8x96xf32> to vector<8x32xf32>
      %241 = arith.addf %239, %240 : vector<8x32xf32>
      %cst_97 = arith.constant 5.000000e-01 : f32
      %242 = vector.broadcast %cst_97 : f32 to vector<8x32xf32>
      %243 = arith.mulf %242, %241 : vector<8x32xf32>
      %244 = math.tanh %243 : vector<8x32xf32>
      %cst_98 = arith.constant 1.000000e+00 : f32
      %245 = vector.broadcast %cst_98 : f32 to vector<8x32xf32>
      %246 = arith.addf %244, %245 : vector<8x32xf32>
      %cst_99 = arith.constant 5.000000e-01 : f32
      %247 = vector.broadcast %cst_99 : f32 to vector<8x32xf32>
      %248 = arith.mulf %247, %246 : vector<8x32xf32>
      %249 = vector.extract_strided_slice %226 {offsets = [0, 64], sizes = [8, 32], strides = [1, 1]} : vector<8x96xf32> to vector<8x32xf32>
      %250 = vector.extract_strided_slice %228 {offsets = [0, 64], sizes = [8, 32], strides = [1, 1]} : vector<8x96xf32> to vector<8x32xf32>
      %251 = arith.addf %250, %61 : vector<8x32xf32>
      %252 = arith.mulf %238, %251 : vector<8x32xf32>
      %253 = arith.addf %249, %252 : vector<8x32xf32>
      %254 = math.tanh %253 : vector<8x32xf32>
      %cst_100 = arith.constant 1.000000e+00 : f32
      %255 = vector.broadcast %cst_100 : f32 to vector<8x32xf32>
      %256 = arith.subf %255, %248 : vector<8x32xf32>
      %257 = arith.mulf %256, %254 : vector<8x32xf32>
      %258 = arith.mulf %248, %222 : vector<8x32xf32>
      %259 = arith.addf %257, %258 : vector<8x32xf32>
      %260 = vector.broadcast %c4_i32 : i32 to vector<8x32xi32>
      %261 = arith.cmpi slt, %260, %57 : vector<8x32xi32>
      %262 = arith.select %261, %259, %222 : vector<8x32xi1>, vector<8x32xf32>
      %c5_i32 = arith.constant 5 : i32
      %c8_i32_101 = arith.constant 8 : i32
      %263 = arith.muli %c5_i32, %c8_i32_101 : i32
      %264 = tpu.assume_multiple %263, 8 : i32
      %265 = arith.index_cast %264 : i32 to index
      %c0_102 = arith.constant 0 : index
      %266 = vector.load %arg17[%265, %c0_102] : memref<64x96xf32, #tpu.memory_space<vmem>>, vector<8x96xf32>
      %267 = arith.truncf %262 : vector<8x32xf32> to vector<8x32xbf16>
      %cst_103 = arith.constant dense<0.000000e+00> : vector<8x96xf32>
      %268 = tpu.matmul %267, %58, %cst_103 {dimension_numbers = #tpu.dot_dimension_numbers<[1], [0], [0], [1], [0, 0, 1, 1], [], []>} : vector<8x32xbf16>, vector<32x96xbf16>, vector<8x96xf32> -> vector<8x96xf32>
      %269 = vector.extract_strided_slice %266 {offsets = [0, 0], sizes = [8, 32], strides = [1, 1]} : vector<8x96xf32> to vector<8x32xf32>
      %270 = vector.extract_strided_slice %268 {offsets = [0, 0], sizes = [8, 32], strides = [1, 1]} : vector<8x96xf32> to vector<8x32xf32>
      %271 = arith.addf %269, %270 : vector<8x32xf32>
      %cst_104 = arith.constant 5.000000e-01 : f32
      %272 = vector.broadcast %cst_104 : f32 to vector<8x32xf32>
      %273 = arith.mulf %272, %271 : vector<8x32xf32>
      %274 = math.tanh %273 : vector<8x32xf32>
      %cst_105 = arith.constant 1.000000e+00 : f32
      %275 = vector.broadcast %cst_105 : f32 to vector<8x32xf32>
      %276 = arith.addf %274, %275 : vector<8x32xf32>
      %cst_106 = arith.constant 5.000000e-01 : f32
      %277 = vector.broadcast %cst_106 : f32 to vector<8x32xf32>
      %278 = arith.mulf %277, %276 : vector<8x32xf32>
      %279 = vector.extract_strided_slice %266 {offsets = [0, 32], sizes = [8, 32], strides = [1, 1]} : vector<8x96xf32> to vector<8x32xf32>
      %280 = vector.extract_strided_slice %268 {offsets = [0, 32], sizes = [8, 32], strides = [1, 1]} : vector<8x96xf32> to vector<8x32xf32>
      %281 = arith.addf %279, %280 : vector<8x32xf32>
      %cst_107 = arith.constant 5.000000e-01 : f32
      %282 = vector.broadcast %cst_107 : f32 to vector<8x32xf32>
      %283 = arith.mulf %282, %281 : vector<8x32xf32>
      %284 = math.tanh %283 : vector<8x32xf32>
      %cst_108 = arith.constant 1.000000e+00 : f32
      %285 = vector.broadcast %cst_108 : f32 to vector<8x32xf32>
      %286 = arith.addf %284, %285 : vector<8x32xf32>
      %cst_109 = arith.constant 5.000000e-01 : f32
      %287 = vector.broadcast %cst_109 : f32 to vector<8x32xf32>
      %288 = arith.mulf %287, %286 : vector<8x32xf32>
      %289 = vector.extract_strided_slice %266 {offsets = [0, 64], sizes = [8, 32], strides = [1, 1]} : vector<8x96xf32> to vector<8x32xf32>
      %290 = vector.extract_strided_slice %268 {offsets = [0, 64], sizes = [8, 32], strides = [1, 1]} : vector<8x96xf32> to vector<8x32xf32>
      %291 = arith.addf %290, %61 : vector<8x32xf32>
      %292 = arith.mulf %278, %291 : vector<8x32xf32>
      %293 = arith.addf %289, %292 : vector<8x32xf32>
      %294 = math.tanh %293 : vector<8x32xf32>
      %cst_110 = arith.constant 1.000000e+00 : f32
      %295 = vector.broadcast %cst_110 : f32 to vector<8x32xf32>
      %296 = arith.subf %295, %288 : vector<8x32xf32>
      %297 = arith.mulf %296, %294 : vector<8x32xf32>
      %298 = arith.mulf %288, %262 : vector<8x32xf32>
      %299 = arith.addf %297, %298 : vector<8x32xf32>
      %300 = vector.broadcast %c5_i32 : i32 to vector<8x32xi32>
      %301 = arith.cmpi slt, %300, %57 : vector<8x32xi32>
      %302 = arith.select %301, %299, %262 : vector<8x32xi1>, vector<8x32xf32>
      %c6_i32 = arith.constant 6 : i32
      %c8_i32_111 = arith.constant 8 : i32
      %303 = arith.muli %c6_i32, %c8_i32_111 : i32
      %304 = tpu.assume_multiple %303, 8 : i32
      %305 = arith.index_cast %304 : i32 to index
      %c0_112 = arith.constant 0 : index
      %306 = vector.load %arg17[%305, %c0_112] : memref<64x96xf32, #tpu.memory_space<vmem>>, vector<8x96xf32>
      %307 = arith.truncf %302 : vector<8x32xf32> to vector<8x32xbf16>
      %cst_113 = arith.constant dense<0.000000e+00> : vector<8x96xf32>
      %308 = tpu.matmul %307, %58, %cst_113 {dimension_numbers = #tpu.dot_dimension_numbers<[1], [0], [0], [1], [0, 0, 1, 1], [], []>} : vector<8x32xbf16>, vector<32x96xbf16>, vector<8x96xf32> -> vector<8x96xf32>
      %309 = vector.extract_strided_slice %306 {offsets = [0, 0], sizes = [8, 32], strides = [1, 1]} : vector<8x96xf32> to vector<8x32xf32>
      %310 = vector.extract_strided_slice %308 {offsets = [0, 0], sizes = [8, 32], strides = [1, 1]} : vector<8x96xf32> to vector<8x32xf32>
      %311 = arith.addf %309, %310 : vector<8x32xf32>
      %cst_114 = arith.constant 5.000000e-01 : f32
      %312 = vector.broadcast %cst_114 : f32 to vector<8x32xf32>
      %313 = arith.mulf %312, %311 : vector<8x32xf32>
      %314 = math.tanh %313 : vector<8x32xf32>
      %cst_115 = arith.constant 1.000000e+00 : f32
      %315 = vector.broadcast %cst_115 : f32 to vector<8x32xf32>
      %316 = arith.addf %314, %315 : vector<8x32xf32>
      %cst_116 = arith.constant 5.000000e-01 : f32
      %317 = vector.broadcast %cst_116 : f32 to vector<8x32xf32>
      %318 = arith.mulf %317, %316 : vector<8x32xf32>
      %319 = vector.extract_strided_slice %306 {offsets = [0, 32], sizes = [8, 32], strides = [1, 1]} : vector<8x96xf32> to vector<8x32xf32>
      %320 = vector.extract_strided_slice %308 {offsets = [0, 32], sizes = [8, 32], strides = [1, 1]} : vector<8x96xf32> to vector<8x32xf32>
      %321 = arith.addf %319, %320 : vector<8x32xf32>
      %cst_117 = arith.constant 5.000000e-01 : f32
      %322 = vector.broadcast %cst_117 : f32 to vector<8x32xf32>
      %323 = arith.mulf %322, %321 : vector<8x32xf32>
      %324 = math.tanh %323 : vector<8x32xf32>
      %cst_118 = arith.constant 1.000000e+00 : f32
      %325 = vector.broadcast %cst_118 : f32 to vector<8x32xf32>
      %326 = arith.addf %324, %325 : vector<8x32xf32>
      %cst_119 = arith.constant 5.000000e-01 : f32
      %327 = vector.broadcast %cst_119 : f32 to vector<8x32xf32>
      %328 = arith.mulf %327, %326 : vector<8x32xf32>
      %329 = vector.extract_strided_slice %306 {offsets = [0, 64], sizes = [8, 32], strides = [1, 1]} : vector<8x96xf32> to vector<8x32xf32>
      %330 = vector.extract_strided_slice %308 {offsets = [0, 64], sizes = [8, 32], strides = [1, 1]} : vector<8x96xf32> to vector<8x32xf32>
      %331 = arith.addf %330, %61 : vector<8x32xf32>
      %332 = arith.mulf %318, %331 : vector<8x32xf32>
      %333 = arith.addf %329, %332 : vector<8x32xf32>
      %334 = math.tanh %333 : vector<8x32xf32>
      %cst_120 = arith.constant 1.000000e+00 : f32
      %335 = vector.broadcast %cst_120 : f32 to vector<8x32xf32>
      %336 = arith.subf %335, %328 : vector<8x32xf32>
      %337 = arith.mulf %336, %334 : vector<8x32xf32>
      %338 = arith.mulf %328, %302 : vector<8x32xf32>
      %339 = arith.addf %337, %338 : vector<8x32xf32>
      %340 = vector.broadcast %c6_i32 : i32 to vector<8x32xi32>
      %341 = arith.cmpi slt, %340, %57 : vector<8x32xi32>
      %342 = arith.select %341, %339, %302 : vector<8x32xi1>, vector<8x32xf32>
      %c7_i32 = arith.constant 7 : i32
      %c8_i32_121 = arith.constant 8 : i32
      %343 = arith.muli %c7_i32, %c8_i32_121 : i32
      %344 = tpu.assume_multiple %343, 8 : i32
      %345 = arith.index_cast %344 : i32 to index
      %c0_122 = arith.constant 0 : index
      %346 = vector.load %arg17[%345, %c0_122] : memref<64x96xf32, #tpu.memory_space<vmem>>, vector<8x96xf32>
      %347 = arith.truncf %342 : vector<8x32xf32> to vector<8x32xbf16>
      %cst_123 = arith.constant dense<0.000000e+00> : vector<8x96xf32>
      %348 = tpu.matmul %347, %58, %cst_123 {dimension_numbers = #tpu.dot_dimension_numbers<[1], [0], [0], [1], [0, 0, 1, 1], [], []>} : vector<8x32xbf16>, vector<32x96xbf16>, vector<8x96xf32> -> vector<8x96xf32>
      %349 = vector.extract_strided_slice %346 {offsets = [0, 0], sizes = [8, 32], strides = [1, 1]} : vector<8x96xf32> to vector<8x32xf32>
      %350 = vector.extract_strided_slice %348 {offsets = [0, 0], sizes = [8, 32], strides = [1, 1]} : vector<8x96xf32> to vector<8x32xf32>
      %351 = arith.addf %349, %350 : vector<8x32xf32>
      %cst_124 = arith.constant 5.000000e-01 : f32
      %352 = vector.broadcast %cst_124 : f32 to vector<8x32xf32>
      %353 = arith.mulf %352, %351 : vector<8x32xf32>
      %354 = math.tanh %353 : vector<8x32xf32>
      %cst_125 = arith.constant 1.000000e+00 : f32
      %355 = vector.broadcast %cst_125 : f32 to vector<8x32xf32>
      %356 = arith.addf %354, %355 : vector<8x32xf32>
      %cst_126 = arith.constant 5.000000e-01 : f32
      %357 = vector.broadcast %cst_126 : f32 to vector<8x32xf32>
      %358 = arith.mulf %357, %356 : vector<8x32xf32>
      %359 = vector.extract_strided_slice %346 {offsets = [0, 32], sizes = [8, 32], strides = [1, 1]} : vector<8x96xf32> to vector<8x32xf32>
      %360 = vector.extract_strided_slice %348 {offsets = [0, 32], sizes = [8, 32], strides = [1, 1]} : vector<8x96xf32> to vector<8x32xf32>
      %361 = arith.addf %359, %360 : vector<8x32xf32>
      %cst_127 = arith.constant 5.000000e-01 : f32
      %362 = vector.broadcast %cst_127 : f32 to vector<8x32xf32>
      %363 = arith.mulf %362, %361 : vector<8x32xf32>
      %364 = math.tanh %363 : vector<8x32xf32>
      %cst_128 = arith.constant 1.000000e+00 : f32
      %365 = vector.broadcast %cst_128 : f32 to vector<8x32xf32>
      %366 = arith.addf %364, %365 : vector<8x32xf32>
      %cst_129 = arith.constant 5.000000e-01 : f32
      %367 = vector.broadcast %cst_129 : f32 to vector<8x32xf32>
      %368 = arith.mulf %367, %366 : vector<8x32xf32>
      %369 = vector.extract_strided_slice %346 {offsets = [0, 64], sizes = [8, 32], strides = [1, 1]} : vector<8x96xf32> to vector<8x32xf32>
      %370 = vector.extract_strided_slice %348 {offsets = [0, 64], sizes = [8, 32], strides = [1, 1]} : vector<8x96xf32> to vector<8x32xf32>
      %371 = arith.addf %370, %61 : vector<8x32xf32>
      %372 = arith.mulf %358, %371 : vector<8x32xf32>
      %373 = arith.addf %369, %372 : vector<8x32xf32>
      %374 = math.tanh %373 : vector<8x32xf32>
      %cst_130 = arith.constant 1.000000e+00 : f32
      %375 = vector.broadcast %cst_130 : f32 to vector<8x32xf32>
      %376 = arith.subf %375, %368 : vector<8x32xf32>
      %377 = arith.mulf %376, %374 : vector<8x32xf32>
      %378 = arith.mulf %368, %342 : vector<8x32xf32>
      %379 = arith.addf %377, %378 : vector<8x32xf32>
      %380 = vector.broadcast %c7_i32 : i32 to vector<8x32xi32>
      %381 = arith.cmpi slt, %380, %57 : vector<8x32xi32>
      %382 = arith.select %381, %379, %342 : vector<8x32xi1>, vector<8x32xf32>
      %c8_i32_131 = arith.constant 8 : i32
      %c0_132 = arith.constant 0 : index
      %c0_133 = arith.constant 0 : index
      %383 = vector.load %arg9[%c0_132, %c0_133] : memref<32x96xbf16, #tpu.memory_space<vmem>>, vector<32x96xbf16>
      %c0_134 = arith.constant 0 : index
      %c0_135 = arith.constant 0 : index
      %384 = vector.load %arg11[%c0_134, %c0_135] : memref<1x32xf32, #tpu.memory_space<vmem>>, vector<1x32xf32>
      %385 = vector.shape_cast %384 : vector<1x32xf32> to vector<1x32xf32>
      %386 = vector.broadcast %385 : vector<1x32xf32> to vector<8x32xf32>
      %c0_i32_136 = arith.constant 0 : i32
      %c8_i32_137 = arith.constant 8 : i32
      %387 = arith.muli %c0_i32_136, %c8_i32_137 : i32
      %388 = tpu.assume_multiple %387, 8 : i32
      %389 = arith.index_cast %388 : i32 to index
      %c0_138 = arith.constant 0 : index
      %390 = vector.load %arg18[%389, %c0_138] : memref<64x96xf32, #tpu.memory_space<vmem>>, vector<8x96xf32>
      %391 = arith.truncf %382 : vector<8x32xf32> to vector<8x32xbf16>
      %cst_139 = arith.constant dense<0.000000e+00> : vector<8x96xf32>
      %392 = tpu.matmul %391, %383, %cst_139 {dimension_numbers = #tpu.dot_dimension_numbers<[1], [0], [0], [1], [0, 0, 1, 1], [], []>} : vector<8x32xbf16>, vector<32x96xbf16>, vector<8x96xf32> -> vector<8x96xf32>
      %393 = vector.extract_strided_slice %390 {offsets = [0, 0], sizes = [8, 32], strides = [1, 1]} : vector<8x96xf32> to vector<8x32xf32>
      %394 = vector.extract_strided_slice %392 {offsets = [0, 0], sizes = [8, 32], strides = [1, 1]} : vector<8x96xf32> to vector<8x32xf32>
      %395 = arith.addf %393, %394 : vector<8x32xf32>
      %cst_140 = arith.constant 5.000000e-01 : f32
      %396 = vector.broadcast %cst_140 : f32 to vector<8x32xf32>
      %397 = arith.mulf %396, %395 : vector<8x32xf32>
      %398 = math.tanh %397 : vector<8x32xf32>
      %cst_141 = arith.constant 1.000000e+00 : f32
      %399 = vector.broadcast %cst_141 : f32 to vector<8x32xf32>
      %400 = arith.addf %398, %399 : vector<8x32xf32>
      %cst_142 = arith.constant 5.000000e-01 : f32
      %401 = vector.broadcast %cst_142 : f32 to vector<8x32xf32>
      %402 = arith.mulf %401, %400 : vector<8x32xf32>
      %403 = vector.extract_strided_slice %390 {offsets = [0, 32], sizes = [8, 32], strides = [1, 1]} : vector<8x96xf32> to vector<8x32xf32>
      %404 = vector.extract_strided_slice %392 {offsets = [0, 32], sizes = [8, 32], strides = [1, 1]} : vector<8x96xf32> to vector<8x32xf32>
      %405 = arith.addf %403, %404 : vector<8x32xf32>
      %cst_143 = arith.constant 5.000000e-01 : f32
      %406 = vector.broadcast %cst_143 : f32 to vector<8x32xf32>
      %407 = arith.mulf %406, %405 : vector<8x32xf32>
      %408 = math.tanh %407 : vector<8x32xf32>
      %cst_144 = arith.constant 1.000000e+00 : f32
      %409 = vector.broadcast %cst_144 : f32 to vector<8x32xf32>
      %410 = arith.addf %408, %409 : vector<8x32xf32>
      %cst_145 = arith.constant 5.000000e-01 : f32
      %411 = vector.broadcast %cst_145 : f32 to vector<8x32xf32>
      %412 = arith.mulf %411, %410 : vector<8x32xf32>
      %413 = vector.extract_strided_slice %390 {offsets = [0, 64], sizes = [8, 32], strides = [1, 1]} : vector<8x96xf32> to vector<8x32xf32>
      %414 = vector.extract_strided_slice %392 {offsets = [0, 64], sizes = [8, 32], strides = [1, 1]} : vector<8x96xf32> to vector<8x32xf32>
      %415 = arith.addf %414, %386 : vector<8x32xf32>
      %416 = arith.mulf %402, %415 : vector<8x32xf32>
      %417 = arith.addf %413, %416 : vector<8x32xf32>
      %418 = math.tanh %417 : vector<8x32xf32>
      %cst_146 = arith.constant 1.000000e+00 : f32
      %419 = vector.broadcast %cst_146 : f32 to vector<8x32xf32>
      %420 = arith.subf %419, %412 : vector<8x32xf32>
      %421 = arith.mulf %420, %418 : vector<8x32xf32>
      %422 = arith.mulf %412, %382 : vector<8x32xf32>
      %423 = arith.addf %421, %422 : vector<8x32xf32>
      %424 = arith.index_cast %388 : i32 to index
      %c0_147 = arith.constant 0 : index
      %425 = vector.load %arg19[%424, %c0_147] : memref<64x32xf32, #tpu.memory_space<vmem>>, vector<8x32xf32>
      tpu.vector_store %arg19[%424, %c0_147], %423 {strides = array<i32>} : memref<64x32xf32, #tpu.memory_space<vmem>>, vector<8x32xf32>,
      %c1_i32_148 = arith.constant 1 : i32
      %c8_i32_149 = arith.constant 8 : i32
      %426 = arith.muli %c1_i32_148, %c8_i32_149 : i32
      %427 = tpu.assume_multiple %426, 8 : i32
      %428 = arith.index_cast %427 : i32 to index
      %c0_150 = arith.constant 0 : index
      %429 = vector.load %arg18[%428, %c0_150] : memref<64x96xf32, #tpu.memory_space<vmem>>, vector<8x96xf32>
      %430 = arith.truncf %423 : vector<8x32xf32> to vector<8x32xbf16>
      %cst_151 = arith.constant dense<0.000000e+00> : vector<8x96xf32>
      %431 = tpu.matmul %430, %383, %cst_151 {dimension_numbers = #tpu.dot_dimension_numbers<[1], [0], [0], [1], [0, 0, 1, 1], [], []>} : vector<8x32xbf16>, vector<32x96xbf16>, vector<8x96xf32> -> vector<8x96xf32>
      %432 = vector.extract_strided_slice %429 {offsets = [0, 0], sizes = [8, 32], strides = [1, 1]} : vector<8x96xf32> to vector<8x32xf32>
      %433 = vector.extract_strided_slice %431 {offsets = [0, 0], sizes = [8, 32], strides = [1, 1]} : vector<8x96xf32> to vector<8x32xf32>
      %434 = arith.addf %432, %433 : vector<8x32xf32>
      %cst_152 = arith.constant 5.000000e-01 : f32
      %435 = vector.broadcast %cst_152 : f32 to vector<8x32xf32>
      %436 = arith.mulf %435, %434 : vector<8x32xf32>
      %437 = math.tanh %436 : vector<8x32xf32>
      %cst_153 = arith.constant 1.000000e+00 : f32
      %438 = vector.broadcast %cst_153 : f32 to vector<8x32xf32>
      %439 = arith.addf %437, %438 : vector<8x32xf32>
      %cst_154 = arith.constant 5.000000e-01 : f32
      %440 = vector.broadcast %cst_154 : f32 to vector<8x32xf32>
      %441 = arith.mulf %440, %439 : vector<8x32xf32>
      %442 = vector.extract_strided_slice %429 {offsets = [0, 32], sizes = [8, 32], strides = [1, 1]} : vector<8x96xf32> to vector<8x32xf32>
      %443 = vector.extract_strided_slice %431 {offsets = [0, 32], sizes = [8, 32], strides = [1, 1]} : vector<8x96xf32> to vector<8x32xf32>
      %444 = arith.addf %442, %443 : vector<8x32xf32>
      %cst_155 = arith.constant 5.000000e-01 : f32
      %445 = vector.broadcast %cst_155 : f32 to vector<8x32xf32>
      %446 = arith.mulf %445, %444 : vector<8x32xf32>
      %447 = math.tanh %446 : vector<8x32xf32>
      %cst_156 = arith.constant 1.000000e+00 : f32
      %448 = vector.broadcast %cst_156 : f32 to vector<8x32xf32>
      %449 = arith.addf %447, %448 : vector<8x32xf32>
      %cst_157 = arith.constant 5.000000e-01 : f32
      %450 = vector.broadcast %cst_157 : f32 to vector<8x32xf32>
      %451 = arith.mulf %450, %449 : vector<8x32xf32>
      %452 = vector.extract_strided_slice %429 {offsets = [0, 64], sizes = [8, 32], strides = [1, 1]} : vector<8x96xf32> to vector<8x32xf32>
      %453 = vector.extract_strided_slice %431 {offsets = [0, 64], sizes = [8, 32], strides = [1, 1]} : vector<8x96xf32> to vector<8x32xf32>
      %454 = arith.addf %453, %386 : vector<8x32xf32>
      %455 = arith.mulf %441, %454 : vector<8x32xf32>
      %456 = arith.addf %452, %455 : vector<8x32xf32>
      %457 = math.tanh %456 : vector<8x32xf32>
      %cst_158 = arith.constant 1.000000e+00 : f32
      %458 = vector.broadcast %cst_158 : f32 to vector<8x32xf32>
      %459 = arith.subf %458, %451 : vector<8x32xf32>
      %460 = arith.mulf %459, %457 : vector<8x32xf32>
      %461 = arith.mulf %451, %423 : vector<8x32xf32>
      %462 = arith.addf %460, %461 : vector<8x32xf32>
      %463 = arith.index_cast %427 : i32 to index
      %c0_159 = arith.constant 0 : index
      %464 = vector.load %arg19[%463, %c0_159] : memref<64x32xf32, #tpu.memory_space<vmem>>, vector<8x32xf32>
      tpu.vector_store %arg19[%463, %c0_159], %462 {strides = array<i32>} : memref<64x32xf32, #tpu.memory_space<vmem>>, vector<8x32xf32>,
      %c2_i32_160 = arith.constant 2 : i32
      %c8_i32_161 = arith.constant 8 : i32
      %465 = arith.muli %c2_i32_160, %c8_i32_161 : i32
      %466 = tpu.assume_multiple %465, 8 : i32
      %467 = arith.index_cast %466 : i32 to index
      %c0_162 = arith.constant 0 : index
      %468 = vector.load %arg18[%467, %c0_162] : memref<64x96xf32, #tpu.memory_space<vmem>>, vector<8x96xf32>
      %469 = arith.truncf %462 : vector<8x32xf32> to vector<8x32xbf16>
      %cst_163 = arith.constant dense<0.000000e+00> : vector<8x96xf32>
      %470 = tpu.matmul %469, %383, %cst_163 {dimension_numbers = #tpu.dot_dimension_numbers<[1], [0], [0], [1], [0, 0, 1, 1], [], []>} : vector<8x32xbf16>, vector<32x96xbf16>, vector<8x96xf32> -> vector<8x96xf32>
      %471 = vector.extract_strided_slice %468 {offsets = [0, 0], sizes = [8, 32], strides = [1, 1]} : vector<8x96xf32> to vector<8x32xf32>
      %472 = vector.extract_strided_slice %470 {offsets = [0, 0], sizes = [8, 32], strides = [1, 1]} : vector<8x96xf32> to vector<8x32xf32>
      %473 = arith.addf %471, %472 : vector<8x32xf32>
      %cst_164 = arith.constant 5.000000e-01 : f32
      %474 = vector.broadcast %cst_164 : f32 to vector<8x32xf32>
      %475 = arith.mulf %474, %473 : vector<8x32xf32>
      %476 = math.tanh %475 : vector<8x32xf32>
      %cst_165 = arith.constant 1.000000e+00 : f32
      %477 = vector.broadcast %cst_165 : f32 to vector<8x32xf32>
      %478 = arith.addf %476, %477 : vector<8x32xf32>
      %cst_166 = arith.constant 5.000000e-01 : f32
      %479 = vector.broadcast %cst_166 : f32 to vector<8x32xf32>
      %480 = arith.mulf %479, %478 : vector<8x32xf32>
      %481 = vector.extract_strided_slice %468 {offsets = [0, 32], sizes = [8, 32], strides = [1, 1]} : vector<8x96xf32> to vector<8x32xf32>
      %482 = vector.extract_strided_slice %470 {offsets = [0, 32], sizes = [8, 32], strides = [1, 1]} : vector<8x96xf32> to vector<8x32xf32>
      %483 = arith.addf %481, %482 : vector<8x32xf32>
      %cst_167 = arith.constant 5.000000e-01 : f32
      %484 = vector.broadcast %cst_167 : f32 to vector<8x32xf32>
      %485 = arith.mulf %484, %483 : vector<8x32xf32>
      %486 = math.tanh %485 : vector<8x32xf32>
      %cst_168 = arith.constant 1.000000e+00 : f32
      %487 = vector.broadcast %cst_168 : f32 to vector<8x32xf32>
      %488 = arith.addf %486, %487 : vector<8x32xf32>
      %cst_169 = arith.constant 5.000000e-01 : f32
      %489 = vector.broadcast %cst_169 : f32 to vector<8x32xf32>
      %490 = arith.mulf %489, %488 : vector<8x32xf32>
      %491 = vector.extract_strided_slice %468 {offsets = [0, 64], sizes = [8, 32], strides = [1, 1]} : vector<8x96xf32> to vector<8x32xf32>
      %492 = vector.extract_strided_slice %470 {offsets = [0, 64], sizes = [8, 32], strides = [1, 1]} : vector<8x96xf32> to vector<8x32xf32>
      %493 = arith.addf %492, %386 : vector<8x32xf32>
      %494 = arith.mulf %480, %493 : vector<8x32xf32>
      %495 = arith.addf %491, %494 : vector<8x32xf32>
      %496 = math.tanh %495 : vector<8x32xf32>
      %cst_170 = arith.constant 1.000000e+00 : f32
      %497 = vector.broadcast %cst_170 : f32 to vector<8x32xf32>
      %498 = arith.subf %497, %490 : vector<8x32xf32>
      %499 = arith.mulf %498, %496 : vector<8x32xf32>
      %500 = arith.mulf %490, %462 : vector<8x32xf32>
      %501 = arith.addf %499, %500 : vector<8x32xf32>
      %502 = arith.index_cast %466 : i32 to index
      %c0_171 = arith.constant 0 : index
      %503 = vector.load %arg19[%502, %c0_171] : memref<64x32xf32, #tpu.memory_space<vmem>>, vector<8x32xf32>
      tpu.vector_store %arg19[%502, %c0_171], %501 {strides = array<i32>} : memref<64x32xf32, #tpu.memory_space<vmem>>, vector<8x32xf32>,
      %c3_i32_172 = arith.constant 3 : i32
      %c8_i32_173 = arith.constant 8 : i32
      %504 = arith.muli %c3_i32_172, %c8_i32_173 : i32
      %505 = tpu.assume_multiple %504, 8 : i32
      %506 = arith.index_cast %505 : i32 to index
      %c0_174 = arith.constant 0 : index
      %507 = vector.load %arg18[%506, %c0_174] : memref<64x96xf32, #tpu.memory_space<vmem>>, vector<8x96xf32>
      %508 = arith.truncf %501 : vector<8x32xf32> to vector<8x32xbf16>
      %cst_175 = arith.constant dense<0.000000e+00> : vector<8x96xf32>
      %509 = tpu.matmul %508, %383, %cst_175 {dimension_numbers = #tpu.dot_dimension_numbers<[1], [0], [0], [1], [0, 0, 1, 1], [], []>} : vector<8x32xbf16>, vector<32x96xbf16>, vector<8x96xf32> -> vector<8x96xf32>
      %510 = vector.extract_strided_slice %507 {offsets = [0, 0], sizes = [8, 32], strides = [1, 1]} : vector<8x96xf32> to vector<8x32xf32>
      %511 = vector.extract_strided_slice %509 {offsets = [0, 0], sizes = [8, 32], strides = [1, 1]} : vector<8x96xf32> to vector<8x32xf32>
      %512 = arith.addf %510, %511 : vector<8x32xf32>
      %cst_176 = arith.constant 5.000000e-01 : f32
      %513 = vector.broadcast %cst_176 : f32 to vector<8x32xf32>
      %514 = arith.mulf %513, %512 : vector<8x32xf32>
      %515 = math.tanh %514 : vector<8x32xf32>
      %cst_177 = arith.constant 1.000000e+00 : f32
      %516 = vector.broadcast %cst_177 : f32 to vector<8x32xf32>
      %517 = arith.addf %515, %516 : vector<8x32xf32>
      %cst_178 = arith.constant 5.000000e-01 : f32
      %518 = vector.broadcast %cst_178 : f32 to vector<8x32xf32>
      %519 = arith.mulf %518, %517 : vector<8x32xf32>
      %520 = vector.extract_strided_slice %507 {offsets = [0, 32], sizes = [8, 32], strides = [1, 1]} : vector<8x96xf32> to vector<8x32xf32>
      %521 = vector.extract_strided_slice %509 {offsets = [0, 32], sizes = [8, 32], strides = [1, 1]} : vector<8x96xf32> to vector<8x32xf32>
      %522 = arith.addf %520, %521 : vector<8x32xf32>
      %cst_179 = arith.constant 5.000000e-01 : f32
      %523 = vector.broadcast %cst_179 : f32 to vector<8x32xf32>
      %524 = arith.mulf %523, %522 : vector<8x32xf32>
      %525 = math.tanh %524 : vector<8x32xf32>
      %cst_180 = arith.constant 1.000000e+00 : f32
      %526 = vector.broadcast %cst_180 : f32 to vector<8x32xf32>
      %527 = arith.addf %525, %526 : vector<8x32xf32>
      %cst_181 = arith.constant 5.000000e-01 : f32
      %528 = vector.broadcast %cst_181 : f32 to vector<8x32xf32>
      %529 = arith.mulf %528, %527 : vector<8x32xf32>
      %530 = vector.extract_strided_slice %507 {offsets = [0, 64], sizes = [8, 32], strides = [1, 1]} : vector<8x96xf32> to vector<8x32xf32>
      %531 = vector.extract_strided_slice %509 {offsets = [0, 64], sizes = [8, 32], strides = [1, 1]} : vector<8x96xf32> to vector<8x32xf32>
      %532 = arith.addf %531, %386 : vector<8x32xf32>
      %533 = arith.mulf %519, %532 : vector<8x32xf32>
      %534 = arith.addf %530, %533 : vector<8x32xf32>
      %535 = math.tanh %534 : vector<8x32xf32>
      %cst_182 = arith.constant 1.000000e+00 : f32
      %536 = vector.broadcast %cst_182 : f32 to vector<8x32xf32>
      %537 = arith.subf %536, %529 : vector<8x32xf32>
      %538 = arith.mulf %537, %535 : vector<8x32xf32>
      %539 = arith.mulf %529, %501 : vector<8x32xf32>
      %540 = arith.addf %538, %539 : vector<8x32xf32>
      %541 = arith.index_cast %505 : i32 to index
      %c0_183 = arith.constant 0 : index
      %542 = vector.load %arg19[%541, %c0_183] : memref<64x32xf32, #tpu.memory_space<vmem>>, vector<8x32xf32>
      tpu.vector_store %arg19[%541, %c0_183], %540 {strides = array<i32>} : memref<64x32xf32, #tpu.memory_space<vmem>>, vector<8x32xf32>,
      %c4_i32_184 = arith.constant 4 : i32
      %c8_i32_185 = arith.constant 8 : i32
      %543 = arith.muli %c4_i32_184, %c8_i32_185 : i32
      %544 = tpu.assume_multiple %543, 8 : i32
      %545 = arith.index_cast %544 : i32 to index
      %c0_186 = arith.constant 0 : index
      %546 = vector.load %arg18[%545, %c0_186] : memref<64x96xf32, #tpu.memory_space<vmem>>, vector<8x96xf32>
      %547 = arith.truncf %540 : vector<8x32xf32> to vector<8x32xbf16>
      %cst_187 = arith.constant dense<0.000000e+00> : vector<8x96xf32>
      %548 = tpu.matmul %547, %383, %cst_187 {dimension_numbers = #tpu.dot_dimension_numbers<[1], [0], [0], [1], [0, 0, 1, 1], [], []>} : vector<8x32xbf16>, vector<32x96xbf16>, vector<8x96xf32> -> vector<8x96xf32>
      %549 = vector.extract_strided_slice %546 {offsets = [0, 0], sizes = [8, 32], strides = [1, 1]} : vector<8x96xf32> to vector<8x32xf32>
      %550 = vector.extract_strided_slice %548 {offsets = [0, 0], sizes = [8, 32], strides = [1, 1]} : vector<8x96xf32> to vector<8x32xf32>
      %551 = arith.addf %549, %550 : vector<8x32xf32>
      %cst_188 = arith.constant 5.000000e-01 : f32
      %552 = vector.broadcast %cst_188 : f32 to vector<8x32xf32>
      %553 = arith.mulf %552, %551 : vector<8x32xf32>
      %554 = math.tanh %553 : vector<8x32xf32>
      %cst_189 = arith.constant 1.000000e+00 : f32
      %555 = vector.broadcast %cst_189 : f32 to vector<8x32xf32>
      %556 = arith.addf %554, %555 : vector<8x32xf32>
      %cst_190 = arith.constant 5.000000e-01 : f32
      %557 = vector.broadcast %cst_190 : f32 to vector<8x32xf32>
      %558 = arith.mulf %557, %556 : vector<8x32xf32>
      %559 = vector.extract_strided_slice %546 {offsets = [0, 32], sizes = [8, 32], strides = [1, 1]} : vector<8x96xf32> to vector<8x32xf32>
      %560 = vector.extract_strided_slice %548 {offsets = [0, 32], sizes = [8, 32], strides = [1, 1]} : vector<8x96xf32> to vector<8x32xf32>
      %561 = arith.addf %559, %560 : vector<8x32xf32>
      %cst_191 = arith.constant 5.000000e-01 : f32
      %562 = vector.broadcast %cst_191 : f32 to vector<8x32xf32>
      %563 = arith.mulf %562, %561 : vector<8x32xf32>
      %564 = math.tanh %563 : vector<8x32xf32>
      %cst_192 = arith.constant 1.000000e+00 : f32
      %565 = vector.broadcast %cst_192 : f32 to vector<8x32xf32>
      %566 = arith.addf %564, %565 : vector<8x32xf32>
      %cst_193 = arith.constant 5.000000e-01 : f32
      %567 = vector.broadcast %cst_193 : f32 to vector<8x32xf32>
      %568 = arith.mulf %567, %566 : vector<8x32xf32>
      %569 = vector.extract_strided_slice %546 {offsets = [0, 64], sizes = [8, 32], strides = [1, 1]} : vector<8x96xf32> to vector<8x32xf32>
      %570 = vector.extract_strided_slice %548 {offsets = [0, 64], sizes = [8, 32], strides = [1, 1]} : vector<8x96xf32> to vector<8x32xf32>
      %571 = arith.addf %570, %386 : vector<8x32xf32>
      %572 = arith.mulf %558, %571 : vector<8x32xf32>
      %573 = arith.addf %569, %572 : vector<8x32xf32>
      %574 = math.tanh %573 : vector<8x32xf32>
      %cst_194 = arith.constant 1.000000e+00 : f32
      %575 = vector.broadcast %cst_194 : f32 to vector<8x32xf32>
      %576 = arith.subf %575, %568 : vector<8x32xf32>
      %577 = arith.mulf %576, %574 : vector<8x32xf32>
      %578 = arith.mulf %568, %540 : vector<8x32xf32>
      %579 = arith.addf %577, %578 : vector<8x32xf32>
      %580 = arith.index_cast %544 : i32 to index
      %c0_195 = arith.constant 0 : index
      %581 = vector.load %arg19[%580, %c0_195] : memref<64x32xf32, #tpu.memory_space<vmem>>, vector<8x32xf32>
      tpu.vector_store %arg19[%580, %c0_195], %579 {strides = array<i32>} : memref<64x32xf32, #tpu.memory_space<vmem>>, vector<8x32xf32>,
      %c5_i32_196 = arith.constant 5 : i32
      %c8_i32_197 = arith.constant 8 : i32
      %582 = arith.muli %c5_i32_196, %c8_i32_197 : i32
      %583 = tpu.assume_multiple %582, 8 : i32
      %584 = arith.index_cast %583 : i32 to index
      %c0_198 = arith.constant 0 : index
      %585 = vector.load %arg18[%584, %c0_198] : memref<64x96xf32, #tpu.memory_space<vmem>>, vector<8x96xf32>
      %586 = arith.truncf %579 : vector<8x32xf32> to vector<8x32xbf16>
      %cst_199 = arith.constant dense<0.000000e+00> : vector<8x96xf32>
      %587 = tpu.matmul %586, %383, %cst_199 {dimension_numbers = #tpu.dot_dimension_numbers<[1], [0], [0], [1], [0, 0, 1, 1], [], []>} : vector<8x32xbf16>, vector<32x96xbf16>, vector<8x96xf32> -> vector<8x96xf32>
      %588 = vector.extract_strided_slice %585 {offsets = [0, 0], sizes = [8, 32], strides = [1, 1]} : vector<8x96xf32> to vector<8x32xf32>
      %589 = vector.extract_strided_slice %587 {offsets = [0, 0], sizes = [8, 32], strides = [1, 1]} : vector<8x96xf32> to vector<8x32xf32>
      %590 = arith.addf %588, %589 : vector<8x32xf32>
      %cst_200 = arith.constant 5.000000e-01 : f32
      %591 = vector.broadcast %cst_200 : f32 to vector<8x32xf32>
      %592 = arith.mulf %591, %590 : vector<8x32xf32>
      %593 = math.tanh %592 : vector<8x32xf32>
      %cst_201 = arith.constant 1.000000e+00 : f32
      %594 = vector.broadcast %cst_201 : f32 to vector<8x32xf32>
      %595 = arith.addf %593, %594 : vector<8x32xf32>
      %cst_202 = arith.constant 5.000000e-01 : f32
      %596 = vector.broadcast %cst_202 : f32 to vector<8x32xf32>
      %597 = arith.mulf %596, %595 : vector<8x32xf32>
      %598 = vector.extract_strided_slice %585 {offsets = [0, 32], sizes = [8, 32], strides = [1, 1]} : vector<8x96xf32> to vector<8x32xf32>
      %599 = vector.extract_strided_slice %587 {offsets = [0, 32], sizes = [8, 32], strides = [1, 1]} : vector<8x96xf32> to vector<8x32xf32>
      %600 = arith.addf %598, %599 : vector<8x32xf32>
      %cst_203 = arith.constant 5.000000e-01 : f32
      %601 = vector.broadcast %cst_203 : f32 to vector<8x32xf32>
      %602 = arith.mulf %601, %600 : vector<8x32xf32>
      %603 = math.tanh %602 : vector<8x32xf32>
      %cst_204 = arith.constant 1.000000e+00 : f32
      %604 = vector.broadcast %cst_204 : f32 to vector<8x32xf32>
      %605 = arith.addf %603, %604 : vector<8x32xf32>
      %cst_205 = arith.constant 5.000000e-01 : f32
      %606 = vector.broadcast %cst_205 : f32 to vector<8x32xf32>
      %607 = arith.mulf %606, %605 : vector<8x32xf32>
      %608 = vector.extract_strided_slice %585 {offsets = [0, 64], sizes = [8, 32], strides = [1, 1]} : vector<8x96xf32> to vector<8x32xf32>
      %609 = vector.extract_strided_slice %587 {offsets = [0, 64], sizes = [8, 32], strides = [1, 1]} : vector<8x96xf32> to vector<8x32xf32>
      %610 = arith.addf %609, %386 : vector<8x32xf32>
      %611 = arith.mulf %597, %610 : vector<8x32xf32>
      %612 = arith.addf %608, %611 : vector<8x32xf32>
      %613 = math.tanh %612 : vector<8x32xf32>
      %cst_206 = arith.constant 1.000000e+00 : f32
      %614 = vector.broadcast %cst_206 : f32 to vector<8x32xf32>
      %615 = arith.subf %614, %607 : vector<8x32xf32>
      %616 = arith.mulf %615, %613 : vector<8x32xf32>
      %617 = arith.mulf %607, %579 : vector<8x32xf32>
      %618 = arith.addf %616, %617 : vector<8x32xf32>
      %619 = arith.index_cast %583 : i32 to index
      %c0_207 = arith.constant 0 : index
      %620 = vector.load %arg19[%619, %c0_207] : memref<64x32xf32, #tpu.memory_space<vmem>>, vector<8x32xf32>
      tpu.vector_store %arg19[%619, %c0_207], %618 {strides = array<i32>} : memref<64x32xf32, #tpu.memory_space<vmem>>, vector<8x32xf32>,
      %c6_i32_208 = arith.constant 6 : i32
      %c8_i32_209 = arith.constant 8 : i32
      %621 = arith.muli %c6_i32_208, %c8_i32_209 : i32
      %622 = tpu.assume_multiple %621, 8 : i32
      %623 = arith.index_cast %622 : i32 to index
      %c0_210 = arith.constant 0 : index
      %624 = vector.load %arg18[%623, %c0_210] : memref<64x96xf32, #tpu.memory_space<vmem>>, vector<8x96xf32>
      %625 = arith.truncf %618 : vector<8x32xf32> to vector<8x32xbf16>
      %cst_211 = arith.constant dense<0.000000e+00> : vector<8x96xf32>
      %626 = tpu.matmul %625, %383, %cst_211 {dimension_numbers = #tpu.dot_dimension_numbers<[1], [0], [0], [1], [0, 0, 1, 1], [], []>} : vector<8x32xbf16>, vector<32x96xbf16>, vector<8x96xf32> -> vector<8x96xf32>
      %627 = vector.extract_strided_slice %624 {offsets = [0, 0], sizes = [8, 32], strides = [1, 1]} : vector<8x96xf32> to vector<8x32xf32>
      %628 = vector.extract_strided_slice %626 {offsets = [0, 0], sizes = [8, 32], strides = [1, 1]} : vector<8x96xf32> to vector<8x32xf32>
      %629 = arith.addf %627, %628 : vector<8x32xf32>
      %cst_212 = arith.constant 5.000000e-01 : f32
      %630 = vector.broadcast %cst_212 : f32 to vector<8x32xf32>
      %631 = arith.mulf %630, %629 : vector<8x32xf32>
      %632 = math.tanh %631 : vector<8x32xf32>
      %cst_213 = arith.constant 1.000000e+00 : f32
      %633 = vector.broadcast %cst_213 : f32 to vector<8x32xf32>
      %634 = arith.addf %632, %633 : vector<8x32xf32>
      %cst_214 = arith.constant 5.000000e-01 : f32
      %635 = vector.broadcast %cst_214 : f32 to vector<8x32xf32>
      %636 = arith.mulf %635, %634 : vector<8x32xf32>
      %637 = vector.extract_strided_slice %624 {offsets = [0, 32], sizes = [8, 32], strides = [1, 1]} : vector<8x96xf32> to vector<8x32xf32>
      %638 = vector.extract_strided_slice %626 {offsets = [0, 32], sizes = [8, 32], strides = [1, 1]} : vector<8x96xf32> to vector<8x32xf32>
      %639 = arith.addf %637, %638 : vector<8x32xf32>
      %cst_215 = arith.constant 5.000000e-01 : f32
      %640 = vector.broadcast %cst_215 : f32 to vector<8x32xf32>
      %641 = arith.mulf %640, %639 : vector<8x32xf32>
      %642 = math.tanh %641 : vector<8x32xf32>
      %cst_216 = arith.constant 1.000000e+00 : f32
      %643 = vector.broadcast %cst_216 : f32 to vector<8x32xf32>
      %644 = arith.addf %642, %643 : vector<8x32xf32>
      %cst_217 = arith.constant 5.000000e-01 : f32
      %645 = vector.broadcast %cst_217 : f32 to vector<8x32xf32>
      %646 = arith.mulf %645, %644 : vector<8x32xf32>
      %647 = vector.extract_strided_slice %624 {offsets = [0, 64], sizes = [8, 32], strides = [1, 1]} : vector<8x96xf32> to vector<8x32xf32>
      %648 = vector.extract_strided_slice %626 {offsets = [0, 64], sizes = [8, 32], strides = [1, 1]} : vector<8x96xf32> to vector<8x32xf32>
      %649 = arith.addf %648, %386 : vector<8x32xf32>
      %650 = arith.mulf %636, %649 : vector<8x32xf32>
      %651 = arith.addf %647, %650 : vector<8x32xf32>
      %652 = math.tanh %651 : vector<8x32xf32>
      %cst_218 = arith.constant 1.000000e+00 : f32
      %653 = vector.broadcast %cst_218 : f32 to vector<8x32xf32>
      %654 = arith.subf %653, %646 : vector<8x32xf32>
      %655 = arith.mulf %654, %652 : vector<8x32xf32>
      %656 = arith.mulf %646, %618 : vector<8x32xf32>
      %657 = arith.addf %655, %656 : vector<8x32xf32>
      %658 = arith.index_cast %622 : i32 to index
      %c0_219 = arith.constant 0 : index
      %659 = vector.load %arg19[%658, %c0_219] : memref<64x32xf32, #tpu.memory_space<vmem>>, vector<8x32xf32>
      tpu.vector_store %arg19[%658, %c0_219], %657 {strides = array<i32>} : memref<64x32xf32, #tpu.memory_space<vmem>>, vector<8x32xf32>,
      %c7_i32_220 = arith.constant 7 : i32
      %c8_i32_221 = arith.constant 8 : i32
      %660 = arith.muli %c7_i32_220, %c8_i32_221 : i32
      %661 = tpu.assume_multiple %660, 8 : i32
      %662 = arith.index_cast %661 : i32 to index
      %c0_222 = arith.constant 0 : index
      %663 = vector.load %arg18[%662, %c0_222] : memref<64x96xf32, #tpu.memory_space<vmem>>, vector<8x96xf32>
      %664 = arith.truncf %657 : vector<8x32xf32> to vector<8x32xbf16>
      %cst_223 = arith.constant dense<0.000000e+00> : vector<8x96xf32>
      %665 = tpu.matmul %664, %383, %cst_223 {dimension_numbers = #tpu.dot_dimension_numbers<[1], [0], [0], [1], [0, 0, 1, 1], [], []>} : vector<8x32xbf16>, vector<32x96xbf16>, vector<8x96xf32> -> vector<8x96xf32>
      %666 = vector.extract_strided_slice %663 {offsets = [0, 0], sizes = [8, 32], strides = [1, 1]} : vector<8x96xf32> to vector<8x32xf32>
      %667 = vector.extract_strided_slice %665 {offsets = [0, 0], sizes = [8, 32], strides = [1, 1]} : vector<8x96xf32> to vector<8x32xf32>
      %668 = arith.addf %666, %667 : vector<8x32xf32>
      %cst_224 = arith.constant 5.000000e-01 : f32
      %669 = vector.broadcast %cst_224 : f32 to vector<8x32xf32>
      %670 = arith.mulf %669, %668 : vector<8x32xf32>
      %671 = math.tanh %670 : vector<8x32xf32>
      %cst_225 = arith.constant 1.000000e+00 : f32
      %672 = vector.broadcast %cst_225 : f32 to vector<8x32xf32>
      %673 = arith.addf %671, %672 : vector<8x32xf32>
      %cst_226 = arith.constant 5.000000e-01 : f32
      %674 = vector.broadcast %cst_226 : f32 to vector<8x32xf32>
      %675 = arith.mulf %674, %673 : vector<8x32xf32>
      %676 = vector.extract_strided_slice %663 {offsets = [0, 32], sizes = [8, 32], strides = [1, 1]} : vector<8x96xf32> to vector<8x32xf32>
      %677 = vector.extract_strided_slice %665 {offsets = [0, 32], sizes = [8, 32], strides = [1, 1]} : vector<8x96xf32> to vector<8x32xf32>
      %678 = arith.addf %676, %677 : vector<8x32xf32>
      %cst_227 = arith.constant 5.000000e-01 : f32
      %679 = vector.broadcast %cst_227 : f32 to vector<8x32xf32>
      %680 = arith.mulf %679, %678 : vector<8x32xf32>
      %681 = math.tanh %680 : vector<8x32xf32>
      %cst_228 = arith.constant 1.000000e+00 : f32
      %682 = vector.broadcast %cst_228 : f32 to vector<8x32xf32>
      %683 = arith.addf %681, %682 : vector<8x32xf32>
      %cst_229 = arith.constant 5.000000e-01 : f32
      %684 = vector.broadcast %cst_229 : f32 to vector<8x32xf32>
      %685 = arith.mulf %684, %683 : vector<8x32xf32>
      %686 = vector.extract_strided_slice %663 {offsets = [0, 64], sizes = [8, 32], strides = [1, 1]} : vector<8x96xf32> to vector<8x32xf32>
      %687 = vector.extract_strided_slice %665 {offsets = [0, 64], sizes = [8, 32], strides = [1, 1]} : vector<8x96xf32> to vector<8x32xf32>
      %688 = arith.addf %687, %386 : vector<8x32xf32>
      %689 = arith.mulf %675, %688 : vector<8x32xf32>
      %690 = arith.addf %686, %689 : vector<8x32xf32>
      %691 = math.tanh %690 : vector<8x32xf32>
      %cst_230 = arith.constant 1.000000e+00 : f32
      %692 = vector.broadcast %cst_230 : f32 to vector<8x32xf32>
      %693 = arith.subf %692, %685 : vector<8x32xf32>
      %694 = arith.mulf %693, %691 : vector<8x32xf32>
      %695 = arith.mulf %685, %657 : vector<8x32xf32>
      %696 = arith.addf %694, %695 : vector<8x32xf32>
      %697 = arith.index_cast %661 : i32 to index
      %c0_231 = arith.constant 0 : index
      %698 = vector.load %arg19[%697, %c0_231] : memref<64x32xf32, #tpu.memory_space<vmem>>, vector<8x32xf32>
      tpu.vector_store %arg19[%697, %c0_231], %696 {strides = array<i32>} : memref<64x32xf32, #tpu.memory_space<vmem>>, vector<8x32xf32>,
      %c8_i32_232 = arith.constant 8 : i32
      %cst_233 = arith.constant -1.000000e+30 : f32
      %699 = vector.broadcast %cst_233 : f32 to vector<64x1xf32>
      %c0_234 = arith.constant 0 : index
      %c0_235 = arith.constant 0 : index
      %700 = vector.load %arg20[%c0_234, %c0_235] : memref<64x1xf32, #tpu.memory_space<vmem>>, vector<64x1xf32>
      tpu.vector_store %arg20[%c0_234, %c0_235], %699 {strides = array<i32>} : memref<64x1xf32, #tpu.memory_space<vmem>>, vector<64x1xf32>,
      %cst_236 = arith.constant 0.000000e+00 : f32
      %701 = vector.broadcast %cst_236 : f32 to vector<64x1xf32>
      %c0_237 = arith.constant 0 : index
      %c0_238 = arith.constant 0 : index
      %702 = vector.load %arg21[%c0_237, %c0_238] : memref<64x1xf32, #tpu.memory_space<vmem>>, vector<64x1xf32>
      tpu.vector_store %arg21[%c0_237, %c0_238], %701 {strides = array<i32>} : memref<64x1xf32, #tpu.memory_space<vmem>>, vector<64x1xf32>,
      %cst_239 = arith.constant 0.000000e+00 : f32
      %703 = vector.broadcast %cst_239 : f32 to vector<64x1xf32>
      %c0_240 = arith.constant 0 : index
      %c0_241 = arith.constant 0 : index
      %704 = vector.load %arg22[%c0_240, %c0_241] : memref<64x1xf32, #tpu.memory_space<vmem>>, vector<64x1xf32>
      tpu.vector_store %arg22[%c0_240, %c0_241], %703 {strides = array<i32>} : memref<64x1xf32, #tpu.memory_space<vmem>>, vector<64x1xf32>,
    } else {
    }
    %c0 = arith.constant 0 : index
    %c0_1 = arith.constant 0 : index
    %3 = vector.load %arg19[%c0, %c0_1] : memref<64x32xf32, #tpu.memory_space<vmem>>, vector<64x32xf32>
    %4 = arith.truncf %3 : vector<64x32xf32> to vector<64x32xbf16>
    %c0_2 = arith.constant 0 : index
    %c0_3 = arith.constant 0 : index
    %5 = vector.load %arg14[%c0_2, %c0_3] : memref<32x128xbf16, #tpu.memory_space<vmem>>, vector<32x128xbf16>
    %cst = arith.constant dense<0.000000e+00> : vector<64x128xf32>
    %6 = tpu.matmul %4, %5, %cst {dimension_numbers = #tpu.dot_dimension_numbers<[1], [0], [0], [1], [0, 0, 1, 1], [], []>} : vector<64x32xbf16>, vector<32x128xbf16>, vector<64x128xf32> -> vector<64x128xf32>
    %c0_4 = arith.constant 0 : index
    %c0_5 = arith.constant 0 : index
    %7 = vector.load %arg15[%c0_4, %c0_5] : memref<1x128xf32, #tpu.memory_space<vmem>>, vector<1x128xf32>
    %8 = vector.broadcast %7 : vector<1x128xf32> to vector<64x128xf32>
    %9 = arith.addf %6, %8 : vector<64x128xf32>
    %c0_6 = arith.constant 0 : index
    %c0_7 = arith.constant 0 : index
    %10 = vector.load %arg20[%c0_6, %c0_7] : memref<64x1xf32, #tpu.memory_space<vmem>>, vector<64x1xf32>
    %cst_8 = arith.constant dense<0xFF800000> : vector<64xf32>
    %11 = vector.multi_reduction <maximumf>, %9, %cst_8 [1] : vector<64x128xf32> to vector<64xf32>
    %12 = vector.shape_cast %11 : vector<64xf32> to vector<64x1xf32>
    %13 = arith.maximumf %10, %12 : vector<64x1xf32>
    %14 = arith.subf %10, %13 : vector<64x1xf32>
    %15 = math.exp %14 : vector<64x1xf32>
    %c0_9 = arith.constant 0 : index
    %c0_10 = arith.constant 0 : index
    %16 = vector.load %arg21[%c0_9, %c0_10] : memref<64x1xf32, #tpu.memory_space<vmem>>, vector<64x1xf32>
    %17 = arith.mulf %15, %16 : vector<64x1xf32>
    %18 = vector.broadcast %13 : vector<64x1xf32> to vector<64x128xf32>
    %19 = arith.subf %9, %18 : vector<64x128xf32>
    %20 = math.exp %19 : vector<64x128xf32>
    %cst_11 = arith.constant dense<0.000000e+00> : vector<64xf32>
    %21 = vector.multi_reduction <add>, %20, %cst_11 [1] : vector<64x128xf32> to vector<64xf32>
    %22 = vector.shape_cast %21 : vector<64xf32> to vector<64x1xf32>
    %23 = arith.addf %17, %22 : vector<64x1xf32>
    %c0_12 = arith.constant 0 : index
    %c0_13 = arith.constant 0 : index
    %24 = vector.load %arg21[%c0_12, %c0_13] : memref<64x1xf32, #tpu.memory_space<vmem>>, vector<64x1xf32>
    tpu.vector_store %arg21[%c0_12, %c0_13], %23 {strides = array<i32>} : memref<64x1xf32, #tpu.memory_space<vmem>>, vector<64x1xf32>,
    %c0_14 = arith.constant 0 : index
    %c0_15 = arith.constant 0 : index
    %25 = vector.load %arg20[%c0_14, %c0_15] : memref<64x1xf32, #tpu.memory_space<vmem>>, vector<64x1xf32>
    tpu.vector_store %arg20[%c0_14, %c0_15], %13 {strides = array<i32>} : memref<64x1xf32, #tpu.memory_space<vmem>>, vector<64x1xf32>,
    %c128_i32 = arith.constant 128 : i32
    %26 = arith.muli %arg0, %c128_i32 : i32
    %27 = tpu.iota {dimensions = array<i32: 1>} : vector<64x128xi32>
    %28 = vector.broadcast %26 : i32 to vector<64x128xi32>
    %29 = arith.addi %27, %28 : vector<64x128xi32>
    %c0_16 = arith.constant 0 : index
    %c0_17 = arith.constant 0 : index
    %30 = vector.load %arg22[%c0_16, %c0_17] : memref<64x1xf32, #tpu.memory_space<vmem>>, vector<64x1xf32>
    %c0_18 = arith.constant 0 : index
    %c0_19 = arith.constant 0 : index
    %31 = vector.load %arg12[%c0_18, %c0_19] : memref<64x1xi32, #tpu.memory_space<vmem>>, vector<64x1xi32>
    %32 = vector.broadcast %31 : vector<64x1xi32> to vector<64x128xi32>
    %33 = arith.cmpi eq, %29, %32 : vector<64x128xi32>
    %cst_20 = arith.constant 0.000000e+00 : f32
    %34 = vector.broadcast %cst_20 : f32 to vector<64x128xf32>
    %35 = arith.select %33, %9, %34 : vector<64x128xi1>, vector<64x128xf32>
    %cst_21 = arith.constant dense<0.000000e+00> : vector<64xf32>
    %36 = vector.multi_reduction <add>, %35, %cst_21 [1] : vector<64x128xf32> to vector<64xf32>
    %37 = vector.shape_cast %36 : vector<64xf32> to vector<64x1xf32>
    %38 = arith.addf %30, %37 : vector<64x1xf32>
    %c0_22 = arith.constant 0 : index
    %c0_23 = arith.constant 0 : index
    %39 = vector.load %arg22[%c0_22, %c0_23] : memref<64x1xf32, #tpu.memory_space<vmem>>, vector<64x1xf32>
    tpu.vector_store %arg22[%c0_22, %c0_23], %38 {strides = array<i32>} : memref<64x1xf32, #tpu.memory_space<vmem>>, vector<64x1xf32>,
    %c0_i32_24 = arith.constant 0 : i32
    %40 = arith.cmpi eq, %arg0, %c0_i32_24 : i32
    %41 = arith.extui %40 : i1 to i32
    %c0_i32_25 = arith.constant 0 : i32
    %42 = arith.cmpi ne, %41, %c0_i32_25 : i32
    scf.if %42 {
      %c0_26 = arith.constant 0 : index
      %c0_27 = arith.constant 0 : index
      %43 = vector.load %arg20[%c0_26, %c0_27] : memref<64x1xf32, #tpu.memory_space<vmem>>, vector<64x1xf32>
      %c0_28 = arith.constant 0 : index
      %c0_29 = arith.constant 0 : index
      %44 = vector.load %arg21[%c0_28, %c0_29] : memref<64x1xf32, #tpu.memory_space<vmem>>, vector<64x1xf32>
      %45 = math.log %44 : vector<64x1xf32>
      %46 = arith.addf %43, %45 : vector<64x1xf32>
      %c0_30 = arith.constant 0 : index
      %c0_31 = arith.constant 0 : index
      %47 = vector.load %arg22[%c0_30, %c0_31] : memref<64x1xf32, #tpu.memory_space<vmem>>, vector<64x1xf32>
      %48 = arith.subf %46, %47 : vector<64x1xf32>
      %c0_32 = arith.constant 0 : index
      %c0_33 = arith.constant 0 : index
      %49 = vector.load %arg13[%c0_32, %c0_33] : memref<64x1xf32, #tpu.memory_space<vmem>>, vector<64x1xf32>
      %50 = arith.mulf %48, %49 : vector<64x1xf32>
      %cst_34 = arith.constant dense<0.000000e+00> : vector<1xf32>
      %51 = vector.multi_reduction <add>, %50, %cst_34 [0] : vector<64x1xf32> to vector<1xf32>
      %52 = vector.shape_cast %51 : vector<1xf32> to vector<1x1xf32>
      %c0_35 = arith.constant 0 : index
      %c0_36 = arith.constant 0 : index
      %53 = vector.load %arg16[%c0_35, %c0_36] : memref<1x1xf32, #tpu.memory_space<vmem>>, vector<1x1xf32>
      tpu.vector_store %arg16[%c0_35, %c0_36], %52 {strides = array<i32>} : memref<1x1xf32, #tpu.memory_space<vmem>>, vector<1x1xf32>,
    } else {
    }
    return
  }
  func.func @transform_0(%arg0: i32) -> (i32, i32) {
    %c0_i32 = arith.constant 0 : i32
    %c0_i32_0 = arith.constant 0 : i32
    %c0_i32_1 = arith.constant 0 : i32
    return %c0_i32, %c0_i32_0 : i32, i32
  }
  func.func @transform_1(%arg0: i32) -> (i32, i32) {
    %c0_i32 = arith.constant 0 : i32
    %c0_i32_0 = arith.constant 0 : i32
    %c0_i32_1 = arith.constant 0 : i32
    return %c0_i32, %c0_i32_0 : i32, i32
  }
  func.func @transform_2(%arg0: i32) -> (i32, i32) {
    %c0_i32 = arith.constant 0 : i32
    %c0_i32_0 = arith.constant 0 : i32
    %c0_i32_1 = arith.constant 0 : i32
    return %c0_i32, %c0_i32_0 : i32, i32
  }
  func.func @transform_3(%arg0: i32) -> (i32, i32) {
    %c0_i32 = arith.constant 0 : i32
    %c0_i32_0 = arith.constant 0 : i32
    %c0_i32_1 = arith.constant 0 : i32
    return %c0_i32, %c0_i32_0 : i32, i32
  }
  func.func @transform_4(%arg0: i32) -> (i32, i32) {
    %c0_i32 = arith.constant 0 : i32
    %c0_i32_0 = arith.constant 0 : i32
    %c0_i32_1 = arith.constant 0 : i32
    return %c0_i32, %c0_i32_0 : i32, i32
  }
  func.func @transform_5(%arg0: i32) -> (i32, i32) {
    %c0_i32 = arith.constant 0 : i32
    %c0_i32_0 = arith.constant 0 : i32
    %c0_i32_1 = arith.constant 0 : i32
    return %c0_i32, %c0_i32_0 : i32, i32
  }
  func.func @transform_6(%arg0: i32) -> (i32, i32) {
    %c0_i32 = arith.constant 0 : i32
    %c0_i32_0 = arith.constant 0 : i32
    %c0_i32_1 = arith.constant 0 : i32
    return %c0_i32, %c0_i32_0 : i32, i32
  }
  func.func @transform_7(%arg0: i32) -> (i32, i32) {
    %c0_i32 = arith.constant 0 : i32
    %c0_i32_0 = arith.constant 0 : i32
    %c0_i32_1 = arith.constant 0 : i32
    return %c0_i32, %c0_i32_0 : i32, i32
  }
  func.func @transform_8(%arg0: i32) -> (i32, i32) {
    %c0_i32 = arith.constant 0 : i32
    %c0_i32_0 = arith.constant 0 : i32
    %c0_i32_1 = arith.constant 0 : i32
    return %c0_i32, %c0_i32_0 : i32, i32
  }
  func.func @transform_9(%arg0: i32) -> (i32, i32) {
    %c0_i32 = arith.constant 0 : i32
    %c0_i32_0 = arith.constant 0 : i32
    %c0_i32_1 = arith.constant 0 : i32
    return %c0_i32, %c0_i32_0 : i32, i32
  }
  func.func @transform_10(%arg0: i32) -> (i32, i32) {
    %c0_i32 = arith.constant 0 : i32
    %c0_i32_0 = arith.constant 0 : i32
    %c0_i32_1 = arith.constant 0 : i32
    return %c0_i32, %c0_i32_0 : i32, i32
  }
  func.func @transform_11(%arg0: i32) -> (i32, i32) {
    %c0_i32 = arith.constant 0 : i32
    %c0_i32_0 = arith.constant 0 : i32
    %c0_i32_1 = arith.constant 0 : i32
    return %c0_i32, %c0_i32_0 : i32, i32
  }
  func.func @transform_12(%arg0: i32) -> (i32, i32) {
    %c0_i32 = arith.constant 0 : i32
    %c0_i32_0 = arith.constant 0 : i32
    %c0_i32_1 = arith.constant 0 : i32
    return %c0_i32, %c0_i32_0 : i32, i32
  }
  func.func @transform_13(%arg0: i32) -> (i32, i32) {
    %c0_i32 = arith.constant 0 : i32
    %c0_i32_0 = arith.constant 0 : i32
    return %c0_i32, %arg0 : i32, i32
  }
  func.func @transform_14(%arg0: i32) -> (i32, i32) {
    %c0_i32 = arith.constant 0 : i32
    %c0_i32_0 = arith.constant 0 : i32
    return %c0_i32, %arg0 : i32, i32
  }
  func.func @transform_15(%arg0: i32) -> (i32, i32) {
    %c0_i32 = arith.constant 0 : i32
    %c0_i32_0 = arith.constant 0 : i32
    %c0_i32_1 = arith.constant 0 : i32
    return %c0_i32, %c0_i32_0 : i32, i32
  }
}

</mosaic_0001>

<bundles_post_ra>
// kernel: tpu_custom_call.1
= control target key start
LH: loop header
LB: loop body
LE: loop exit
PB: predicated region body
PF: predicated region fallthrough
CT: control target
= control target key end

     0   :  { %vm107_vm0 = vcmask 261120   ;;  %v2628_v5 = vmov 0   ;;  %s2629_s29 = smov 64   ;;  %v2630_v7 = vmov 0.0   ;;  %vm2631_vm1 = vmmov 0   ;;  %s3359_s0 = inlined_call_operand.vmem [shape: bf16[64,32], index: 0, kind: input, shape index: {}]   ;;  %s3360_s1 = inlined_call_operand.vmem [shape: s32[8,32], index: 1, kind: input, shape index: {}]   ;;  %s3361_s2 = inlined_call_operand.vmem [shape: bf16[32,96], index: 2, kind: input, shape index: {}]   ;;  %s3362_s3 = inlined_call_operand.vmem [shape: bf16[32,96], index: 3, kind: input, shape index: {}]   ;;  %s3363_s4 = inlined_call_operand.vmem [shape: f32[1,96], index: 4, kind: input, shape index: {}]   ;;  %s3364_s5 = inlined_call_operand.vmem [shape: f32[1,32], index: 5, kind: input, shape index: {}]   ;;  %s3365_s6 = inlined_call_operand.vmem [shape: bf16[64,32], index: 6, kind: input, shape index: {}]   ;;  %s3366_s7 = inlined_call_operand.vmem [shape: bf16[32,96], index: 7, kind: input, shape index: {}]   ;;  %s3367_s8 = inlined_call_operand.vmem [shape: bf16[32,96], index: 8, kind: input, shape index: {}]   ;;  %s3368_s9 = inlined_call_operand.vmem [shape: f32[1,96], index: 9, kind: input, shape index: {}]   ;;  %s3369_s10 = inlined_call_operand.vmem [shape: f32[1,32], index: 10, kind: input, shape index: {}]   ;;  %s3370_s11 = inlined_call_operand.vmem [shape: s32[64,1], index: 11, kind: input, shape index: {}]   ;;  %s3371_s12 = inlined_call_operand.vmem [shape: f32[64,1], index: 12, kind: input, shape index: {}]   ;;  %s3372_s13 = inlined_call_operand.vmem [shape: bf16[32,128], index: 13, kind: input, shape index: {}]   ;;  %s3373_s14 = inlined_call_operand.vmem [shape: f32[1,128], index: 14, kind: input, shape index: {}]   ;;  %s3374_s15 = inlined_call_operand.hbm [shape: f32[1,1], index: 15, kind: output, shape index: {}]  }
   0x1   :  { %v2476_v0 = vld [vmem:[%s3361_s2 + $0x8] sm:$0xff]   ;;  %v2477_v1 = vld [vmem:[%s3361_s2] sm:$0xff]   ;;  %2474 = vset.pattern.permute.xlu0 %v2628_v5  ;;  %2475 = vset.pattern.permute.xlu1 %v2628_v5 }
   0x2   :  { %2298 = vmatprep.subr.bf16.mxu0 %v2476_v0  ;;  %v2478_v2 = vld [vmem:[%s3359_s0] sm:$0xff]   ;;  %2462 = vmatprep.subr.bf16.mxu1 %v2476_v0  ;;  %v2479_v3 = vld [vmem:[%s3359_s0 + $0x8] sm:$0xff]  }
   0x3   :  { %2299 = vmatpush3.bf16.msra.mxu0 %v2476_v0  ;;  %2464 = vmatpush3.bf16.msra.mxu1 %v2476_v0  ;;  %v2732_v4 = vld [vmem:[%s3362_s3 + $0x8] sm:$0xff]   ;;  %v2204_v6 = vld [vmem:[%s3364_s5] ss:$0 sm:$0xff] }
   0x4   :  { %2300 = vmatprep.subr.bf16.mxu0 %v2477_v1  ;;  %2302 = vmatprep.mubr.msk.bf16.mxu0 %vm107_vm0, %v2478_v2  ;;  %v2742_v8 = vld [vmem:[%s3362_s3] sm:$0xff]  }
   0x5   :  { %2463 = vmatprep.subr.bf16.mxu1 %v2477_v1  ;;  %402 = vrot.lane.b32.xlu0 %v2204_v6, %s2629_s29 }
   0x7   :  { %2301 = vmatpush3.bf16.msra.mxu0 %v2477_v1  ;;  %2465 = vmatpush3.bf16.msra.mxu1 %v2477_v1 }
   0x8   :  { %2322 = vmatprep.subr.bf16.mxu0 %v2630_v7 }
   0xa   :  { %2303 = vmatmul.mubr.msk.bf16.vlgmr.msra.gmra.mxu0 %vm107_vm0, %v2479_v3 }
   0xb   :  { %2323 = vmatpush3.bf16.msra.mxu0 %v2732_v4  ;;  %2326 = vmatprep.mubr.msk.bf16.mxu0 %vm2631_vm1, %v2630_v7 }
   0xc   :  { %2324 = vmatprep.subr.bf16.mxu0 %v2630_v7 }
   0xd   :  { %20 = vsyncpa [#allocation9], 0  ;;  %v2760_v9 = vld [vmem:[%s3363_s4] ss:$0 sm:$0xff]  ;;  %vm185_vm2 = vcmask 785408   ;;  %v2482_v34 = vld [vmem:[%s3359_s0 + $0x10] sm:$0xff]  }
   0xe   :  { %v2483_v35 = vld [vmem:[%s3359_s0 + $0x18] sm:$0xff]   ;;  %v2484_v36 = vld [vmem:[%s3366_s7 + $0x8] sm:$0xff]   ;;  %v2485_v37 = vld [vmem:[%s3366_s7] sm:$0xff]   ;;  %2306 = vmatprep.mubr.msk.bf16.mxu1 %vm107_vm0, %v2482_v34  ;;  %s2632_s2 = smov 96   ;;  %vm1662_vm11 = vcmask 7168   ;;  %s2635_s25 = smov [#allocation8]  }
   0xf   :  { %2325 = vmatpush3.bf16.msra.mxu0 %v2742_v8  ;;  %v2486_v38 = vld [vmem:[%s3365_s6] sm:$0xff]   ;;  %2310 = vmatprep.subr.bf16.mxu1 %v2484_v36  ;;  %v2487_v39 = vld [vmem:[%s3365_s6 + $0x8] sm:$0xff]   ;;  %v2488_v41 = vld [vmem:[%s3365_s6 + $0x10] sm:$0xff]   ;;  %1671 = vst.msk [vmem:[#allocation6] sm:$0xff] %vm1662_vm11, %v2630_v7  ;;  %s2174_s0 = sshll.u32 %s2635_s25, 4  ;;  %s2175_s0 = int_to_ptr.vmem [resolvable:$true] %s2174_s0 }
  0x10   :  { %2338 = vmatprep.subr.bf16.mxu0 %v2630_v7  ;;  %2307 = vmatmul.mubr.msk.bf16.vlgmr.msra.gmra.mxu1 %vm107_vm0, %v2483_v35  ;;  %v2489_v42 = vld [vmem:[%s3365_s6 + $0x18] sm:$0xff]   ;;  %v2193_v55 = vld [vmem:[%s3368_s9] ss:$0 sm:$0xff]  ;;  %1672 = vst.msk [vmem:[#allocation6 + $0x8] sm:$0xff] %vm1662_vm11, %v2630_v7  ;;  %1673 = vst.msk [vmem:[#allocation6 + $0x10] sm:$0xff] %vm1662_vm11, %v2630_v7  ;;  %s2610_s26 = scalar_lea.vmem %s2175_s0, 32  ;;  %p2611_p1 = scmp.lt.s32.totalorder %s2175_s0, %s2175_s0 }
  0x11   :  { %2311 = vmatpush3.bf16.msra.mxu1 %v2484_v36  ;;  %2314 = vmatprep.mubr.msk.bf16.mxu1 %vm107_vm0, %v2486_v38  ;;  %1674 = vst.msk [vmem:[#allocation6 + $0x18] sm:$0xff] %vm1662_vm11, %v2630_v7  ;;  %1675 = vst.msk [vmem:[#allocation6 + $0x20] sm:$0xff] %vm1662_vm11, %v2630_v7 }
  0x12   :  { %2327 = vmatmul.mubr.bf16.vlgmr.msra.gmra.mxu0 %v2628_v5  ;;  %2312 = vmatprep.subr.bf16.mxu1 %v2485_v37  ;;  %1676 = vst.msk [vmem:[#allocation6 + $0x28] sm:$0xff] %vm1662_vm11, %v2630_v7  ;;  %1677 = vst.msk [vmem:[#allocation6 + $0x30] sm:$0xff] %vm1662_vm11, %v2630_v7 }
  0x13   :  { %2339 = vmatpush3.bf16.msra.mxu0 %v2732_v4  ;;  %2342 = vmatprep.mubr.msk.bf16.mxu0 %vm2631_vm1, %v2630_v7  ;;  %1678 = vst.msk [vmem:[#allocation6 + $0x38] sm:$0xff] %vm1662_vm11, %v2630_v7  ;;  %1679 = vst.msk [vmem:[#allocation7] sm:$0xff] %vm1662_vm11, %v2630_v7 }
  0x14   :  { %2340 = vmatprep.subr.bf16.mxu0 %v2630_v7  ;;  %1680 = vst.msk [vmem:[#allocation7 + $0x8] sm:$0xff] %vm1662_vm11, %v2630_v7  ;;  %1681 = vst.msk [vmem:[#allocation7 + $0x10] sm:$0xff] %vm1662_vm11, %v2630_v7 }
  0x15   :  { %2313 = vmatpush3.bf16.msra.mxu1 %v2485_v37  ;;  %1682 = vst.msk [vmem:[#allocation7 + $0x18] sm:$0xff] %vm1662_vm11, %v2630_v7  ;;  %1683 = vst.msk [vmem:[#allocation7 + $0x20] sm:$0xff] %vm1662_vm11, %v2630_v7 }
  0x16   :  { %2330 = vmatprep.subr.bf16.mxu1 %v2630_v7  ;;  %1684 = vst.msk [vmem:[#allocation7 + $0x28] sm:$0xff] %vm1662_vm11, %v2630_v7  ;;  %1685 = vst.msk [vmem:[#allocation7 + $0x30] sm:$0xff] %vm1662_vm11, %v2630_v7 }
  0x17   :  { %2341 = vmatpush3.bf16.msra.mxu0 %v2742_v8  ;;  %1686 = vst.msk [vmem:[#allocation7 + $0x38] sm:$0xff] %vm1662_vm11, %v2630_v7 }
  0x18   :  { %2354 = vmatprep.subr.bf16.mxu0 %v2630_v7  ;;  %2315 = vmatmul.mubr.msk.bf16.vlgmr.msra.gmra.mxu1 %vm107_vm0, %v2487_v39 }
  0x19   :  { %2331 = vmatpush3.bf16.msra.mxu1 %v2732_v4  ;;  %2318 = vmatprep.mubr.msk.bf16.mxu1 %vm107_vm0, %v2488_v41 }
  0x1a   :  { %2332 = vmatprep.subr.bf16.mxu1 %v2630_v7 }
  0x1d   :  { %2333 = vmatpush3.bf16.msra.mxu1 %v2742_v8 }
  0x1e   :  { %2346 = vmatprep.subr.bf16.mxu1 %v2630_v7 }
  0x20   :  { %2319 = vmatmul.mubr.msk.bf16.gmra.mxu1 %vm107_vm0, %v2489_v42 }
  0x21   :  { %2334 = vmatprep.mubr.msk.bf16.mxu1 %vm2631_vm1, %v2630_v7 }
  0x77   :  { %v2767_v17 = vpop.permute.xlu0 %402 }
  0xca   :  { %v2304_v10 = vpop.f32.mrf.mxu0 }
  0xcb   :  { %v163_v11 = vadd.f32 %v2304_v10, %v2760_v9 }
  0xcc   :  { %v154_v12 = vpop.f32.mrf.mxu0 }
  0xcd   :  { %188 = vst.msk [vmem:[#allocation2 + $0x10] sm:$0xff] %vm185_vm2, %v163_v11  ;;  %v155_v13 = vadd.f32 %v2760_v9, %v154_v12  ;;  %v2836_v12 = vld [vmem:[%s3360_s1] sm:$0xff]  ;;  %s2633_s1 = smov 32  }
  0xce   :  { %v2305_v14 = vpop.f32.mrf.mxu0  ;;  %vm425_vm3 = vcmp.gt.s32.totalorder %v2836_v12, 0  ;;  %vm506_vm4 = vcmp.gt.s32.totalorder %v2836_v12, 1  ;;  %vm587_vm5 = vcmp.gt.s32.totalorder %v2836_v12, 2  ;;  %vm668_vm6 = vcmp.gt.s32.totalorder %v2836_v12, 3 }
  0xcf   :  { %186 = vst.msk [vmem:[#allocation2] sm:$0xff] %vm185_vm2, %v155_v13  ;;  %v166_v15 = vadd.f32 %v2305_v14, %v2760_v9  ;;  %vm749_vm7 = vcmp.gt.s32.totalorder %v2836_v12, 4  ;;  %vm830_vm8 = vcmp.gt.s32.totalorder %v2836_v12, 5  ;;  %vm911_vm9 = vcmp.gt.s32.totalorder %v2836_v12, 6 }
  0xd0   :  { %v157_v16 = vpop.f32.mrf.mxu0  ;;  %v2308_v48 = vpop.f32.mrf.mxu1  ;;  %vm992_vm10 = vcmp.gt.s32.totalorder %v2836_v12, 7 }
  0xd1   :  { %189 = vst.msk [vmem:[#allocation2 + $0x18] sm:$0xff] %vm185_vm2, %v166_v15  ;;  %v158_v18 = vadd.f32 %v2760_v9, %v157_v16  ;;  %v179_v49 = vadd.f32 %v2308_v48, %v2760_v9 }
  0xd2   :  { %v391_v19 = vpop.f32.mrf.mxu0  ;;  %v170_v50 = vpop.f32.mrf.mxu1 }
  0xd3   :  { %187 = vst.msk [vmem:[#allocation2 + $0x8] sm:$0xff] %vm185_vm2, %v158_v18  ;;  %v405_v20 = vadd.f32 %v2767_v17, %v391_v19  ;;  %192 = vst.msk [vmem:[#allocation2 + $0x30] sm:$0xff] %vm185_vm2, %v179_v49  ;;  %v171_v51 = vadd.f32 %v2760_v9, %v170_v50 }
  0xd4   :  { %v2328_v21 = vpop.f32.mrf.mxu0  ;;  %v2309_v52 = vpop.f32.mrf.mxu1 }
  0xd5   :  { %407 = vrot.lane.b32.xlu0 %v405_v20, %s2629_s29  ;;  %190 = vst.msk [vmem:[#allocation2 + $0x20] sm:$0xff] %vm185_vm2, %v171_v51  ;;  %v182_v53 = vadd.f32 %v2309_v52, %v2760_v9 }
  0xd6   :  { %v394_v22 = vpop.f32.mrf.mxu0  ;;  %v341_v24 = vld [vmem:[#allocation2] sm:$0xff]  ;;  %v173_v54 = vpop.f32.mrf.mxu1 }
  0xd7   :  { %v397_v25 = vadd.f32 %v391_v19, %v341_v24  ;;  %193 = vst.msk [vmem:[#allocation2 + $0x38] sm:$0xff] %vm185_vm2, %v182_v53  ;;  %v174_v56 = vadd.f32 %v2760_v9, %v173_v54 }
  0xd8   :  { %v2329_v23 = vpop.f32.mrf.mxu0  ;;  %v2316_v57 = vpop.f32.mrf.mxu1 }
  0xd9   :  { %v398_v26 = vmul.f32 0.5, %v397_v25  ;;  %191 = vst.msk [vmem:[#allocation2 + $0x28] sm:$0xff] %vm185_vm2, %v174_v56  ;;  %v300_v58 = vadd.f32 %v2316_v57, %v2193_v55 }
  0xda   :  { %v291_v59 = vpop.f32.mrf.mxu1  ;;  %v432_v22 = vld [vmem:[#allocation2 + $0x8] sm:$0xff] }
  0xdb   :  { %2494 = vtanh.f32 %v398_v26  ;;  %324 = vst.msk [vmem:[#allocation3 + $0x10] sm:$0xff] %vm185_vm2, %v300_v58  ;;  %v292_v60 = vadd.f32 %v2193_v55, %v291_v59 }
  0xdc   :  { %v2317_v61 = vpop.f32.mrf.mxu1 }
  0xdd   :  { %322 = vst.msk [vmem:[#allocation3] sm:$0xff] %vm185_vm2, %v292_v60  ;;  %v303_v62 = vadd.f32 %v2317_v61, %v2193_v55 }
  0xde   :  { %v294_v63 = vpop.f32.mrf.mxu1 }
  0xdf   :  { %325 = vst.msk [vmem:[#allocation3 + $0x18] sm:$0xff] %vm185_vm2, %v303_v62  ;;  %v295_v0 = vadd.f32 %v2193_v55, %v294_v63 }
  0xe0   :  { %v2320_v1 = vpop.f32.mrf.mxu1 }
  0xe1   :  { %323 = vst.msk [vmem:[#allocation3 + $0x8] sm:$0xff] %vm185_vm2, %v295_v0  ;;  %v316_v2 = vadd.f32 %v2320_v1, %v2193_v55 }
  0xe2   :  { %v307_v3 = vpop.f32.mrf.mxu1 }
  0xe3   :  { %328 = vst.msk [vmem:[#allocation3 + $0x30] sm:$0xff] %vm185_vm2, %v316_v2  ;;  %v308_v5 = vadd.f32 %v2193_v55, %v307_v3 }
  0xe4   :  { %v2321_v6 = vpop.f32.mrf.mxu1 }
  0xe5   :  { %326 = vst.msk [vmem:[#allocation3 + $0x20] sm:$0xff] %vm185_vm2, %v308_v5  ;;  %v319_v9 = vadd.f32 %v2321_v6, %v2193_v55 }
  0xe6   :  { %v310_v10 = vpop.f32.mrf.mxu1 }
  0xe7   :  { %329 = vst.msk [vmem:[#allocation3 + $0x38] sm:$0xff] %vm185_vm2, %v319_v9  ;;  %v311_v11 = vadd.f32 %v2193_v55, %v310_v10 }
  0xe8   :  { %v2495_v27 = vpop.eup %2494 }
  0xe9   :  { %v400_v28 = vadd.f32 1.0, %v2495_v27  ;;  %327 = vst.msk [vmem:[#allocation3 + $0x28] sm:$0xff] %vm185_vm2, %v311_v11  ;;  %v594_v11 = vld [vmem:[#allocation2 + $0x18] sm:$0xff] }
  0xeb   :  { %v401_v29 = vmul.f32 0.5, %v400_v28 }
  0xed   :  { %v417_v43 = vsub.f32 1.0, %v401_v29  ;;  %v423_v45 = vmul.f32 0.0, %v401_v29 }
 0x147   :  { %v408_v30 = vpop.permute.xlu0 %407 }
 0x148   :  { %v410_v31 = vmul.f32 %v408_v30, %v401_v29 }
 0x14a   :  { %412 = vrot.lane.b32.xlu1 %v410_v31, %s2629_s29 }
 0x1bc   :  { %v413_v32 = vpop.permute.xlu1 %412 }
 0x1bd   :  { %v415_v33 = vadd.f32 %v413_v32, %v341_v24 }
 0x1bf   :  { %2496 = vtanh.f32 %v415_v33 }
 0x1cc   :  { %v2497_v40 = vpop.eup %2496 }
 0x1cd   :  { %419 = vrot.lane.b32.xlu1 %v2497_v40, %s2632_s2 }
 0x23f   :  { %v420_v44 = vpop.permute.xlu1 %419 }
 0x240   :  { %v422_v46 = vmul.f32 %v420_v44, %v417_v43 }
 0x242   :  { %v424_v47 = vadd.f32 %v423_v45, %v422_v46 }
 0x244   :  { %427 = vrot.lane.b32.xlu0 %v424_v47, %s2632_s2  ;;  %v513_v47 = vld [vmem:[#allocation2 + $0x10] sm:$0xff] }
 0x2b6   :  { %v428_v13 = vpop.permute.xlu0 %427 }
 0x2b7   :  { %v430_v14 = vsel %vm425_vm3, %v428_v13, 0.0 }
 0x2b8   :  { %v433_v15 = vpack.c.bf16 %v430_v14, %v430_v14 }
 0x2ba   :  { %2335 = vmatmul.mubr.msk.bf16.vlgmr.msra.gmra.mxu1 %vm107_vm0, %v433_v15 }
 0x2bb   :  { %2347 = vmatpush3.bf16.msra.mxu1 %v2732_v4  ;;  %2350 = vmatprep.mubr.msk.bf16.mxu1 %vm2631_vm1, %v2630_v7 }
 0x2bc   :  { %2348 = vmatprep.subr.bf16.mxu1 %v2630_v7 }
 0x2bf   :  { %2349 = vmatpush3.bf16.msra.mxu1 %v2742_v8 }
 0x2c0   :  { %2362 = vmatprep.subr.bf16.mxu1 %v2630_v7 }
 0x37a   :  { %v471_v16 = vpop.f32.mrf.mxu1 }
 0x37b   :  { %v482_v18 = vadd.f32 %v471_v16, %v2767_v17  ;;  %v477_v23 = vadd.f32 %v471_v16, %v432_v22 }
 0x37c   :  { %v2336_v19 = vpop.f32.mrf.mxu1 }
 0x37d   :  { %484 = vrot.lane.b32.xlu1 %v482_v18, %s2629_s29  ;;  %v478_v24 = vmul.f32 0.5, %v477_v23 }
 0x37e   :  { %v474_v20 = vpop.f32.mrf.mxu1 }
 0x37f   :  { %2498 = vtanh.f32 %v478_v24 }
 0x380   :  { %v2337_v21 = vpop.f32.mrf.mxu1 }
 0x38c   :  { %v2499_v25 = vpop.eup %2498 }
 0x38d   :  { %v480_v26 = vadd.f32 1.0, %v2499_v25 }
 0x38f   :  { %v481_v27 = vmul.f32 0.5, %v480_v26 }
 0x391   :  { %v494_v34 = vsub.f32 1.0, %v481_v27 }
 0x3ef   :  { %v485_v28 = vpop.permute.xlu1 %484 }
 0x3f0   :  { %v487_v29 = vmul.f32 %v485_v28, %v481_v27 }
 0x3f2   :  { %489 = vrot.lane.b32.xlu0 %v487_v29, %s2629_s29 }
 0x3f6   :  { %501 = vrot.lane.b32.xlu0 %v430_v14, %s2633_s1 }
 0x464   :  { %v490_v30 = vpop.permute.xlu0 %489 }
 0x465   :  { %v492_v31 = vadd.f32 %v490_v30, %v432_v22 }
 0x467   :  { %2500 = vtanh.f32 %v492_v31 }
 0x468   :  { %v502_v33 = vpop.permute.xlu0 %501 }
 0x469   :  { %v504_v36 = vmul.f32 %v502_v33, %v481_v27 }
 0x474   :  { %v2501_v32 = vpop.eup %2500 }
 0x475   :  { %496 = vrot.lane.b32.xlu1 %v2501_v32, %s2632_s2 }
 0x4e7   :  { %v497_v35 = vpop.permute.xlu1 %496 }
 0x4e8   :  { %v499_v37 = vmul.f32 %v497_v35, %v494_v34 }
 0x4ea   :  { %v505_v38 = vadd.f32 %v504_v36, %v499_v37 }
 0x4ec   :  { %508 = vrot.lane.b32.xlu1 %v505_v38, %s2632_s2  ;;  %v675_v38 = vld [vmem:[#allocation2 + $0x20] sm:$0xff] }
 0x55e   :  { %v509_v39 = vpop.permute.xlu1 %508 }
 0x55f   :  { %v511_v40 = vsel %vm506_vm4, %v509_v39, %v430_v14  ;;  %vm2166_vm4 = vcmask 0  }
 0x560   :  { %v514_v41 = vpack.c.bf16 %v511_v40, %v511_v40 }
 0x562   :  { %2343 = vmatmul.mubr.msk.bf16.vlgmr.msra.gmra.mxu0 %vm107_vm0, %v514_v41 }
 0x563   :  { %2355 = vmatpush3.bf16.msra.mxu0 %v2732_v4  ;;  %2358 = vmatprep.mubr.msk.bf16.mxu0 %vm2631_vm1, %v2630_v7 }
 0x564   :  { %2356 = vmatprep.subr.bf16.mxu0 %v2630_v7 }
 0x567   :  { %2357 = vmatpush3.bf16.msra.mxu0 %v2742_v8 }
 0x568   :  { %2370 = vmatprep.subr.bf16.mxu0 %v2630_v7 }
 0x622   :  { %v552_v42 = vpop.f32.mrf.mxu0 }
 0x623   :  { %v563_v43 = vadd.f32 %v552_v42, %v2767_v17  ;;  %v558_v48 = vadd.f32 %v552_v42, %v513_v47 }
 0x624   :  { %v2344_v44 = vpop.f32.mrf.mxu0 }
 0x625   :  { %565 = vrot.lane.b32.xlu0 %v563_v43, %s2629_s29  ;;  %v559_v49 = vmul.f32 0.5, %v558_v48 }
 0x626   :  { %v555_v45 = vpop.f32.mrf.mxu0 }
 0x627   :  { %2502 = vtanh.f32 %v559_v49 }
 0x628   :  { %v2345_v46 = vpop.f32.mrf.mxu0 }
 0x634   :  { %v2503_v50 = vpop.eup %2502 }
 0x635   :  { %v561_v51 = vadd.f32 1.0, %v2503_v50 }
 0x637   :  { %v562_v52 = vmul.f32 0.5, %v561_v51 }
 0x639   :  { %v575_v59 = vsub.f32 1.0, %v562_v52 }
 0x697   :  { %v566_v53 = vpop.permute.xlu0 %565 }
 0x698   :  { %v568_v54 = vmul.f32 %v566_v53, %v562_v52 }
 0x69a   :  { %570 = vrot.lane.b32.xlu1 %v568_v54, %s2629_s29 }
 0x69e   :  { %582 = vrot.lane.b32.xlu1 %v511_v40, %s2633_s1 }
 0x70c   :  { %v571_v55 = vpop.permute.xlu1 %570 }
 0x70d   :  { %v573_v56 = vadd.f32 %v571_v55, %v513_v47 }
 0x70f   :  { %2504 = vtanh.f32 %v573_v56 }
 0x710   :  { %v583_v58 = vpop.permute.xlu1 %582 }
 0x711   :  { %v585_v61 = vmul.f32 %v583_v58, %v562_v52 }
 0x71c   :  { %v2505_v57 = vpop.eup %2504 }
 0x71d   :  { %577 = vrot.lane.b32.xlu0 %v2505_v57, %s2632_s2 }
 0x78f   :  { %v578_v60 = vpop.permute.xlu0 %577 }
 0x790   :  { %v580_v62 = vmul.f32 %v578_v60, %v575_v59 }
 0x792   :  { %v586_v63 = vadd.f32 %v585_v61, %v580_v62 }
 0x794   :  { %589 = vrot.lane.b32.xlu0 %v586_v63, %s2632_s2  ;;  %v756_v63 = vld [vmem:[#allocation2 + $0x28] sm:$0xff] }
 0x806   :  { %v590_v0 = vpop.permute.xlu0 %589 }
 0x807   :  { %v592_v1 = vsel %vm587_vm5, %v590_v0, %v511_v40 }
 0x808   :  { %v595_v2 = vpack.c.bf16 %v592_v1, %v592_v1 }
 0x80a   :  { %2351 = vmatmul.mubr.msk.bf16.vlgmr.msra.gmra.mxu1 %vm107_vm0, %v595_v2 }
 0x80b   :  { %2363 = vmatpush3.bf16.msra.mxu1 %v2732_v4  ;;  %2366 = vmatprep.mubr.msk.bf16.mxu1 %vm2631_vm1, %v2630_v7 }
 0x80c   :  { %2364 = vmatprep.subr.bf16.mxu1 %v2630_v7 }
 0x80f   :  { %2365 = vmatpush3.bf16.msra.mxu1 %v2742_v8 }
 0x810   :  { %2378 = vmatprep.subr.bf16.mxu1 %v2630_v7 }
 0x8ca   :  { %v633_v3 = vpop.f32.mrf.mxu1 }
 0x8cb   :  { %v644_v5 = vadd.f32 %v633_v3, %v2767_v17  ;;  %v639_v13 = vadd.f32 %v633_v3, %v594_v11 }
 0x8cc   :  { %v2352_v6 = vpop.f32.mrf.mxu1 }
 0x8cd   :  { %646 = vrot.lane.b32.xlu1 %v644_v5, %s2629_s29  ;;  %v640_v14 = vmul.f32 0.5, %v639_v13 }
 0x8ce   :  { %v636_v9 = vpop.f32.mrf.mxu1 }
 0x8cf   :  { %2506 = vtanh.f32 %v640_v14 }
 0x8d0   :  { %v2353_v10 = vpop.f32.mrf.mxu1 }
 0x8dc   :  { %v2507_v15 = vpop.eup %2506 }
 0x8dd   :  { %v642_v16 = vadd.f32 1.0, %v2507_v15 }
 0x8df   :  { %v643_v18 = vmul.f32 0.5, %v642_v16 }
 0x8e1   :  { %v656_v25 = vsub.f32 1.0, %v643_v18 }
 0x93f   :  { %v647_v19 = vpop.permute.xlu1 %646 }
 0x940   :  { %v649_v20 = vmul.f32 %v647_v19, %v643_v18 }
 0x942   :  { %651 = vrot.lane.b32.xlu0 %v649_v20, %s2629_s29 }
 0x946   :  { %663 = vrot.lane.b32.xlu0 %v592_v1, %s2633_s1 }
 0x9b4   :  { %v652_v21 = vpop.permute.xlu0 %651 }
 0x9b5   :  { %v654_v22 = vadd.f32 %v652_v21, %v594_v11 }
 0x9b7   :  { %2508 = vtanh.f32 %v654_v22 }
 0x9b8   :  { %v664_v24 = vpop.permute.xlu0 %663 }
 0x9b9   :  { %v666_v27 = vmul.f32 %v664_v24, %v643_v18 }
 0x9c4   :  { %v2509_v23 = vpop.eup %2508 }
 0x9c5   :  { %658 = vrot.lane.b32.xlu1 %v2509_v23, %s2632_s2 }
 0xa37   :  { %v659_v26 = vpop.permute.xlu1 %658 }
 0xa38   :  { %v661_v28 = vmul.f32 %v659_v26, %v656_v25 }
 0xa3a   :  { %v667_v29 = vadd.f32 %v666_v27, %v661_v28  ;;  %v837_v27 = vld [vmem:[#allocation2 + $0x30] sm:$0xff] }
 0xa3c   :  { %670 = vrot.lane.b32.xlu1 %v667_v29, %s2632_s2 }
 0xaae   :  { %v671_v30 = vpop.permute.xlu1 %670 }
 0xaaf   :  { %v673_v31 = vsel %vm668_vm6, %v671_v30, %v592_v1 }
 0xab0   :  { %v676_v32 = vpack.c.bf16 %v673_v31, %v673_v31 }
 0xab2   :  { %2359 = vmatmul.mubr.msk.bf16.vlgmr.msra.gmra.mxu0 %vm107_vm0, %v676_v32 }
 0xab3   :  { %2371 = vmatpush3.bf16.msra.mxu0 %v2732_v4  ;;  %2374 = vmatprep.mubr.msk.bf16.mxu0 %vm2631_vm1, %v2630_v7 }
 0xab4   :  { %2372 = vmatprep.subr.bf16.mxu0 %v2630_v7 }
 0xab7   :  { %2373 = vmatpush3.bf16.msra.mxu0 %v2742_v8 }
 0xab8   :  { %2386 = vmatprep.subr.bf16.mxu0 %v2630_v7 }
 0xb72   :  { %v714_v33 = vpop.f32.mrf.mxu0 }
 0xb73   :  { %v725_v34 = vadd.f32 %v714_v33, %v2767_v17  ;;  %v720_v39 = vadd.f32 %v714_v33, %v675_v38 }
 0xb74   :  { %v2360_v35 = vpop.f32.mrf.mxu0 }
 0xb75   :  { %727 = vrot.lane.b32.xlu0 %v725_v34, %s2629_s29  ;;  %v721_v40 = vmul.f32 0.5, %v720_v39 }
 0xb76   :  { %v717_v36 = vpop.f32.mrf.mxu0 }
 0xb77   :  { %2510 = vtanh.f32 %v721_v40 }
 0xb78   :  { %v2361_v37 = vpop.f32.mrf.mxu0 }
 0xb84   :  { %v2511_v41 = vpop.eup %2510 }
 0xb85   :  { %v723_v42 = vadd.f32 1.0, %v2511_v41 }
 0xb87   :  { %v724_v43 = vmul.f32 0.5, %v723_v42 }
 0xb89   :  { %v737_v50 = vsub.f32 1.0, %v724_v43 }
 0xbe7   :  { %v728_v44 = vpop.permute.xlu0 %727 }
 0xbe8   :  { %v730_v45 = vmul.f32 %v728_v44, %v724_v43 }
 0xbea   :  { %732 = vrot.lane.b32.xlu1 %v730_v45, %s2629_s29 }
 0xbee   :  { %744 = vrot.lane.b32.xlu1 %v673_v31, %s2633_s1 }
 0xc5c   :  { %v733_v46 = vpop.permute.xlu1 %732 }
 0xc5d   :  { %v735_v47 = vadd.f32 %v733_v46, %v675_v38 }
 0xc5f   :  { %2512 = vtanh.f32 %v735_v47 }
 0xc60   :  { %v745_v49 = vpop.permute.xlu1 %744 }
 0xc61   :  { %v747_v52 = vmul.f32 %v745_v49, %v724_v43 }
 0xc6c   :  { %v2513_v48 = vpop.eup %2512 }
 0xc6d   :  { %739 = vrot.lane.b32.xlu0 %v2513_v48, %s2632_s2 }
 0xcdf   :  { %v740_v51 = vpop.permute.xlu0 %739 }
 0xce0   :  { %v742_v53 = vmul.f32 %v740_v51, %v737_v50 }
 0xce2   :  { %v748_v54 = vadd.f32 %v747_v52, %v742_v53  ;;  %v918_v52 = vld [vmem:[#allocation2 + $0x38] sm:$0xff] }
 0xce4   :  { %751 = vrot.lane.b32.xlu0 %v748_v54, %s2632_s2 }
 0xd56   :  { %v752_v55 = vpop.permute.xlu0 %751 }
 0xd57   :  { %v754_v56 = vsel %vm749_vm7, %v752_v55, %v673_v31 }
 0xd58   :  { %v757_v57 = vpack.c.bf16 %v754_v56, %v754_v56 }
 0xd5a   :  { %2367 = vmatmul.mubr.msk.bf16.vlgmr.msra.gmra.mxu1 %vm107_vm0, %v757_v57 }
 0xd5b   :  { %2379 = vmatpush3.bf16.msra.mxu1 %v2732_v4  ;;  %2382 = vmatprep.mubr.msk.bf16.mxu1 %vm2631_vm1, %v2630_v7 }
 0xd5c   :  { %2380 = vmatprep.subr.bf16.mxu1 %v2630_v7 }
 0xd5f   :  { %2381 = vmatpush3.bf16.msra.mxu1 %v2742_v8 }
 0xd60   :  { %2394 = vmatprep.subr.bf16.mxu1 %v2630_v7 }
 0xe1a   :  { %v795_v58 = vpop.f32.mrf.mxu1 }
 0xe1b   :  { %v806_v59 = vadd.f32 %v795_v58, %v2767_v17  ;;  %v801_v0 = vadd.f32 %v795_v58, %v756_v63 }
 0xe1c   :  { %v2368_v60 = vpop.f32.mrf.mxu1 }
 0xe1d   :  { %808 = vrot.lane.b32.xlu1 %v806_v59, %s2629_s29  ;;  %v802_v4 = vmul.f32 0.5, %v801_v0  ;;  %v2214_v0 = vld [vmem:[%s3369_s10] ss:$0 sm:$0xff] }
 0xe1e   :  { %v798_v61 = vpop.f32.mrf.mxu1 }
 0xe1f   :  { %2514 = vtanh.f32 %v802_v4  ;;  %v2929_v61 = vld [vmem:[%s3367_s8 + $0x8] sm:$0xff]  }
 0xe20   :  { %v2369_v62 = vpop.f32.mrf.mxu1 }
 0xe2c   :  { %v2515_v1 = vpop.eup %2514 }
 0xe2d   :  { %v804_v2 = vadd.f32 1.0, %v2515_v1 }
 0xe2f   :  { %v805_v3 = vmul.f32 0.5, %v804_v2 }
 0xe31   :  { %v818_v13 = vsub.f32 1.0, %v805_v3 }
 0xe8f   :  { %v809_v5 = vpop.permute.xlu1 %808 }
 0xe90   :  { %v811_v6 = vmul.f32 %v809_v5, %v805_v3 }
 0xe92   :  { %813 = vrot.lane.b32.xlu0 %v811_v6, %s2629_s29 }
 0xe96   :  { %825 = vrot.lane.b32.xlu0 %v754_v56, %s2633_s1 }
 0xf04   :  { %v814_v8 = vpop.permute.xlu0 %813 }
 0xf05   :  { %v816_v9 = vadd.f32 %v814_v8, %v756_v63  ;;  %v2939_v63 = vld [vmem:[%s3367_s8] sm:$0xff]  }
 0xf07   :  { %2516 = vtanh.f32 %v816_v9 }
 0xf08   :  { %v826_v11 = vpop.permute.xlu0 %825 }
 0xf09   :  { %v828_v15 = vmul.f32 %v826_v11, %v805_v3 }
 0xf14   :  { %v2517_v10 = vpop.eup %2516 }
 0xf15   :  { %820 = vrot.lane.b32.xlu1 %v2517_v10, %s2632_s2 }
 0xf87   :  { %v821_v14 = vpop.permute.xlu1 %820 }
 0xf88   :  { %v823_v16 = vmul.f32 %v821_v14, %v818_v13 }
 0xf8a   :  { %v829_v18 = vadd.f32 %v828_v15, %v823_v16 }
 0xf8c   :  { %832 = vrot.lane.b32.xlu1 %v829_v18, %s2632_s2  ;;  %v1008_v18 = vld [vmem:[#allocation3] sm:$0xff] }
 0xffe   :  { %v833_v19 = vpop.permute.xlu1 %832 }
 0xfff   :  { %v835_v20 = vsel %vm830_vm8, %v833_v19, %v754_v56 }
0x1000   :  { %v838_v21 = vpack.c.bf16 %v835_v20, %v835_v20 }
0x1002   :  { %2375 = vmatmul.mubr.msk.bf16.vlgmr.msra.gmra.mxu0 %vm107_vm0, %v838_v21 }
0x1003   :  { %2390 = vmatprep.mubr.msk.bf16.mxu0 %vm2631_vm1, %v2630_v7  ;;  %2387 = vmatpush3.bf16.msra.mxu0 %v2929_v61 }
0x1004   :  { %2388 = vmatprep.subr.bf16.mxu0 %v2630_v7 }
0x1007   :  { %2389 = vmatpush3.bf16.msra.mxu0 %v2939_v63 }
0x1008   :  { %2402 = vmatprep.subr.bf16.mxu0 %v2630_v7 }
0x10c2   :  { %v876_v22 = vpop.f32.mrf.mxu0 }
0x10c3   :  { %v887_v23 = vadd.f32 %v876_v22, %v2767_v17  ;;  %v882_v28 = vadd.f32 %v876_v22, %v837_v27 }
0x10c4   :  { %v2376_v24 = vpop.f32.mrf.mxu0 }
0x10c5   :  { %889 = vrot.lane.b32.xlu0 %v887_v23, %s2629_s29  ;;  %v883_v29 = vmul.f32 0.5, %v882_v28 }
0x10c6   :  { %v879_v25 = vpop.f32.mrf.mxu0 }
0x10c7   :  { %2518 = vtanh.f32 %v883_v29 }
0x10c8   :  { %v2377_v26 = vpop.f32.mrf.mxu0 }
0x10d4   :  { %v2519_v30 = vpop.eup %2518 }
0x10d5   :  { %v885_v31 = vadd.f32 1.0, %v2519_v30 }
0x10d7   :  { %v886_v32 = vmul.f32 0.5, %v885_v31 }
0x10d9   :  { %v899_v39 = vsub.f32 1.0, %v886_v32 }
0x1137   :  { %v890_v33 = vpop.permute.xlu0 %889 }
0x1138   :  { %v892_v34 = vmul.f32 %v890_v33, %v886_v32 }
0x113a   :  { %894 = vrot.lane.b32.xlu1 %v892_v34, %s2629_s29 }
0x113e   :  { %906 = vrot.lane.b32.xlu1 %v835_v20, %s2633_s1 }
0x11ac   :  { %v895_v35 = vpop.permute.xlu1 %894 }
0x11ad   :  { %v897_v36 = vadd.f32 %v895_v35, %v837_v27 }
0x11af   :  { %2520 = vtanh.f32 %v897_v36 }
0x11b0   :  { %v907_v38 = vpop.permute.xlu1 %906 }
0x11b1   :  { %v909_v41 = vmul.f32 %v907_v38, %v886_v32 }
0x11bc   :  { %v2521_v37 = vpop.eup %2520 }
0x11bd   :  { %901 = vrot.lane.b32.xlu0 %v2521_v37, %s2632_s2 }
0x122f   :  { %v902_v40 = vpop.permute.xlu0 %901 }
0x1230   :  { %v904_v42 = vmul.f32 %v902_v40, %v899_v39 }
0x1232   :  { %v910_v43 = vadd.f32 %v909_v41, %v904_v42  ;;  %v1103_v42 = vld [vmem:[#allocation3 + $0x8] sm:$0xff] }
0x1234   :  { %913 = vrot.lane.b32.xlu0 %v910_v43, %s2632_s2 }
0x12a6   :  { %v914_v44 = vpop.permute.xlu0 %913 }
0x12a7   :  { %v916_v45 = vsel %vm911_vm9, %v914_v44, %v835_v20 }
0x12a8   :  { %v919_v46 = vpack.c.bf16 %v916_v45, %v916_v45 }
0x12aa   :  { %2383 = vmatmul.mubr.msk.bf16.vlgmr.msra.gmra.mxu1 %vm107_vm0, %v919_v46 }
0x12ab   :  { %2398 = vmatprep.mubr.msk.bf16.mxu1 %vm2631_vm1, %v2630_v7  ;;  %2395 = vmatpush3.bf16.msra.mxu1 %v2929_v61 }
0x12ac   :  { %2396 = vmatprep.subr.bf16.mxu1 %v2630_v7 }
0x12af   :  { %2397 = vmatpush3.bf16.msra.mxu1 %v2939_v63 }
0x12b0   :  { %2410 = vmatprep.subr.bf16.mxu1 %v2630_v7 }
0x136a   :  { %v957_v47 = vpop.f32.mrf.mxu1 }
0x136b   :  { %v968_v48 = vadd.f32 %v957_v47, %v2767_v17  ;;  %v963_v53 = vadd.f32 %v957_v47, %v918_v52 }
0x136c   :  { %v2384_v49 = vpop.f32.mrf.mxu1 }
0x136d   :  { %970 = vrot.lane.b32.xlu1 %v968_v48, %s2629_s29  ;;  %v964_v54 = vmul.f32 0.5, %v963_v53 }
0x136e   :  { %v960_v50 = vpop.f32.mrf.mxu1 }
0x136f   :  { %2522 = vtanh.f32 %v964_v54 }
0x1370   :  { %v2385_v51 = vpop.f32.mrf.mxu1 }
0x137c   :  { %v2523_v55 = vpop.eup %2522 }
0x137d   :  { %v966_v56 = vadd.f32 1.0, %v2523_v55 }
0x137f   :  { %v967_v57 = vmul.f32 0.5, %v966_v56 }
0x1381   :  { %v980_v1 = vsub.f32 1.0, %v967_v57 }
0x13df   :  { %v971_v58 = vpop.permute.xlu1 %970 }
0x13e0   :  { %v973_v59 = vmul.f32 %v971_v58, %v967_v57 }
0x13e2   :  { %975 = vrot.lane.b32.xlu0 %v973_v59, %s2629_s29 }
0x13e6   :  { %987 = vrot.lane.b32.xlu0 %v916_v45, %s2633_s1 }
0x13ea   :  { %1070 = vrot.lane.b32.xlu0 %v2214_v0, %s2629_s29 }
0x1454   :  { %v976_v60 = vpop.permute.xlu0 %975 }
0x1455   :  { %v978_v17 = vadd.f32 %v976_v60, %v918_v52 }
0x1457   :  { %2524 = vtanh.f32 %v978_v17 }
0x1458   :  { %v988_v4 = vpop.permute.xlu0 %987 }
0x1459   :  { %v990_v3 = vmul.f32 %v988_v4, %v967_v57 }
0x145c   :  { %v2958_v11 = vpop.permute.xlu0 %1070 }
0x1464   :  { %v2525_v62 = vpop.eup %2524 }
0x1465   :  { %982 = vrot.lane.b32.xlu1 %v2525_v62, %s2632_s2 }
0x14d7   :  { %v983_v2 = vpop.permute.xlu1 %982 }
0x14d8   :  { %v985_v5 = vmul.f32 %v983_v2, %v980_v1  ;;  %v1183_v1 = vld [vmem:[#allocation3 + $0x10] sm:$0xff] }
0x14da   :  { %v991_v6 = vadd.f32 %v990_v3, %v985_v5 }
0x14dc   :  { %994 = vrot.lane.b32.xlu1 %v991_v6, %s2632_s2 }
0x154e   :  { %v995_v8 = vpop.permute.xlu1 %994 }
0x154f   :  { %v997_v9 = vsel %vm992_vm10, %v995_v8, %v916_v45 }
0x1550   :  { %v1009_v10 = vpack.c.bf16 %v997_v9, %v997_v9 }
0x1552   :  { %2391 = vmatmul.mubr.msk.bf16.vlgmr.msra.gmra.mxu0 %vm107_vm0, %v1009_v10 }
0x1553   :  { %2403 = vmatpush3.bf16.msra.mxu0 %v2929_v61  ;;  %2406 = vmatprep.mubr.msk.bf16.mxu0 %vm2631_vm1, %v2630_v7 }
0x1554   :  { %2404 = vmatprep.subr.bf16.mxu0 %v2630_v7 }
0x1557   :  { %2405 = vmatpush3.bf16.msra.mxu0 %v2939_v63 }
0x1558   :  { %2418 = vmatprep.subr.bf16.mxu0 %v2630_v7 }
0x1612   :  { %v1059_v13 = vpop.f32.mrf.mxu0 }
0x1613   :  { %v1073_v12 = vadd.f32 %v2958_v11, %v1059_v13  ;;  %v1065_v19 = vadd.f32 %v1059_v13, %v1008_v18 }
0x1614   :  { %v2392_v14 = vpop.f32.mrf.mxu0 }
0x1615   :  { %1075 = vrot.lane.b32.xlu1 %v1073_v12, %s2629_s29  ;;  %v1066_v20 = vmul.f32 0.5, %v1065_v19 }
0x1616   :  { %v1062_v15 = vpop.f32.mrf.mxu0 }
0x1617   :  { %2526 = vtanh.f32 %v1066_v20 }
0x1618   :  { %v2393_v16 = vpop.f32.mrf.mxu0 }
0x1624   :  { %v2527_v21 = vpop.eup %2526 }
0x1625   :  { %v1068_v22 = vadd.f32 1.0, %v2527_v21 }
0x1627   :  { %v1069_v23 = vmul.f32 0.5, %v1068_v22 }
0x1629   :  { %v1085_v30 = vsub.f32 1.0, %v1069_v23 }
0x1687   :  { %v1076_v24 = vpop.permute.xlu1 %1075 }
0x1688   :  { %v1078_v25 = vmul.f32 %v1076_v24, %v1069_v23 }
0x168a   :  { %1080 = vrot.lane.b32.xlu0 %v1078_v25, %s2629_s29 }
0x168e   :  { %1092 = vrot.lane.b32.xlu0 %v997_v9, %s2633_s1 }
0x16fc   :  { %v1081_v26 = vpop.permute.xlu0 %1080 }
0x16fd   :  { %v1083_v27 = vadd.f32 %v1081_v26, %v1008_v18 }
0x16ff   :  { %2528 = vtanh.f32 %v1083_v27 }
0x1700   :  { %v1093_v29 = vpop.permute.xlu0 %1092 }
0x1701   :  { %v1095_v32 = vmul.f32 %v1093_v29, %v1069_v23 }
0x170c   :  { %v2529_v28 = vpop.eup %2528 }
0x170d   :  { %1087 = vrot.lane.b32.xlu1 %v2529_v28, %s2632_s2  ;;  %v1263_v28 = vld [vmem:[#allocation3 + $0x18] sm:$0xff] }
0x177f   :  { %v1088_v31 = vpop.permute.xlu1 %1087 }
0x1780   :  { %v1090_v33 = vmul.f32 %v1088_v31, %v1085_v30 }
0x1782   :  { %v2965_v34 = vadd.f32 %v1095_v32, %v1090_v33 }
0x1784   :  { %v1104_v35 = vpack.c.bf16 %v2965_v34, %v2965_v34 }
0x1786   :  { %1106 = vrot.lane.b32.xlu1 %v1104_v35, %s2632_s2 }
0x17f8   :  { %v1107_v36 = vpop.permute.xlu1 %1106 }
0x17f9   :  { %2399 = vmatmul.mubr.msk.bf16.vlgmr.msra.gmra.mxu1 %vm107_vm0, %v1107_v36 }
0x17fa   :  { %2411 = vmatpush3.bf16.msra.mxu1 %v2929_v61  ;;  %2414 = vmatprep.mubr.msk.bf16.mxu1 %vm2631_vm1, %v2630_v7 }
0x17fb   :  { %2412 = vmatprep.subr.bf16.mxu1 %v2630_v7 }
0x17fe   :  { %2413 = vmatpush3.bf16.msra.mxu1 %v2939_v63 }
0x17ff   :  { %2426 = vmatprep.subr.bf16.mxu1 %v2630_v7 }
0x18b9   :  { %v1145_v37 = vpop.f32.mrf.mxu1 }
0x18ba   :  { %v1156_v38 = vadd.f32 %v1145_v37, %v2958_v11  ;;  %v1151_v43 = vadd.f32 %v1145_v37, %v1103_v42 }
0x18bb   :  { %v2400_v39 = vpop.f32.mrf.mxu1 }
0x18bc   :  { %1158 = vrot.lane.b32.xlu0 %v1156_v38, %s2629_s29  ;;  %v1152_v44 = vmul.f32 0.5, %v1151_v43 }
0x18bd   :  { %v1148_v40 = vpop.f32.mrf.mxu1 }
0x18be   :  { %2530 = vtanh.f32 %v1152_v44 }
0x18bf   :  { %v2401_v41 = vpop.f32.mrf.mxu1 }
0x18cb   :  { %v2531_v45 = vpop.eup %2530 }
0x18cc   :  { %v1154_v46 = vadd.f32 1.0, %v2531_v45 }
0x18ce   :  { %v1155_v47 = vmul.f32 0.5, %v1154_v46 }
0x18d0   :  { %v1168_v53 = vsub.f32 1.0, %v1155_v47  ;;  %v1174_v55 = vmul.f32 %v1155_v47, %v2965_v34 }
0x192e   :  { %v1159_v48 = vpop.permute.xlu0 %1158 }
0x192f   :  { %v1161_v49 = vmul.f32 %v1159_v48, %v1155_v47 }
0x1931   :  { %1163 = vrot.lane.b32.xlu1 %v1161_v49, %s2629_s29 }
0x19a3   :  { %v1164_v50 = vpop.permute.xlu1 %1163 }
0x19a4   :  { %v1166_v51 = vadd.f32 %v1164_v50, %v1103_v42 }
0x19a6   :  { %2532 = vtanh.f32 %v1166_v51 }
0x19b3   :  { %v2533_v52 = vpop.eup %2532 }
0x19b4   :  { %1170 = vrot.lane.b32.xlu0 %v2533_v52, %s2632_s2  ;;  %v1343_v52 = vld [vmem:[#allocation3 + $0x20] sm:$0xff] }
0x1a26   :  { %v1171_v54 = vpop.permute.xlu0 %1170 }
0x1a27   :  { %v1173_v56 = vmul.f32 %v1171_v54, %v1168_v53 }
0x1a29   :  { %v2982_v57 = vadd.f32 %v1174_v55, %v1173_v56 }
0x1a2b   :  { %v1184_v58 = vpack.c.bf16 %v2982_v57, %v2982_v57 }
0x1a2d   :  { %1186 = vrot.lane.b32.xlu1 %v1184_v58, %s2632_s2 }
0x1a9f   :  { %v1187_v59 = vpop.permute.xlu1 %1186 }
0x1aa0   :  { %2407 = vmatmul.mubr.msk.bf16.vlgmr.msra.gmra.mxu0 %vm107_vm0, %v1187_v59 }
0x1aa1   :  { %2419 = vmatpush3.bf16.msra.mxu0 %v2929_v61  ;;  %2422 = vmatprep.mubr.msk.bf16.mxu0 %vm2631_vm1, %v2630_v7 }
0x1aa2   :  { %2420 = vmatprep.subr.bf16.mxu0 %v2630_v7 }
0x1aa5   :  { %2421 = vmatpush3.bf16.msra.mxu0 %v2939_v63 }
0x1aa6   :  { %2434 = vmatprep.subr.bf16.mxu0 %v2630_v7 }
0x1b60   :  { %v1225_v60 = vpop.f32.mrf.mxu0 }
0x1b61   :  { %v1236_v17 = vadd.f32 %v1225_v60, %v2958_v11  ;;  %v1231_v2 = vadd.f32 %v1225_v60, %v1183_v1 }
0x1b62   :  { %v2408_v62 = vpop.f32.mrf.mxu0 }
0x1b63   :  { %1238 = vrot.lane.b32.xlu0 %v1236_v17, %s2629_s29  ;;  %v1232_v3 = vmul.f32 0.5, %v1231_v2 }
0x1b64   :  { %v1228_v0 = vpop.f32.mrf.mxu0 }
0x1b65   :  { %2534 = vtanh.f32 %v1232_v3 }
0x1b66   :  { %v2409_v4 = vpop.f32.mrf.mxu0 }
0x1b72   :  { %v2535_v5 = vpop.eup %2534 }
0x1b73   :  { %v1234_v6 = vadd.f32 1.0, %v2535_v5 }
0x1b75   :  { %v1235_v8 = vmul.f32 0.5, %v1234_v6 }
0x1b77   :  { %v1248_v15 = vsub.f32 1.0, %v1235_v8  ;;  %v1254_v18 = vmul.f32 %v1235_v8, %v2982_v57 }
0x1bd5   :  { %v1239_v9 = vpop.permute.xlu0 %1238 }
0x1bd6   :  { %v1241_v10 = vmul.f32 %v1239_v9, %v1235_v8 }
0x1bd8   :  { %1243 = vrot.lane.b32.xlu1 %v1241_v10, %s2629_s29 }
0x1c4a   :  { %v1244_v13 = vpop.permute.xlu1 %1243 }
0x1c4b   :  { %v1246_v12 = vadd.f32 %v1244_v13, %v1183_v1 }
0x1c4d   :  { %2536 = vtanh.f32 %v1246_v12 }
0x1c5a   :  { %v2537_v14 = vpop.eup %2536 }
0x1c5b   :  { %1250 = vrot.lane.b32.xlu0 %v2537_v14, %s2632_s2 }
0x1ccd   :  { %v1251_v16 = vpop.permute.xlu0 %1250 }
0x1cce   :  { %v1253_v19 = vmul.f32 %v1251_v16, %v1248_v15  ;;  %v1423_v15 = vld [vmem:[#allocation3 + $0x28] sm:$0xff] }
0x1cd0   :  { %v2999_v20 = vadd.f32 %v1254_v18, %v1253_v19 }
0x1cd2   :  { %v1264_v21 = vpack.c.bf16 %v2999_v20, %v2999_v20 }
0x1cd4   :  { %1266 = vrot.lane.b32.xlu1 %v1264_v21, %s2632_s2 }
0x1d46   :  { %v1267_v22 = vpop.permute.xlu1 %1266 }
0x1d47   :  { %2415 = vmatmul.mubr.msk.bf16.vlgmr.msra.gmra.mxu1 %vm107_vm0, %v1267_v22 }
0x1d48   :  { %2427 = vmatpush3.bf16.msra.mxu1 %v2929_v61  ;;  %2430 = vmatprep.mubr.msk.bf16.mxu1 %vm2631_vm1, %v2630_v7 }
0x1d49   :  { %2428 = vmatprep.subr.bf16.mxu1 %v2630_v7 }
0x1d4c   :  { %2429 = vmatpush3.bf16.msra.mxu1 %v2939_v63 }
0x1d4d   :  { %2442 = vmatprep.subr.bf16.mxu1 %v2630_v7 }
0x1e07   :  { %v1305_v23 = vpop.f32.mrf.mxu1 }
0x1e08   :  { %v1316_v24 = vadd.f32 %v1305_v23, %v2958_v11  ;;  %v1311_v29 = vadd.f32 %v1305_v23, %v1263_v28 }
0x1e09   :  { %v2416_v25 = vpop.f32.mrf.mxu1 }
0x1e0a   :  { %1318 = vrot.lane.b32.xlu0 %v1316_v24, %s2629_s29  ;;  %v1312_v30 = vmul.f32 0.5, %v1311_v29 }
0x1e0b   :  { %v1308_v26 = vpop.f32.mrf.mxu1 }
0x1e0c   :  { %2538 = vtanh.f32 %v1312_v30 }
0x1e0d   :  { %v2417_v27 = vpop.f32.mrf.mxu1 }
0x1e19   :  { %v2539_v31 = vpop.eup %2538 }
0x1e1a   :  { %v1314_v32 = vadd.f32 1.0, %v2539_v31 }
0x1e1c   :  { %v1315_v33 = vmul.f32 0.5, %v1314_v32 }
0x1e1e   :  { %v1328_v40 = vsub.f32 1.0, %v1315_v33  ;;  %v1334_v42 = vmul.f32 %v1315_v33, %v2999_v20 }
0x1e7c   :  { %v1319_v35 = vpop.permute.xlu0 %1318 }
0x1e7d   :  { %v1321_v36 = vmul.f32 %v1319_v35, %v1315_v33 }
0x1e7f   :  { %1323 = vrot.lane.b32.xlu1 %v1321_v36, %s2629_s29 }
0x1ef1   :  { %v1324_v37 = vpop.permute.xlu1 %1323 }
0x1ef2   :  { %v1326_v38 = vadd.f32 %v1324_v37, %v1263_v28 }
0x1ef4   :  { %2540 = vtanh.f32 %v1326_v38 }
0x1f01   :  { %v2541_v39 = vpop.eup %2540 }
0x1f02   :  { %1330 = vrot.lane.b32.xlu0 %v2541_v39, %s2632_s2  ;;  %v1503_v39 = vld [vmem:[#allocation3 + $0x30] sm:$0xff] }
0x1f74   :  { %v1331_v41 = vpop.permute.xlu0 %1330 }
0x1f75   :  { %v1333_v43 = vmul.f32 %v1331_v41, %v1328_v40 }
0x1f77   :  { %v3016_v44 = vadd.f32 %v1334_v42, %v1333_v43 }
0x1f79   :  { %v1344_v45 = vpack.c.bf16 %v3016_v44, %v3016_v44 }
0x1f7b   :  { %1346 = vrot.lane.b32.xlu1 %v1344_v45, %s2632_s2 }
0x1fed   :  { %v1347_v46 = vpop.permute.xlu1 %1346 }
0x1fee   :  { %2423 = vmatmul.mubr.msk.bf16.vlgmr.msra.gmra.mxu0 %vm107_vm0, %v1347_v46 }
0x1fef   :  { %2435 = vmatpush3.bf16.msra.mxu0 %v2929_v61  ;;  %2438 = vmatprep.mubr.msk.bf16.mxu0 %vm2631_vm1, %v2630_v7 }
0x1ff0   :  { %2436 = vmatprep.subr.bf16.mxu0 %v2630_v7 }
0x1ff3   :  { %2437 = vmatpush3.bf16.msra.mxu0 %v2939_v63 }
0x20ae   :  { %v1385_v47 = vpop.f32.mrf.mxu0 }
0x20af   :  { %v1396_v48 = vadd.f32 %v1385_v47, %v2958_v11  ;;  %v1391_v53 = vadd.f32 %v1385_v47, %v1343_v52 }
0x20b0   :  { %v2424_v49 = vpop.f32.mrf.mxu0 }
0x20b1   :  { %1398 = vrot.lane.b32.xlu0 %v1396_v48, %s2629_s29  ;;  %v1392_v54 = vmul.f32 0.5, %v1391_v53 }
0x20b2   :  { %v1388_v50 = vpop.f32.mrf.mxu0 }
0x20b3   :  { %2542 = vtanh.f32 %v1392_v54 }
0x20b4   :  { %v2425_v51 = vpop.f32.mrf.mxu0 }
0x20c0   :  { %v2543_v55 = vpop.eup %2542 }
0x20c1   :  { %v1394_v56 = vadd.f32 1.0, %v2543_v55 }
0x20c3   :  { %v1395_v58 = vmul.f32 0.5, %v1394_v56 }
0x20c5   :  { %v1408_v4 = vsub.f32 1.0, %v1395_v58  ;;  %v1414_v2 = vmul.f32 %v1395_v58, %v3016_v44 }
0x2123   :  { %v1399_v59 = vpop.permute.xlu0 %1398 }
0x2124   :  { %v1401_v60 = vmul.f32 %v1399_v59, %v1395_v58 }
0x2126   :  { %1403 = vrot.lane.b32.xlu1 %v1401_v60, %s2629_s29 }
0x2198   :  { %v1404_v17 = vpop.permute.xlu1 %1403 }
0x2199   :  { %v1406_v62 = vadd.f32 %v1404_v17, %v1343_v52 }
0x219b   :  { %2544 = vtanh.f32 %v1406_v62 }
0x21a8   :  { %v2545_v0 = vpop.eup %2544 }
0x21a9   :  { %1410 = vrot.lane.b32.xlu0 %v2545_v0, %s2632_s2 }
0x221b   :  { %v1411_v1 = vpop.permute.xlu0 %1410 }
0x221c   :  { %v1413_v3 = vmul.f32 %v1411_v1, %v1408_v4  ;;  %v1583_v4 = vld [vmem:[#allocation3 + $0x38] sm:$0xff] }
0x221e   :  { %v3032_v5 = vadd.f32 %v1414_v2, %v1413_v3 }
0x2220   :  { %v1424_v6 = vpack.c.bf16 %v3032_v5, %v3032_v5 }
0x2222   :  { %1426 = vrot.lane.b32.xlu1 %v1424_v6, %s2632_s2 }
0x2294   :  { %v1427_v8 = vpop.permute.xlu1 %1426 }
0x2295   :  { %2431 = vmatmul.mubr.msk.bf16.vlgmr.msra.gmra.mxu1 %vm107_vm0, %v1427_v8 }
0x2296   :  { %2443 = vmatpush3.bf16.msra.mxu1 %v2929_v61  ;;  %2446 = vmatprep.mubr.msk.bf16.mxu1 %vm2631_vm1, %v2630_v7 }
0x2297   :  { %2444 = vmatprep.subr.bf16.mxu1 %v2630_v7 }
0x229a   :  { %2445 = vmatpush3.bf16.msra.mxu1 %v2939_v63 }
0x2355   :  { %v1465_v9 = vpop.f32.mrf.mxu1 }
0x2356   :  { %v1476_v10 = vadd.f32 %v1465_v9, %v2958_v11  ;;  %v1471_v16 = vadd.f32 %v1465_v9, %v1423_v15 }
0x2357   :  { %v2432_v13 = vpop.f32.mrf.mxu1 }
0x2358   :  { %1478 = vrot.lane.b32.xlu0 %v1476_v10, %s2629_s29  ;;  %v1472_v18 = vmul.f32 0.5, %v1471_v16  ;;  %v2493_v16 = vld [vmem:[%s3372_s13] sm:$0xff]  }
0x2359   :  { %v1468_v12 = vpop.f32.mrf.mxu1 }
0x235a   :  { %2546 = vtanh.f32 %v1472_v18 }
0x235b   :  { %v2433_v14 = vpop.f32.mrf.mxu1 }
0x2367   :  { %v2547_v61 = vpop.eup %2546 }
0x2368   :  { %v1474_v19 = vadd.f32 1.0, %v2547_v61 }
0x236a   :  { %v1475_v21 = vmul.f32 0.5, %v1474_v19 }
0x236c   :  { %v1488_v26 = vsub.f32 1.0, %v1475_v21  ;;  %v1494_v28 = vmul.f32 %v1475_v21, %v3032_v5 }
0x23ca   :  { %v1479_v22 = vpop.permute.xlu0 %1478 }
0x23cb   :  { %v1481_v23 = vmul.f32 %v1479_v22, %v1475_v21 }
0x23cd   :  { %1483 = vrot.lane.b32.xlu1 %v1481_v23, %s2629_s29 }
0x243f   :  { %v1484_v63 = vpop.permute.xlu1 %1483 }
0x2440   :  { %v1486_v24 = vadd.f32 %v1484_v63, %v1423_v15 }
0x2442   :  { %2548 = vtanh.f32 %v1486_v24 }
0x244f   :  { %v2549_v25 = vpop.eup %2548 }
0x2450   :  { %1490 = vrot.lane.b32.xlu0 %v2549_v25, %s2632_s2 }
0x24c2   :  { %v1491_v27 = vpop.permute.xlu0 %1490 }
0x24c3   :  { %v1493_v29 = vmul.f32 %v1491_v27, %v1488_v26 }
0x24c5   :  { %v3048_v30 = vadd.f32 %v1494_v28, %v1493_v29 }
0x24c7   :  { %v1504_v31 = vpack.c.bf16 %v3048_v30, %v3048_v30 }
0x24c9   :  { %1506 = vrot.lane.b32.xlu1 %v1504_v31, %s2632_s2 }
0x253b   :  { %v1507_v32 = vpop.permute.xlu1 %1506 }
0x253c   :  { %2439 = vmatmul.mubr.msk.bf16.vlgmr.msra.gmra.mxu0 %vm107_vm0, %v1507_v32 }
0x25fc   :  { %v1545_v33 = vpop.f32.mrf.mxu0 }
0x25fd   :  { %v1556_v35 = vadd.f32 %v1545_v33, %v2958_v11  ;;  %v1551_v40 = vadd.f32 %v1545_v33, %v1503_v39 }
0x25fe   :  { %v2440_v36 = vpop.f32.mrf.mxu0 }
0x25ff   :  { %1558 = vrot.lane.b32.xlu0 %v1556_v35, %s2629_s29  ;;  %v1552_v41 = vmul.f32 0.5, %v1551_v40 }
0x2600   :  { %v1548_v37 = vpop.f32.mrf.mxu0 }
0x2601   :  { %2550 = vtanh.f32 %v1552_v41  ;;  %v2634_v37 = vmov -1e+30  }
0x2602   :  { %v2441_v38 = vpop.f32.mrf.mxu0  ;;  %1663 = vst.msk [vmem:[#allocation5] sm:$0xff] %vm1662_vm11, %v2634_v37  ;;  %1664 = vst.msk [vmem:[#allocation5 + $0x8] sm:$0xff] %vm1662_vm11, %v2634_v37 }
0x2603   :  { %1665 = vst.msk [vmem:[#allocation5 + $0x10] sm:$0xff] %vm1662_vm11, %v2634_v37  ;;  %1666 = vst.msk [vmem:[#allocation5 + $0x18] sm:$0xff] %vm1662_vm11, %v2634_v37 }
0x2604   :  { %1667 = vst.msk [vmem:[#allocation5 + $0x20] sm:$0xff] %vm1662_vm11, %v2634_v37  ;;  %1668 = vst.msk [vmem:[#allocation5 + $0x28] sm:$0xff] %vm1662_vm11, %v2634_v37 }
0x2605   :  { %1669 = vst.msk [vmem:[#allocation5 + $0x30] sm:$0xff] %vm1662_vm11, %v2634_v37  ;;  %1670 = vst.msk [vmem:[#allocation5 + $0x38] sm:$0xff] %vm1662_vm11, %v2634_v37 }
0x260e   :  { %v2551_v42 = vpop.eup %2550 }
0x260f   :  { %v1554_v43 = vadd.f32 1.0, %v2551_v42 }
0x2611   :  { %v1555_v45 = vmul.f32 0.5, %v1554_v43 }
0x2613   :  { %v1568_v51 = vsub.f32 1.0, %v1555_v45  ;;  %v1574_v53 = vmul.f32 %v1555_v45, %v3048_v30 }
0x2671   :  { %v1559_v46 = vpop.permute.xlu0 %1558 }
0x2672   :  { %v1561_v47 = vmul.f32 %v1559_v46, %v1555_v45 }
0x2674   :  { %1563 = vrot.lane.b32.xlu1 %v1561_v47, %s2629_s29 }
0x26e6   :  { %v1564_v48 = vpop.permute.xlu1 %1563 }
0x26e7   :  { %v1566_v49 = vadd.f32 %v1564_v48, %v1503_v39  ;;  %v2225_v39 = vld [vmem:[%s3373_s14] ss:$0 sm:$0xff] }
0x26e9   :  { %2552 = vtanh.f32 %v1566_v49 }
0x26f6   :  { %v2553_v50 = vpop.eup %2552 }
0x26f7   :  { %1570 = vrot.lane.b32.xlu0 %v2553_v50, %s2632_s2 }
0x2769   :  { %v1571_v52 = vpop.permute.xlu0 %1570 }
0x276a   :  { %v1573_v54 = vmul.f32 %v1571_v52, %v1568_v51 }
0x276c   :  { %v1575_v55 = vadd.f32 %v1574_v53, %v1573_v54 }
0x276e   :  { %v1584_v56 = vpack.c.bf16 %v1575_v55, %v1575_v55 }
0x2770   :  { %1586 = vrot.lane.b32.xlu1 %v1584_v56, %s2632_s2 }
0x27e2   :  { %v1587_v58 = vpop.permute.xlu1 %1586 }
0x27e3   :  { %2447 = vmatmul.mubr.msk.bf16.vlgmr.msra.gmra.mxu1 %vm107_vm0, %v1587_v58 }
0x28a3   :  { %v1625_v59 = vpop.f32.mrf.mxu1 }
0x28a4   :  { %v1636_v60 = vadd.f32 %v1625_v59, %v2958_v11  ;;  %v1631_v1 = vadd.f32 %v1625_v59, %v1583_v4  ;;  %v3169_v59 = vld [vmem:[#allocation5 + $0x8] sm:$0xff] }
0x28a5   :  { %v2448_v17 = vpop.f32.mrf.mxu1 }
0x28a6   :  { %1638 = vrot.lane.b32.xlu0 %v1636_v60, %s2629_s29  ;;  %v1632_v2 = vmul.f32 0.5, %v1631_v1  ;;  %v3171_v60 = vld [vmem:[#allocation5 + $0x18] sm:$0xff] }
0x28a7   :  { %v1628_v62 = vpop.f32.mrf.mxu1 }
0x28a8   :  { %2554 = vtanh.f32 %v1632_v2 }
0x28a9   :  { %v2449_v0 = vpop.f32.mrf.mxu1 }
0x28b5   :  { %v2555_v3 = vpop.eup %2554 }
0x28b6   :  { %v1634_v6 = vadd.f32 1.0, %v2555_v3  ;;  %v3187_v3 = vld [vmem:[#allocation5 + $0x10] sm:$0xff] }
0x28b8   :  { %v1635_v8 = vmul.f32 0.5, %v1634_v6 }
0x28ba   :  { %v1648_v18 = vsub.f32 1.0, %v1635_v8  ;;  %v1654_v19 = vmul.f32 %v1635_v8, %v1575_v55 }
0x2918   :  { %v1639_v9 = vpop.permute.xlu0 %1638 }
0x2919   :  { %v1641_v10 = vmul.f32 %v1639_v9, %v1635_v8 }
0x291b   :  { %1643 = vrot.lane.b32.xlu1 %v1641_v10, %s2629_s29  ;;  %v1993_v10 = vld [vmem:[%s3370_s11 + $0x18] sm:$0xff] }
0x291f   :  { %1098 = vrot.lane.b32.xlu1 %v2965_v34, %s2632_s2  ;;  %v2492_v34 = vld [vmem:[%s3372_s13 + $0x8] sm:$0xff]  }
0x2920   :  { %2450 = vmatprep.subr.bf16.mxu0 %v2492_v34 }
0x2921   :  { %2451 = vmatpush3.bf16.msra.mxu0 %v2492_v34 }
0x2922   :  { %2452 = vmatprep.subr.bf16.mxu0 %v2493_v16 }
0x2923   :  { %1257 = vrot.lane.b32.xlu1 %v2999_v20, %s2632_s2 }
0x2925   :  { %2453 = vmatpush3.bf16.msra.mxu0 %v2493_v16  ;;  %v3223_v16 = vld [vmem:[#allocation5 + $0x28] sm:$0xff] }
0x2927   :  { %1417 = vrot.lane.b32.xlu1 %v3032_v5, %s2632_s2 }
0x292b   :  { %1577 = vrot.lane.b32.xlu1 %v1575_v55, %s2632_s2  ;;  %v3164_v55 = vld [vmem:[#allocation5] sm:$0xff] }
0x298d   :  { %v1644_v11 = vpop.permute.xlu1 %1643 }
0x298e   :  { %v1646_v13 = vadd.f32 %v1644_v11, %v1583_v4  ;;  %v1991_v4 = vld [vmem:[%s3370_s11 + $0x8] sm:$0xff] }
0x2990   :  { %2556 = vtanh.f32 %v1646_v13 }
0x2991   :  { %v1099_v12 = vpop.permute.xlu1 %1098 }
0x2992   :  { %1101 = vst.msk [vmem:[#allocation4] sm:$0xff] %vm107_vm0, %v1099_v12  ;;  %v1995_v12 = vld [vmem:[%s3370_s11 + $0x28] sm:$0xff] }
0x2995   :  { %v1258_v14 = vpop.permute.xlu1 %1257 }
0x2996   :  { %1261 = vst.msk [vmem:[#allocation4 + $0x10] sm:$0xff] %vm107_vm0, %v1258_v14  ;;  %v1997_v14 = vld [vmem:[%s3370_s11 + $0x38] sm:$0xff] }
0x2999   :  { %v1418_v15 = vpop.permute.xlu1 %1417  ;;  %v1687_v24 = vld [vmem:[#allocation4] sm:$0xff] }
0x299a   :  { %1421 = vst.msk [vmem:[#allocation4 + $0x20] sm:$0xff] %vm107_vm0, %v1418_v15  ;;  %v3216_v15 = vld [vmem:[#allocation5 + $0x20] sm:$0xff] }
0x299d   :  { %v2557_v20 = vpop.eup %2556  ;;  %v1578_v5 = vpop.permute.xlu1 %1577  ;;  %v1689_v26 = vld [vmem:[#allocation4 + $0x10] sm:$0xff] }
0x299e   :  { %1581 = vst.msk [vmem:[#allocation4 + $0x30] sm:$0xff] %vm107_vm0, %v1578_v5  ;;  %1650 = vrot.lane.b32.xlu0 %v2557_v20, %s2632_s2  ;;  %v3221_v5 = vld [vmem:[#allocation5 + $0x30] sm:$0xff] }
0x29a1   :  { %v1691_v29 = vld [vmem:[#allocation4 + $0x20] sm:$0xff] }
0x29a2   :  { %1177 = vrot.lane.b32.xlu0 %v2982_v57, %s2632_s2 }
0x29a5   :  { %v1693_v33 = vld [vmem:[#allocation4 + $0x30] sm:$0xff] }
0x29a6   :  { %1337 = vrot.lane.b32.xlu0 %v3016_v44, %s2632_s2 }
0x29aa   :  { %1497 = vrot.lane.b32.xlu0 %v3048_v30, %s2632_s2 }
0x2a10   :  { %v1651_v61 = vpop.permute.xlu0 %1650 }
0x2a11   :  { %v1653_v21 = vmul.f32 %v1651_v61, %v1648_v18 }
0x2a13   :  { %v1655_v22 = vadd.f32 %v1654_v19, %v1653_v21 }
0x2a14   :  { %v1178_v23 = vpop.permute.xlu0 %1177 }
0x2a15   :  { %1181 = vst.msk [vmem:[#allocation4 + $0x8] sm:$0xff] %vm107_vm0, %v1178_v23  ;;  %1657 = vrot.lane.b32.xlu0 %v1655_v22, %s2632_s2  ;;  %v3235_v23 = vld [vmem:[#allocation5 + $0x38] sm:$0xff] }
0x2a18   :  { %v1338_v63 = vpop.permute.xlu0 %1337 }
0x2a19   :  { %1341 = vst.msk [vmem:[#allocation4 + $0x18] sm:$0xff] %vm107_vm0, %v1338_v63 }
0x2a1c   :  { %v1498_v57 = vpop.permute.xlu0 %1497  ;;  %v1688_v25 = vld [vmem:[#allocation4 + $0x8] sm:$0xff] }
0x2a1d   :  { %1501 = vst.msk [vmem:[#allocation4 + $0x28] sm:$0xff] %vm107_vm0, %v1498_v57  ;;  %v1695_v44 = vpack.c.bf16 %v1688_v25, %v1687_v24 }
0x2a1f   :  { %2454 = vmatprep.mubr.msk.bf16.mxu0 %vm107_vm0, %v1695_v44 }
0x2a20   :  { %v1690_v27 = vld [vmem:[#allocation4 + $0x18] sm:$0xff] }
0x2a21   :  { %v1696_v28 = vpack.c.bf16 %v1690_v27, %v1689_v26 }
0x2a23   :  { %2455 = vmatmul.mubr.msk.bf16.vlgmr.msra.gmra.mxu0 %vm107_vm0, %v1696_v28  ;;  %v1990_v28 = vld [vmem:[%s3370_s11] sm:$0xff] }
0x2a24   :  { %v1692_v30 = vld [vmem:[#allocation4 + $0x28] sm:$0xff] }
0x2a25   :  { %v1697_v31 = vpack.c.bf16 %v1692_v30, %v1691_v29 }
0x2a27   :  { %2458 = vmatprep.mubr.msk.bf16.mxu0 %vm107_vm0, %v1697_v31 }
0x2a87   :  { %v1658_v32 = vpop.permute.xlu0 %1657 }
0x2a88   :  { %1661 = vst.msk [vmem:[#allocation4 + $0x38] sm:$0xff] %vm107_vm0, %v1658_v32  ;;  %v1992_v32 = vld [vmem:[%s3370_s11 + $0x10] sm:$0xff] }
0x2a8f   :  { %v1694_v35 = vld [vmem:[#allocation4 + $0x38] sm:$0xff] }
0x2a90   :  { %v1698_v36 = vpack.c.bf16 %v1694_v35, %v1693_v33  ;;  %v1994_v35 = vld [vmem:[%s3370_s11 + $0x20] sm:$0xff] }
0x2a92   :  { %2459 = vmatmul.mubr.msk.bf16.gmra.mxu0 %vm107_vm0, %v1698_v36  ;;  %v1996_v36 = vld [vmem:[%s3370_s11 + $0x30] sm:$0xff] }
0x2ae3   :  { %v2456_v38 = vpop.f32.mrf.mxu0 }
0x2ae4   :  { %v3149_v7 = vadd.f32 %v2456_v38, %v2225_v39 }
0x2ae5   :  { %v1769_v40 = vpop.f32.mrf.mxu0 }
0x2ae6   :  { %v3140_v41 = vadd.f32 %v2225_v39, %v1769_v40 }
0x2ae7   :  { %v2457_v42 = vpop.f32.mrf.mxu0 }
0x2ae8   :  { %1808 = vmax.xlane.f32.xlu1 %v3140_v41  ;;  %v3143_v45 = vadd.f32 %v2457_v42, %v2225_v39 }
0x2ae9   :  { %v1772_v43 = vpop.f32.mrf.mxu0 }
0x2aea   :  { %v3145_v46 = vadd.f32 %v2225_v39, %v1772_v43 }
0x2aec   :  { %1810 = vmax.xlane.f32.xlu0 %v3145_v46  ;;  %1814 = vmax.xlane.f32.xlu1 %v3143_v45 }
0x2af0   :  { %1812 = vmax.xlane.f32.xlu0 %v3149_v7 }
0x2b52   :  { %v2460_v47 = vpop.f32.mrf.mxu0 }
0x2b53   :  { %v3155_v52 = vadd.f32 %v2460_v47, %v2225_v39 }
0x2b54   :  { %v1785_v48 = vpop.f32.mrf.mxu0 }
0x2b55   :  { %v3152_v49 = vadd.f32 %v2225_v39, %v1785_v48 }
0x2b56   :  { %v2461_v50 = vpop.f32.mrf.mxu0 }
0x2b57   :  { %1816 = vmax.xlane.f32.xlu0 %v3152_v49  ;;  %v3161_v54 = vadd.f32 %v2461_v50, %v2225_v39 }
0x2b58   :  { %v1788_v51 = vpop.f32.mrf.mxu0 }
0x2b59   :  { %v3157_v53 = vadd.f32 %v2225_v39, %v1788_v51 }
0x2b5b   :  { %1818 = vmax.xlane.f32.xlu1 %v3157_v53  ;;  %1820 = vmax.xlane.f32.xlu0 %v3155_v52 }
0x2b5f   :  { %1822 = vmax.xlane.f32.xlu1 %v3161_v54 }
0x2b71   :  { %v1809_v56 = vpop.xlane.xlu1 %1808 }
0x2b72   :  { %v3167_v58 = vmax.f32 %v3164_v55, %v1809_v56 }
0x2b74   :  { %v1832_v17 = vsub.f32 %v3164_v55, %v3167_v58  ;;  %1969 = vst.msk [vmem:[#allocation5] sm:$0xff] %vm1662_vm11, %v3167_v58  ;;  %1874 = vperm.xlu0 %2474, %v3167_v58  }
0x2b75   :  { %v1811_v62 = vpop.xlane.xlu0 %1810  ;;  %v1815_v0 = vpop.xlane.xlu1 %1814 }
0x2b76   :  { %v3182_v1 = vmax.f32 %v3169_v59, %v1811_v62  ;;  %v3185_v2 = vmax.f32 %v3171_v60, %v1815_v0 }
0x2b78   :  { %v1833_v6 = vsub.f32 %v3169_v59, %v3182_v1  ;;  %1970 = vst.msk [vmem:[#allocation5 + $0x8] sm:$0xff] %vm1662_vm11, %v3182_v1  ;;  %v1835_v8 = vsub.f32 %v3171_v60, %v3185_v2  ;;  %1972 = vst.msk [vmem:[#allocation5 + $0x18] sm:$0xff] %vm1662_vm11, %v3185_v2  ;;  %1879 = vperm.xlu1 %2475, %v3182_v1   ;;  %2002 = vperm.xlu0 %2474, %v1991_v4  }
0x2b79   :  { %v1813_v9 = vpop.xlane.xlu0 %1812 }
0x2b7a   :  { %v3202_v11 = vmax.f32 %v3187_v3, %v1813_v9 }
0x2b7c   :  { %v1834_v13 = vsub.f32 %v3187_v3, %v3202_v11  ;;  %1971 = vst.msk [vmem:[#allocation5 + $0x10] sm:$0xff] %vm1662_vm11, %v3202_v11  ;;  %1884 = vperm.xlu1 %2475, %v3202_v11   ;;  %2008 = vperm.xlu0 %2474, %v1993_v10  }
0x2b80   :  { %2014 = vperm.xlu0 %2474, %v1995_v12   ;;  %1889 = vperm.xlu1 %2475, %v3185_v2  }
0x2b84   :  { %2020 = vperm.xlu0 %2474, %v1997_v14  }
0x2be0   :  { %v1817_v34 = vpop.xlane.xlu0 %1816 }
0x2be1   :  { %v3219_v20 = vmax.f32 %v3216_v15, %v1817_v34 }
0x2be3   :  { %v1836_v18 = vsub.f32 %v3216_v15, %v3219_v20  ;;  %1973 = vst.msk [vmem:[#allocation5 + $0x20] sm:$0xff] %vm1662_vm11, %v3219_v20  ;;  %v1860_v15 = vld [vmem:[#allocation6 + $0x20] sm:$0xff] }
0x2be4   :  { %v1821_v61 = vpop.xlane.xlu0 %1820  ;;  %v1819_v19 = vpop.xlane.xlu1 %1818 }
0x2be5   :  { %v3230_v21 = vmax.f32 %v3221_v5, %v1821_v61  ;;  %v3233_v22 = vmax.f32 %v3223_v16, %v1819_v19  ;;  %v1848_v55 = vmul.f32 1.442695, %v1836_v18 }
0x2be7   :  { %v1838_v63 = vsub.f32 %v3221_v5, %v3230_v21  ;;  %1975 = vst.msk [vmem:[#allocation5 + $0x30] sm:$0xff] %vm1662_vm11, %v3230_v21  ;;  %v1837_v57 = vsub.f32 %v3223_v16, %v3233_v22  ;;  %1974 = vst.msk [vmem:[#allocation5 + $0x28] sm:$0xff] %vm1662_vm11, %v3233_v22  ;;  %1904 = vperm.xlu1 %2475, %v3230_v21   ;;  %v1861_v16 = vld [vmem:[#allocation6 + $0x28] sm:$0xff] }
0x2be8   :  { %v1823_v24 = vpop.xlane.xlu1 %1822 }
0x2be9   :  { %v3247_v25 = vmax.f32 %v3235_v23, %v1823_v24  ;;  %v1852_v58 = vmul.f32 1.442695, %v1838_v63  ;;  %v1850_v60 = vmul.f32 1.442695, %v1837_v57 }
0x2beb   :  { %v1839_v44 = vsub.f32 %v3235_v23, %v3247_v25  ;;  %1976 = vst.msk [vmem:[#allocation5 + $0x38] sm:$0xff] %vm1662_vm11, %v3247_v25  ;;  %1894 = vperm.xlu1 %2475, %v3219_v20  }
0x2bef   :  { %1899 = vperm.xlu1 %2475, %v3233_v22   ;;  %v1875_v39 = vpop.permute.xlu0 %1874 }
0x2bf0   :  { %v1912_v40 = vsub.f32 %v3140_v41, %v1875_v39 }
0x2bf2   :  { %v1920_v43 = vmul.f32 1.442695, %v1912_v40 }
0x2bf3   :  { %1909 = vperm.xlu1 %2475, %v3247_v25   ;;  %v1880_v26 = vpop.permute.xlu1 %1879 }
0x2bf4   :  { %v1913_v27 = vsub.f32 %v3145_v46, %v1880_v26 }
0x2bf6   :  { %v1922_v29 = vmul.f32 1.442695, %v1913_v27  ;;  %v1978_v27 = vlaneseq }
0x2bf7   :  { %1999 = vperm.xlu1 %2475, %v1990_v28   ;;  %v1885_v30 = vpop.permute.xlu1 %1884 }
0x2bf8   :  { %2558 = vpow2.f32 %v1922_v29  ;;  %v1914_v31 = vsub.f32 %v3149_v7, %v1885_v30  ;;  %v2003_v29 = vpop.permute.xlu0 %2002  ;;  %v1842_v30 = vmul.f32 1.442695, %v1833_v6 }
0x2bfa   :  { %v1924_v33 = vmul.f32 1.442695, %v1914_v31 }
0x2bfb   :  { %2005 = vperm.xlu1 %2475, %v1992_v32   ;;  %v1890_v42 = vpop.permute.xlu1 %1889 }
0x2bfc   :  { %2560 = vpow2.f32 %v1924_v33  ;;  %v1915_v47 = vsub.f32 %v3143_v45, %v1890_v42  ;;  %v1979_v33 = vand.u32 127, %v1978_v27  ;;  %v1862_v27 = vld [vmem:[#allocation6 + $0x30] sm:$0xff] }
0x2bfd   :  { %2562 = vpow2.f32 %v1920_v43  ;;  %v1857_v43 = vld [vmem:[#allocation6 + $0x8] sm:$0xff] }
0x2bfe   :  { %v1926_v48 = vmul.f32 1.442695, %v1915_v47  ;;  %vm2023_vm13 = vcmp.eq.s32.totalorder %v1979_v33, %v2003_v29 }
0x2bff   :  { %2011 = vperm.xlu1 %2475, %v1994_v35   ;;  %v2031_v59 = vsel %vm2023_vm13, %v3145_v46, 0.0 }
0x2c00   :  { %2564 = vpow2.f32 %v1926_v48 }
0x2c03   :  { %2017 = vperm.xlu1 %2475, %v1996_v36   ;;  %v1844_v36 = vmul.f32 1.442695, %v1834_v13 }
0x2c05   :  { %v2559_v37 = vpop.eup %2558 }
0x2c06   :  { %1938 = vadd.xlane.f32.xlu0 %v2559_v37  ;;  %v2009_v37 = vpop.permute.xlu0 %2008 }
0x2c07   :  { %vm2025_vm15 = vcmp.eq.s32.totalorder %v1979_v33, %v2009_v37 }
0x2c08   :  { %v2033_v11 = vsel %vm2025_vm15, %v3143_v45, 0.0  ;;  %v1858_v45 = vld [vmem:[#allocation6 + $0x10] sm:$0xff] }
0x2c09   :  { %v2561_v38 = vpop.eup %2560 }
0x2c0a   :  { %1940 = vadd.xlane.f32.xlu0 %v2561_v38  ;;  %v2563_v50 = vpop.eup %2562  ;;  %v2015_v1 = vpop.permute.xlu0 %2014 }
0x2c0b   :  { %vm2027_vm1 = vcmp.eq.s32.totalorder %v1979_v33, %v2015_v1  ;;  %v1983_v1 = vld [vmem:[#allocation7 + $0x8] sm:$0xff] }
0x2c0c   :  { %v2035_v46 = vsel %vm2027_vm1, %v3157_v53, 0.0 }
0x2c0d   :  { %v2565_v51 = vpop.eup %2564 }
0x2c0e   :  { %v2021_v13 = vpop.permute.xlu0 %2020 }
0x2c0f   :  { %vm2029_vm3 = vcmp.eq.s32.totalorder %v1979_v33, %v2021_v13 }
0x2c27   :  { %1936 = vadd.xlane.f32.xlu1 %v2563_v50 }
0x2c2b   :  { %1942 = vadd.xlane.f32.xlu1 %v2565_v51 }
0x2c62   :  { %v1905_v56 = vpop.permute.xlu1 %1904 }
0x2c63   :  { %v1918_v62 = vsub.f32 %v3155_v52, %v1905_v56 }
0x2c65   :  { %v1932_v10 = vmul.f32 1.442695, %v1918_v62 }
0x2c66   :  { %v1895_v0 = vpop.permute.xlu1 %1894 }
0x2c67   :  { %v1916_v4 = vsub.f32 %v3152_v49, %v1895_v0 }
0x2c69   :  { %v1928_v9 = vmul.f32 1.442695, %v1916_v4  ;;  %v1856_v4 = vld [vmem:[#allocation6] sm:$0xff] }
0x2c6a   :  { %v1900_v12 = vpop.permute.xlu1 %1899 }
0x2c6b   :  { %2566 = vpow2.f32 %v1928_v9  ;;  %v1917_v14 = vsub.f32 %v3157_v53, %v1900_v12  ;;  %v1846_v53 = vmul.f32 1.442695, %v1835_v8 }
0x2c6c   :  { %2568 = vpow2.f32 %v1932_v10 }
0x2c6d   :  { %v1930_v34 = vmul.f32 1.442695, %v1917_v14  ;;  %v1859_v14 = vld [vmem:[#allocation6 + $0x18] sm:$0xff] }
0x2c6e   :  { %v1910_v61 = vpop.permute.xlu1 %1909 }
0x2c6f   :  { %2570 = vpow2.f32 %v1930_v34  ;;  %v1919_v19 = vsub.f32 %v3161_v54, %v1910_v61 }
0x2c71   :  { %v1934_v24 = vmul.f32 1.442695, %v1919_v19 }
0x2c72   :  { %v2000_v26 = vpop.permute.xlu1 %1999 }
0x2c73   :  { %2572 = vpow2.f32 %v1934_v24  ;;  %vm2022_vm12 = vcmp.eq.s32.totalorder %v1979_v33, %v2000_v26 }
0x2c74   :  { %2574 = vpow2.f32 %v1842_v30  ;;  %v2030_v39 = vsel %vm2022_vm12, %v3140_v41, 0.0  ;;  %v1863_v30 = vld [vmem:[#allocation6 + $0x38] sm:$0xff] }
0x2c75   :  { %2576 = vpow2.f32 %v1844_v36 }
0x2c76   :  { %v2006_v31 = vpop.permute.xlu1 %2005 }
0x2c77   :  { %vm2024_vm14 = vcmp.eq.s32.totalorder %v1979_v33, %v2006_v31 }
0x2c78   :  { %v2567_v28 = vpop.eup %2566  ;;  %v2032_v6 = vsel %vm2024_vm14, %v3149_v7, 0.0 }
0x2c79   :  { %1944 = vadd.xlane.f32.xlu0 %v2567_v28  ;;  %v2569_v32 = vpop.eup %2568 }
0x2c7a   :  { %v2012_v40 = vpop.permute.xlu1 %2011 }
0x2c7b   :  { %vm2026_vm0 = vcmp.eq.s32.totalorder %v1979_v33, %v2012_v40 }
0x2c7c   :  { %v2571_v35 = vpop.eup %2570  ;;  %v2034_v41 = vsel %vm2026_vm0, %v3152_v49, 0.0  ;;  %v2037_v49 = vsel %vm2029_vm3, %v3161_v54, 0.0 }
0x2c7d   :  { %1948 = vadd.xlane.f32.xlu0 %v2569_v32  ;;  %1946 = vadd.xlane.f32.xlu1 %v2571_v35 }
0x2c7e   :  { %v2018_v3 = vpop.permute.xlu1 %2017 }
0x2c7f   :  { %vm2028_vm2 = vcmp.eq.s32.totalorder %v1979_v33, %v2018_v3  ;;  %v1982_v33 = vld [vmem:[#allocation7] sm:$0xff] }
0x2c80   :  { %v2573_v38 = vpop.eup %2572  ;;  %v2036_v7 = vsel %vm2028_vm2, %v3155_v52, 0.0  ;;  %v1840_v52 = vmul.f32 1.442695, %v1832_v17  ;;  %v1854_v17 = vmul.f32 1.442695, %v1839_v44 }
0x2c81   :  { %1950 = vadd.xlane.f32.xlu1 %v2573_v38  ;;  %2038 = vadd.xlane.f32.xlu0 %v2030_v39  ;;  %v2575_v42 = vpop.eup %2574 }
0x2c82   :  { %v1865_v47 = vmul.f32 %v2575_v42, %v1857_v43  ;;  %v2577_v48 = vpop.eup %2576  ;;  %2578 = vpow2.f32 %v1840_v52  ;;  %v1986_v43 = vld [vmem:[#allocation7 + $0x20] sm:$0xff] }
0x2c83   :  { %v1866_v56 = vmul.f32 %v2577_v48, %v1858_v45  ;;  %2580 = vpow2.f32 %v1846_v53  ;;  %v1988_v53 = vld [vmem:[#allocation7 + $0x30] sm:$0xff] }
0x2c84   :  { %2582 = vpow2.f32 %v1848_v55 }
0x2c85   :  { %2040 = vadd.xlane.f32.xlu1 %v2031_v59  ;;  %2042 = vadd.xlane.f32.xlu0 %v2032_v6  ;;  %2584 = vpow2.f32 %v1852_v58  ;;  %v1984_v59 = vld [vmem:[#allocation7 + $0x10] sm:$0xff]  ;;  %v2129_v58 = vld [vmem:[%s3371_s12] sm:$0xff] }
0x2c86   :  { %2586 = vpow2.f32 %v1850_v60 }
0x2c87   :  { %2588 = vpow2.f32 %v1854_v17 }
0x2c89   :  { %2044 = vadd.xlane.f32.xlu1 %v2033_v11  ;;  %2046 = vadd.xlane.f32.xlu0 %v2034_v41 }
0x2c8d   :  { %2048 = vadd.xlane.f32.xlu1 %v2035_v46  ;;  %2050 = vadd.xlane.f32.xlu0 %v2036_v7 }
0x2c8f   :  { %v1939_v50 = vpop.xlane.xlu0 %1938  ;;  %v2579_v54 = vpop.eup %2578 }
0x2c90   :  { %v1953_v51 = vadd.f32 %v1939_v50, %v1865_v47  ;;  %v1864_v9 = vmul.f32 %v2579_v54, %v1856_v4  ;;  %v2581_v10 = vpop.eup %2580  ;;  %v1985_v47 = vld [vmem:[#allocation7 + $0x18] sm:$0xff] }
0x2c91   :  { %2052 = vadd.xlane.f32.xlu1 %v2037_v49  ;;  %v1867_v61 = vmul.f32 %v2581_v10, %v1859_v14  ;;  %v2583_v8 = vpop.eup %2582 }
0x2c92   :  { %1962 = vst.msk [vmem:[#allocation6 + $0x8] sm:$0xff] %vm1662_vm11, %v1953_v51  ;;  %v2585_v5 = vpop.eup %2584  ;;  %v1868_v21 = vmul.f32 %v2583_v8, %v1860_v15  ;;  %v2073_v51 = vld [vmem:[#allocation5] sm:$0xff] }
0x2c93   :  { %v1941_v62 = vpop.xlane.xlu0 %1940  ;;  %v2587_v63 = vpop.eup %2586  ;;  %v1870_v23 = vmul.f32 %v2585_v5, %v1862_v27 }
0x2c94   :  { %v1954_v0 = vadd.f32 %v1941_v62, %v1866_v56  ;;  %v1869_v25 = vmul.f32 %v2587_v63, %v1861_v16  ;;  %v2589_v44 = vpop.eup %2588  ;;  %v2076_v63 = vld [vmem:[#allocation5 + $0x18] sm:$0xff] }
0x2c95   :  { %v1871_v35 = vmul.f32 %v2589_v44, %v1863_v30  ;;  %v2077_v30 = vld [vmem:[#allocation5 + $0x20] sm:$0xff] }
0x2c96   :  { %1963 = vst.msk [vmem:[#allocation6 + $0x10] sm:$0xff] %vm1662_vm11, %v1954_v0 }
0x2c99   :  { %v2082_v20 = vld [vmem:[#allocation6 + $0x8] sm:$0xff] }
0x2c9d   :  { %v2083_v18 = vld [vmem:[#allocation6 + $0x10] sm:$0xff] }
0x2cb0   :  { %v1937_v12 = vpop.xlane.xlu1 %1936 }
0x2cb1   :  { %v1952_v34 = vadd.f32 %v1937_v12, %v1864_v9  ;;  %v1987_v9 = vld [vmem:[#allocation7 + $0x28] sm:$0xff] }
0x2cb3   :  { %1961 = vst.msk [vmem:[#allocation6] sm:$0xff] %vm1662_vm11, %v1952_v34 }
0x2cb4   :  { %v1943_v19 = vpop.xlane.xlu1 %1942 }
0x2cb5   :  { %v1955_v24 = vadd.f32 %v1943_v19, %v1867_v61  ;;  %v2074_v19 = vld [vmem:[#allocation5 + $0x8] sm:$0xff] }
0x2cb7   :  { %1964 = vst.msk [vmem:[#allocation6 + $0x18] sm:$0xff] %vm1662_vm11, %v1955_v24  ;;  %v2075_v24 = vld [vmem:[#allocation5 + $0x10] sm:$0xff] }
0x2cba   :  { %v2081_v2 = vld [vmem:[#allocation6] sm:$0xff] }
0x2cbb   :  { %2590 = vlog2.f32 %v2081_v2  ;;  %v1989_v2 = vld [vmem:[#allocation7 + $0x38] sm:$0xff] }
0x2cbc   :  { %2592 = vlog2.f32 %v2082_v20  ;;  %v2130_v20 = vld [vmem:[%s3371_s12 + $0x8] sm:$0xff] }
0x2cbd   :  { %2594 = vlog2.f32 %v2083_v18 }
0x2cbe   :  { %v2084_v57 = vld [vmem:[#allocation6 + $0x18] sm:$0xff] }
0x2cbf   :  { %2596 = vlog2.f32 %v2084_v57 }
0x2cc8   :  { %v2591_v40 = vpop.eup %2590 }
0x2cc9   :  { %v2593_v41 = vpop.eup %2592  ;;  %v2090_v46 = vmul.f32 0.6931472, %v2591_v40  ;;  %v2133_v40 = vld [vmem:[%s3371_s12 + $0x20] sm:$0xff] }
0x2cca   :  { %v2595_v7 = vpop.eup %2594  ;;  %v2092_v56 = vmul.f32 0.6931472, %v2593_v41 }
0x2ccb   :  { %v2094_v54 = vmul.f32 0.6931472, %v2595_v7  ;;  %v2105_v4 = vadd.f32 %v2090_v46, %v2073_v51  ;;  %v2079_v46 = vld [vmem:[#allocation5 + $0x30] sm:$0xff]  ;;  %v2134_v51 = vld [vmem:[%s3371_s12 + $0x28] sm:$0xff] }
0x2ccc   :  { %v2597_v62 = vpop.eup %2596  ;;  %v2106_v8 = vadd.f32 %v2092_v56, %v2074_v19 }
0x2ccd   :  { %v2096_v55 = vmul.f32 0.6931472, %v2597_v62  ;;  %v2107_v15 = vadd.f32 %v2094_v54, %v2075_v24 }
0x2d02   :  { %v1945_v26 = vpop.xlane.xlu0 %1944 }
0x2d03   :  { %v1956_v22 = vadd.f32 %v1945_v26, %v1868_v21  ;;  %v2131_v21 = vld [vmem:[%s3371_s12 + $0x10] sm:$0xff] }
0x2d05   :  { %1965 = vst.msk [vmem:[#allocation6 + $0x20] sm:$0xff] %vm1662_vm11, %v1956_v22 }
0x2d06   :  { %v1949_v28 = vpop.xlane.xlu0 %1948  ;;  %v1947_v29 = vpop.xlane.xlu1 %1946 }
0x2d07   :  { %v1958_v31 = vadd.f32 %v1949_v28, %v1870_v23  ;;  %v1957_v32 = vadd.f32 %v1947_v29, %v1869_v25  ;;  %v2108_v23 = vadd.f32 %v2096_v55, %v2076_v63 }
0x2d09   :  { %1967 = vst.msk [vmem:[#allocation6 + $0x30] sm:$0xff] %vm1662_vm11, %v1958_v31  ;;  %1966 = vst.msk [vmem:[#allocation6 + $0x28] sm:$0xff] %vm1662_vm11, %v1957_v32  ;;  %v2132_v32 = vld [vmem:[%s3371_s12 + $0x18] sm:$0xff] }
0x2d0a   :  { %v2039_v36 = vpop.xlane.xlu0 %2038  ;;  %v1951_v37 = vpop.xlane.xlu1 %1950 }
0x2d0b   :  { %v2054_v38 = vadd.f32 %v2039_v36, %v1982_v33  ;;  %v1959_v39 = vadd.f32 %v1951_v37, %v1871_v35 }
0x2d0c   :  { %v2085_v6 = vld [vmem:[#allocation6 + $0x20] sm:$0xff] }
0x2d0d   :  { %2062 = vst.msk [vmem:[#allocation7] sm:$0xff] %vm1662_vm11, %v2054_v38  ;;  %1968 = vst.msk [vmem:[#allocation6 + $0x38] sm:$0xff] %vm1662_vm11, %v1959_v39  ;;  %2598 = vlog2.f32 %v2085_v6 }
0x2d0e   :  { %v2043_v3 = vpop.xlane.xlu0 %2042  ;;  %v2041_v11 = vpop.xlane.xlu1 %2040 }
0x2d0f   :  { %v2056_v13 = vadd.f32 %v2043_v3, %v1984_v59  ;;  %v2055_v42 = vadd.f32 %v2041_v11, %v1983_v1 }
0x2d10   :  { %v2086_v48 = vld [vmem:[#allocation6 + $0x28] sm:$0xff]  ;;  %v2087_v50 = vld [vmem:[#allocation6 + $0x30] sm:$0xff] }
0x2d11   :  { %2064 = vst.msk [vmem:[#allocation7 + $0x10] sm:$0xff] %vm1662_vm11, %v2056_v13  ;;  %2063 = vst.msk [vmem:[#allocation7 + $0x8] sm:$0xff] %vm1662_vm11, %v2055_v42  ;;  %2600 = vlog2.f32 %v2086_v48  ;;  %v2078_v13 = vld [vmem:[#allocation5 + $0x28] sm:$0xff] }
0x2d12   :  { %v2047_v45 = vpop.xlane.xlu0 %2046  ;;  %v2045_v49 = vpop.xlane.xlu1 %2044  ;;  %2602 = vlog2.f32 %v2087_v50 }
0x2d13   :  { %v2058_v0 = vadd.f32 %v2047_v45, %v1986_v43  ;;  %v2057_v52 = vadd.f32 %v2045_v49, %v1985_v47 }
0x2d14   :  { %v2088_v10 = vld [vmem:[#allocation6 + $0x38] sm:$0xff]  ;;  %v2113_v12 = vld [vmem:[#allocation7] sm:$0xff] }
0x2d15   :  { %2066 = vst.msk [vmem:[#allocation7 + $0x20] sm:$0xff] %vm1662_vm11, %v2058_v0  ;;  %2065 = vst.msk [vmem:[#allocation7 + $0x18] sm:$0xff] %vm1662_vm11, %v2057_v52  ;;  %2604 = vlog2.f32 %v2088_v10  ;;  %v2121_v14 = vsub.f32 %v2105_v4, %v2113_v12  ;;  %v2080_v4 = vld [vmem:[#allocation5 + $0x38] sm:$0xff] }
0x2d16   :  { %v2051_v34 = vpop.xlane.xlu0 %2050  ;;  %v2049_v61 = vpop.xlane.xlu1 %2048 }
0x2d17   :  { %v2060_v60 = vadd.f32 %v2051_v34, %v1988_v53  ;;  %v2059_v17 = vadd.f32 %v2049_v61, %v1987_v9  ;;  %v2137_v16 = vmul.f32 %v2129_v58, %v2121_v14  ;;  %v2135_v53 = vld [vmem:[%s3371_s12 + $0x30] sm:$0xff]  ;;  %v2136_v34 = vld [vmem:[%s3371_s12 + $0x38] sm:$0xff]  ;;  %s2606_s12 = scalar_lea.vmem %s2175_s0, 16 }
0x2d18   :  { %v2114_v18 = vld [vmem:[#allocation7 + $0x8] sm:$0xff]  ;;  %v2115_v5 = vld [vmem:[#allocation7 + $0x10] sm:$0xff]  ;;  %p2607_p0 = scmp.ne.s32.totalorder %s2175_s0, %s2606_s12  ;;  %p2612_p2 = scmp.lt.s32.totalorder %s2610_s26, %s2606_s12 }
0x2d19   :  { %2068 = vst.msk [vmem:[#allocation7 + $0x30] sm:$0xff] %vm1662_vm11, %v2060_v60  ;;  %2067 = vst.msk [vmem:[#allocation7 + $0x28] sm:$0xff] %vm1662_vm11, %v2059_v17  ;;  %v2122_v26 = vsub.f32 %v2106_v8, %v2114_v18  ;;  %v2123_v27 = vsub.f32 %v2107_v15, %v2115_v5  ;;  %v2145_v36 = vsel %vm1662_vm11, %v2137_v16, 0.0 }
0x2d1a   :  { %v2599_v22 = vpop.eup %2598  ;;  %v2053_v57 = vpop.xlane.xlu1 %2052  ;;  %p2613_p3 = por %p2612_p2, %p2611_p1 }
0x2d1b   :  { %v2061_v25 = vadd.f32 %v2053_v57, %v1989_v2  ;;  %v2098_v44 = vmul.f32 0.6931472, %v2599_v22  ;;  %v2138_v28 = vmul.f32 %v2130_v20, %v2122_v26  ;;  %v2139_v29 = vmul.f32 %v2131_v21, %v2123_v27 }
0x2d1c   :  { %v2116_v31 = vld [vmem:[#allocation7 + $0x18] sm:$0xff]  ;;  %v2117_v39 = vld [vmem:[#allocation7 + $0x20] sm:$0xff]  ;;  %p2614_p4 = pnand %p2613_p3, %p2607_p0 }
0x2d1d   :  { %2069 = vst.msk [vmem:[#allocation7 + $0x38] sm:$0xff] %vm1662_vm11, %v2061_v25  ;;  %v2109_v33 = vadd.f32 %v2098_v44, %v2077_v30  ;;  %v2124_v35 = vsub.f32 %v2108_v23, %v2116_v31  ;;  %v2146_v37 = vsel %vm1662_vm11, %v2138_v28, 0.0  ;;  %v2148_v41 = vsel %vm1662_vm11, %v2139_v29, 0.0 }
0x2d1e   :  { %v2601_v38 = vpop.eup %2600  ;;  %v2147_v59 = vadd.f32 %v2146_v37, %v2145_v36 }
0x2d1f   :  { %v2603_v1 = vpop.eup %2602  ;;  %v2100_v6 = vmul.f32 0.6931472, %v2601_v38  ;;  %v2125_v3 = vsub.f32 %v2109_v33, %v2117_v39  ;;  %v2140_v11 = vmul.f32 %v2132_v32, %v2124_v35 }
0x2d20   :  { %v2102_v42 = vmul.f32 0.6931472, %v2603_v1  ;;  %v2149_v43 = vadd.f32 %v2148_v41, %v2147_v59  ;;  %v2118_v49 = vld [vmem:[#allocation7 + $0x28] sm:$0xff]  ;;  %v2119_v0 = vld [vmem:[#allocation7 + $0x30] sm:$0xff] }
0x2d21   :  { %v2110_v7 = vadd.f32 %v2100_v6, %v2078_v13  ;;  %v2141_v47 = vmul.f32 %v2133_v40, %v2125_v3  ;;  %v2150_v48 = vsel %vm1662_vm11, %v2140_v11, 0.0 }
0x2d22   :  { %v2605_v50 = vpop.eup %2604  ;;  %v2111_v45 = vadd.f32 %v2102_v42, %v2079_v46  ;;  %v2151_v56 = vadd.f32 %v2150_v48, %v2149_v43 }
0x2d23   :  { %v2104_v62 = vmul.f32 0.6931472, %v2605_v50  ;;  %v2126_v52 = vsub.f32 %v2110_v7, %v2118_v49  ;;  %v2152_v54 = vsel %vm1662_vm11, %v2141_v47, 0.0 }
0x2d24   :  { %v2127_v9 = vsub.f32 %v2111_v45, %v2119_v0  ;;  %v2120_v14 = vld [vmem:[#allocation7 + $0x38] sm:$0xff]  ;;  %v2153_v19 = vadd.f32 %v2152_v54, %v2151_v56 }
0x2d25   :  { %v2112_v10 = vadd.f32 %v2104_v62, %v2080_v4  ;;  %v2142_v12 = vmul.f32 %v2134_v51, %v2126_v52 }
0x2d26   :  { %v2143_v61 = vmul.f32 %v2135_v53, %v2127_v9 }
0x2d27   :  { %v2128_v24 = vsub.f32 %v2112_v10, %v2120_v14  ;;  %v2154_v55 = vsel %vm1662_vm11, %v2142_v12, 0.0 }
0x2d28   :  { %v2155_v58 = vadd.f32 %v2154_v55, %v2153_v19  ;;  %v2156_v17 = vsel %vm1662_vm11, %v2143_v61, 0.0 }
0x2d29   :  { %v2144_v60 = vmul.f32 %v2136_v34, %v2128_v24 }
0x2d2a   :  { %v2157_v2 = vadd.f32 %v2156_v17, %v2155_v58 }
0x2d2b   :  { %v2158_v8 = vsel %vm1662_vm11, %v2144_v60, 0.0 }
0x2d2c   :  { %v2159_v15 = vadd.f32 %v2158_v8, %v2157_v2 }
0x2d2e   :  { %v2160_v20 = vrot.slane %v2159_v15, 4 }
0x2d30   :  { %v2161_v18 = vadd.f32 %v2160_v20, %v2159_v15 }
0x2d32   :  { %v2162_v5 = vrot.slane %v2161_v18, 2 }
0x2d34   :  { %v2163_v21 = vadd.f32 %v2162_v5, %v2161_v18 }
0x2d36   :  { %v2164_v63 = vrot.slane %v2163_v21, 1 }
0x2d38   :  { %v2165_v26 = vadd.f32 %v2164_v63, %v2163_v21 }
0x2d3a   :  { %2167 = vst.msk [vmem:[#allocation8] sm:$0x1] %vm2166_vm4, %v2165_v26 }
0x2d3b   :  { %2617 = shalt.err (!%p2614_p4)
}
0x2d3c   :  { %2177 = dma.vmem_to_hbm [thread:$0]  %s2175_s0, 16, %s3374_s15, [#allocation9]  }
0x2d3d   :  { %2626 = dma.done.wait [#allocation9], 16  }
0x2d3e   :  { %2627 = vsyncadd [#allocation9], 4294967280 }
0x2d3f   :  { %2181 = vsyncpa [#allocation9], 1 }

</bundles_post_ra>
